<compile_context>
chip_gen: v5e
topology: v5e:2x2
jax: 0.10.0
libtpu: 0.0.40
codegen_flags: <defaults>
</compile_context>

<pallas_src>
import functools

import jax
import jax.numpy as jnp
from jax.experimental import pallas as pl
from jax.experimental.pallas import tpu as pltpu

# ---- Module hyper-parameters (36x36 frames keep the conv stack valid) ------
FRAME_SIZE = (36, 36)       # (36-8)//4+1=8 -> (8-4)//2+1=3 -> (3-3)//1+1=1
N_LAST_FRAMES = 4
N_ACTIONS = 6
FILTERS = [32, 64, 64]
KERNELS = [8, 4, 3]
STRIDES = [4, 2, 1]
N_HIDDEN = 512
_OUT_PAD = 128              # lane-dense linear2 output (sliced to N_ACTIONS)


def _conv_out_sizes(frame_size):
    h, w = frame_size
    sizes = []
    for i in range(len(FILTERS)):
        h = (h - (KERNELS[i] - 1) - 1) // STRIDES[i] + 1
        w = (w - (KERNELS[i] - 1) - 1) // STRIDES[i] + 1
        sizes.append((h, w))
    return sizes


_CONV_SIZES = _conv_out_sizes(FRAME_SIZE)
N_INPUTS = FILTERS[-1] * _CONV_SIZES[-1][0] * _CONV_SIZES[-1][1]
# linear1 below folds the (trivial) NCHW flatten; final spatial must be 1x1.
assert _CONV_SIZES[-1] == (1, 1), _CONV_SIZES


# ---- The fused Pallas kernel ------------------------------------------------
def _qnet_fused_kernel(pat_ref, w1_ref, b1_ref, w2_ref, b2_ref, w3_ref, b3_ref,
                       l1_ref, l1b_ref, l2_ref, l2b_ref, out_ref,
                       lhs2_ref, lhs3_ref, *, bt):
    """Whole Q_net_Pong forward for one batch tile of `bt` samples."""
    f32, bf16 = jnp.float32, jnp.bfloat16
    (oh1, ow1), (oh2, ow2), (oh3, ow3) = _CONV_SIZES
    k2, s2 = KERNELS[1], STRIDES[1]
    k3, s3 = KERNELS[2], STRIDES[2]
    c1, c2, c3 = FILTERS

    # ---- conv1: one MXU dot (K=256), f32 bias+ReLU, single cast to bf16 ----
    # pat rows ordered (position p = i*ow1 + j, local sample b).
    h1 = jnp.dot(pat_ref[...], w1_ref[...], preferred_element_type=f32)
    h1 = jnp.maximum(h1 + b1_ref[...], 0.0).astype(bf16)      # (oh1*ow1*bt, c1)

    # ---- conv2: build lane-dense im2col in VMEM scratch, ONE dot (K=512) ---
    # lhs2 rows = (output position, sample); lanes = (kh, kw, ci).
    for oh in range(oh2):
        for ow in range(ow2):
            r = (oh * ow2 + ow) * bt
            for kh in range(k2):
                for kw in range(k2):
                    p = (s2 * oh + kh) * ow1 + (s2 * ow + kw)
                    t = kh * k2 + kw
                    lhs2_ref[r:r + bt, t * c1:(t + 1) * c1] = \
                        h1[p * bt:(p + 1) * bt, :]
    h2 = jnp.dot(lhs2_ref[...], w2_ref[...], preferred_element_type=f32)
    h2 = jnp.maximum(h2 + b2_ref[...], 0.0).astype(bf16)      # (oh2*ow2*bt, c2)

    # ---- conv3: same scheme, ONE dot (K=576) -------------------------------
    for oh in range(oh3):
        for ow in range(ow3):
            r = (oh * ow3 + ow) * bt
            for kh in range(k3):
                for kw in range(k3):
                    q = (s3 * oh + kh) * ow2 + (s3 * ow + kw)
                    t = kh * k3 + kw
                    lhs3_ref[r:r + bt, t * c2:(t + 1) * c2] = \
                        h2[q * bt:(q + 1) * bt, :]
    h3 = jnp.dot(lhs3_ref[...], w3_ref[...], preferred_element_type=f32)
    h3 = jnp.maximum(h3 + b3_ref[...], 0.0).astype(bf16)      # (bt, c3)

    # ---- linear1 (final spatial is 1x1 -> PyTorch flatten is identity) -----
    h4 = jnp.dot(h3, l1_ref[...], preferred_element_type=f32)
    h4 = jnp.maximum(h4 + l1b_ref[...], 0.0).astype(bf16)     # (bt, N_HIDDEN)

    # ---- linear2 (output padded to 128 lanes -> unmasked lane-dense store) -
    out_ref[...] = (jnp.dot(h4, l2_ref[...], preferred_element_type=f32)
                    + l2b_ref[...])


# ---- Host-side weight preparation (tiny, fused under jit) -------------------
def _prepare_operands(params):
    """PyTorch-layout params -> MXU-ready bf16 matrices + f32 biases."""
    bf16, f32 = jnp.bfloat16, jnp.float32
    c1, c2, c3 = FILTERS
    k1, k2, k3 = KERNELS
    oh3, ow3 = _CONV_SIZES[-1]

    # conv1: rows ordered (ci, kh, kw) -- matches conv_general_dilated_patches.
    w1m = jnp.transpose(params["conv0_w"], (1, 2, 3, 0)).reshape(
        N_LAST_FRAMES * k1 * k1, c1).astype(bf16)
    # conv2/conv3: rows ordered (kh, kw, ci) -- matches in-kernel im2col lanes.
    w2m = jnp.transpose(params["conv1_w"], (2, 3, 1, 0)).reshape(
        k2 * k2 * c1, c2).astype(bf16)
    w3m = jnp.transpose(params["conv2_w"], (2, 3, 1, 0)).reshape(
        k3 * k3 * c2, c3).astype(bf16)
    b1 = params["conv0_b"].reshape(1, c1).astype(f32)
    b2 = params["conv1_b"].reshape(1, c2).astype(f32)
    b3 = params["conv2_b"].reshape(1, c3).astype(f32)

    # linear1: PyTorch flattens NCHW, i.e. rows of lin1_w are ordered
    # (ci, h, w); permute to (h, w, ci) (identity here since final spatial is
    # 1x1) so the kernel consumes conv3 output directly.
    l1m = params["lin1_w"].reshape(c3, oh3, ow3, N_HIDDEN)
    l1m = jnp.transpose(l1m, (1, 2, 0, 3)).reshape(
        oh3 * ow3 * c3, N_HIDDEN).astype(bf16)
    l1b = params["lin1_b"].reshape(1, N_HIDDEN).astype(f32)

    # linear2: pad the output dim to 128 lanes with zero weights / zero bias.
    l2m = jnp.zeros((N_HIDDEN, _OUT_PAD), f32)
    l2m = l2m.at[:, :N_ACTIONS].set(params["lin2_w"]).astype(bf16)
    l2b = jnp.zeros((1, _OUT_PAD), f32).at[0, :N_ACTIONS].set(params["lin2_b"])
    return w1m, b1, w2m, b2, w3m, b3, l1m, l1b, l2m, l2b


# ---- Forward pass (matches Q_net_Pong.forward) ------------------------------
def forward(params, x):
    x = jnp.asarray(x, jnp.float32).reshape(
        -1, N_LAST_FRAMES, FRAME_SIZE[0], FRAME_SIZE[1])
    batch = x.shape[0]

    # Batch tile: multiple of 16 (bf16 sublane packing); >=2 grid steps for
    # mid-size batches (v7x megacore); capped at 128 (fits v5e's 16 MiB
    # default scoped VMEM with the bf16 pat double-buffer).
    if batch <= 16:
        bt = 16
    else:
        bt = min(128, 16 * pl.cdiv(batch, 32))
    nb = pl.cdiv(batch, bt)
    b_pad = nb * bt
    if b_pad != batch:                        # zero-pad; padded rows sliced off
        x = jnp.concatenate(
            [x, jnp.zeros((b_pad - batch,) + x.shape[1:], x.dtype)], axis=0)

    k1, s1 = KERNELS[0], STRIDES[0]
    (oh1, ow1), (oh2, ow2), (oh3, ow3) = _CONV_SIZES
    npos1 = oh1 * ow1
    c1k = N_LAST_FRAMES * k1 * k1

    # conv1 im2col on the host: ONE identity-kernel conv, feature-last (NHWC)
    # and already bf16, so the only relayout swaps (sample, position) with the
    # 256-wide feature axis kept contiguous.  Feature order is (ci, kh, kw).
    x_nhwc = jnp.transpose(x.astype(jnp.bfloat16), (0, 2, 3, 1))
    pat = jax.lax.conv_general_dilated_patches(
        x_nhwc, filter_shape=(k1, k1), window_strides=(s1, s1),
        padding="VALID", dimension_numbers=("NHWC", "HWIO", "NHWC"))
    # (b_pad, oh1, ow1, c1k) -> rows ordered (block, position, local sample).
    pat = pat.reshape(nb, bt, npos1, c1k)
    pat = jnp.transpose(pat, (0, 2, 1, 3)).reshape(nb * npos1 * bt, c1k)

    operands = _prepare_operands(params)
    w1m, b1, w2m, b2, w3m, b3, l1m, l1b, l2m, l2b = operands

    # Advisory cost estimate so XLA schedules the host-side staging around the
    # custom call instead of serializing.
    flops = 2 * b_pad * (
        npos1 * c1k * FILTERS[0]
        + oh2 * ow2 * KERNELS[1] ** 2 * FILTERS[0] * FILTERS[1]
        + oh3 * ow3 * KERNELS[2] ** 2 * FILTERS[1] * FILTERS[2]
        + N_INPUTS * N_HIDDEN + N_HIDDEN * _OUT_PAD)
    bytes_accessed = (pat.size * pat.dtype.itemsize
                      + b_pad * _OUT_PAD * 4
                      + sum(int(o.size) * o.dtype.itemsize for o in operands))

    const = lambda i: (0, 0)    # weights/biases: VMEM-resident across the grid
    out = pl.pallas_call(
        functools.partial(_qnet_fused_kernel, bt=bt),
        out_shape=jax.ShapeDtypeStruct((b_pad, _OUT_PAD), jnp.float32),
        grid=(nb,),
        in_specs=[
            pl.BlockSpec((npos1 * bt, c1k), lambda i: (i, 0)),
            pl.BlockSpec(w1m.shape, const), pl.BlockSpec(b1.shape, const),
            pl.BlockSpec(w2m.shape, const), pl.BlockSpec(b2.shape, const),
            pl.BlockSpec(w3m.shape, const), pl.BlockSpec(b3.shape, const),
            pl.BlockSpec(l1m.shape, const), pl.BlockSpec(l1b.shape, const),
            pl.BlockSpec(l2m.shape, const), pl.BlockSpec(l2b.shape, const),
        ],
        out_specs=pl.BlockSpec((bt, _OUT_PAD), lambda i: (i, 0)),
        scratch_shapes=[
            pltpu.VMEM((oh2 * ow2 * bt, KERNELS[1] ** 2 * FILTERS[0]),
                       jnp.bfloat16),                       # conv2 im2col
            pltpu.VMEM((oh3 * ow3 * bt, KERNELS[2] ** 2 * FILTERS[1]),
                       jnp.bfloat16),                       # conv3 im2col
        ],
        compiler_params=pltpu.CompilerParams(
            dimension_semantics=("parallel",),
            vmem_limit_bytes=32 * 1024 * 1024),
        cost_estimate=pl.CostEstimate(flops=flops, transcendentals=0,
                                      bytes_accessed=bytes_accessed),
    )(pat, w1m, b1, w2m, b2, w3m, b3, l1m, l1b, l2m, l2b)
    return out[:batch, :N_ACTIONS]


# ---- Parameter initialization (deterministic, PyTorch-like uniform) --------
def init_params(key):
    params = {}
    c_in = N_LAST_FRAMES
    for i in range(len(FILTERS)):
        key, kw, kb = jax.random.split(key, 3)
        fan_in = c_in * KERNELS[i] * KERNELS[i]
        bound = 1.0 / jnp.sqrt(fan_in)
        params[f"conv{i}_w"] = jax.random.uniform(
            kw, (FILTERS[i], c_in, KERNELS[i], KERNELS[i]),
            jnp.float32, -bound, bound)
        params[f"conv{i}_b"] = jax.random.uniform(
            kb, (FILTERS[i],), jnp.float32, -bound, bound)
        c_in = FILTERS[i]

    key, kw, kb = jax.random.split(key, 3)
    bound = 1.0 / jnp.sqrt(N_INPUTS)
    params["lin1_w"] = jax.random.uniform(
        kw, (N_INPUTS, N_HIDDEN), jnp.float32, -bound, bound)
    params["lin1_b"] = jax.random.uniform(
        kb, (N_HIDDEN,), jnp.float32, -bound, bound)

    key, kw, kb = jax.random.split(key, 3)
    bound = 1.0 / jnp.sqrt(N_HIDDEN)
    params["lin2_w"] = jax.random.uniform(
        kw, (N_HIDDEN, N_ACTIONS), jnp.float32, -bound, bound)
    params["lin2_b"] = jax.random.uniform(
        kb, (N_ACTIONS,), jnp.float32, -bound, bound)
    return params


# ---- Plain-JAX f32 reference (mirrors the PyTorch module) -------------------
def _reference_forward(params, x):
    hi = jax.lax.Precision.HIGHEST
    x = jnp.asarray(x, jnp.float32).reshape(
        -1, N_LAST_FRAMES, FRAME_SIZE[0], FRAME_SIZE[1])
    h = x
    for i in range(len(FILTERS)):
        h = jax.lax.conv_general_dilated(
            h, params[f"conv{i}_w"], (STRIDES[i], STRIDES[i]), "VALID",
            dimension_numbers=("NCHW", "OIHW", "NCHW"), precision=hi)
        h = jnp.maximum(h + params[f"conv{i}_b"][None, :, None, None], 0.0)
    h = h.reshape(h.shape[0], -1)
    h = jnp.maximum(
        jnp.dot(h, params["lin1_w"], precision=hi) + params["lin1_b"], 0.0)
    return jnp.dot(h, params["lin2_w"], precision=hi) + params["lin2_b"]


if __name__ == "__main__":
    key = jax.random.PRNGKey(0)
    key_p, key_x = jax.random.split(key)
    params = init_params(key_p)

    batch = 2
    x = jax.random.uniform(
        key_x, (batch, N_LAST_FRAMES, FRAME_SIZE[0], FRAME_SIZE[1]),
        jnp.float32)

    out = jax.jit(forward)(params, x)
    out = jax.block_until_ready(out)
    assert out.shape == (batch, N_ACTIONS), out.shape

    # Tightened check vs the f32 reference (kernel matmuls run in bf16,
    # expected max-abs relative error ~1e-2; any tap/feature-ordering bug
    # would blow far past this).
    ref = _reference_forward(params, x)
    err = float(jnp.max(jnp.abs(out - ref)))
    scale = float(jnp.max(jnp.abs(ref))) + 1e-9
    assert err <= 0.05 * scale + 1e-3, f"max abs err {err} (scale {scale})"

    print("KERNEL_OK")
</pallas_src>

<mosaic_0001>
module attributes {stable_mosaic.version = 11 : i64} {
  func.func @_qnet_fused_kernel(%arg0: i32, %arg1: memref<1024x256xbf16, #tpu.memory_space<vmem>>, %arg2: memref<256x32xbf16, #tpu.memory_space<vmem>>, %arg3: memref<1x32xf32, #tpu.memory_space<vmem>>, %arg4: memref<512x64xbf16, #tpu.memory_space<vmem>>, %arg5: memref<1x64xf32, #tpu.memory_space<vmem>>, %arg6: memref<576x64xbf16, #tpu.memory_space<vmem>>, %arg7: memref<1x64xf32, #tpu.memory_space<vmem>>, %arg8: memref<64x512xbf16, #tpu.memory_space<vmem>>, %arg9: memref<1x512xf32, #tpu.memory_space<vmem>>, %arg10: memref<512x128xbf16, #tpu.memory_space<vmem>>, %arg11: memref<1x128xf32, #tpu.memory_space<vmem>>, %arg12: memref<16x128xf32, #tpu.memory_space<vmem>>, %arg13: memref<144x512xbf16, #tpu.memory_space<vmem>>, %arg14: memref<16x576xbf16, #tpu.memory_space<vmem>>) attributes {dimension_semantics = [#tpu.dimension_semantics<parallel>], iteration_bounds = array<i64: 1>, scalar_prefetch = 0 : i64, scratch_operands = 2 : i64, tpu.core_type = #tpu.core_type<tc>, window_params = [{transform_indices = @transform_0, window_bounds = array<i64: 1024, 256>}, {pipeline_mode = #tpu.pipeline_mode<synchronous>, transform_indices = @transform_1, window_bounds = array<i64: 256, 32>}, {pipeline_mode = #tpu.pipeline_mode<synchronous>, transform_indices = @transform_2, window_bounds = array<i64: 1, 32>}, {pipeline_mode = #tpu.pipeline_mode<synchronous>, transform_indices = @transform_3, window_bounds = array<i64: 512, 64>}, {pipeline_mode = #tpu.pipeline_mode<synchronous>, transform_indices = @transform_4, window_bounds = array<i64: 1, 64>}, {pipeline_mode = #tpu.pipeline_mode<synchronous>, transform_indices = @transform_5, window_bounds = array<i64: 576, 64>}, {pipeline_mode = #tpu.pipeline_mode<synchronous>, transform_indices = @transform_6, window_bounds = array<i64: 1, 64>}, {pipeline_mode = #tpu.pipeline_mode<synchronous>, transform_indices = @transform_7, window_bounds = array<i64: 64, 512>}, {pipeline_mode = #tpu.pipeline_mode<synchronous>, transform_indices = @transform_8, window_bounds = array<i64: 1, 512>}, {pipeline_mode = #tpu.pipeline_mode<synchronous>, transform_indices = @transform_9, window_bounds = array<i64: 512, 128>}, {pipeline_mode = #tpu.pipeline_mode<synchronous>, transform_indices = @transform_10, window_bounds = array<i64: 1, 128>}, {transform_indices = @transform_11, window_bounds = array<i64: 16, 128>}]} {
    %c0 = arith.constant 0 : index
    %c0_0 = arith.constant 0 : index
    %0 = vector.load %arg1[%c0, %c0_0] : memref<1024x256xbf16, #tpu.memory_space<vmem>>, vector<1024x256xbf16>
    %c0_1 = arith.constant 0 : index
    %c0_2 = arith.constant 0 : index
    %1 = vector.load %arg2[%c0_1, %c0_2] : memref<256x32xbf16, #tpu.memory_space<vmem>>, vector<256x32xbf16>
    %cst = arith.constant dense<0.000000e+00> : vector<1024x32xf32>
    %2 = tpu.matmul %0, %1, %cst {dimension_numbers = #tpu.dot_dimension_numbers<[1], [0], [0], [1], [0, 0, 1, 1], [], []>} : vector<1024x256xbf16>, vector<256x32xbf16>, vector<1024x32xf32> -> vector<1024x32xf32>
    %c0_3 = arith.constant 0 : index
    %c0_4 = arith.constant 0 : index
    %3 = vector.load %arg3[%c0_3, %c0_4] : memref<1x32xf32, #tpu.memory_space<vmem>>, vector<1x32xf32>
    %4 = vector.broadcast %3 : vector<1x32xf32> to vector<1024x32xf32>
    %5 = arith.addf %2, %4 : vector<1024x32xf32>
    %cst_5 = arith.constant 0.000000e+00 : f32
    %6 = vector.broadcast %cst_5 : f32 to vector<1024x32xf32>
    %7 = arith.maximumf %5, %6 : vector<1024x32xf32>
    %8 = arith.truncf %7 : vector<1024x32xf32> to vector<1024x32xbf16>
    %9 = vector.extract_strided_slice %8 {offsets = [0, 0], sizes = [16, 32], strides = [1, 1]} : vector<1024x32xbf16> to vector<16x32xbf16>
    %c0_6 = arith.constant 0 : index
    %c0_7 = arith.constant 0 : index
    %10 = vector.load %arg13[%c0_6, %c0_7] : memref<144x512xbf16, #tpu.memory_space<vmem>>, vector<16x32xbf16>
    tpu.vector_store %arg13[%c0_6, %c0_7], %9 {strides = array<i32>} : memref<144x512xbf16, #tpu.memory_space<vmem>>, vector<16x32xbf16>,
    %11 = vector.extract_strided_slice %8 {offsets = [16, 0], sizes = [16, 32], strides = [1, 1]} : vector<1024x32xbf16> to vector<16x32xbf16>
    %c0_8 = arith.constant 0 : index
    %c32 = arith.constant 32 : index
    %12 = vector.load %arg13[%c0_8, %c32] : memref<144x512xbf16, #tpu.memory_space<vmem>>, vector<16x32xbf16>
    tpu.vector_store %arg13[%c0_8, %c32], %11 {strides = array<i32>} : memref<144x512xbf16, #tpu.memory_space<vmem>>, vector<16x32xbf16>,
    %13 = vector.extract_strided_slice %8 {offsets = [32, 0], sizes = [16, 32], strides = [1, 1]} : vector<1024x32xbf16> to vector<16x32xbf16>
    %c0_9 = arith.constant 0 : index
    %c64 = arith.constant 64 : index
    %14 = vector.load %arg13[%c0_9, %c64] : memref<144x512xbf16, #tpu.memory_space<vmem>>, vector<16x32xbf16>
    tpu.vector_store %arg13[%c0_9, %c64], %13 {strides = array<i32>} : memref<144x512xbf16, #tpu.memory_space<vmem>>, vector<16x32xbf16>,
    %15 = vector.extract_strided_slice %8 {offsets = [48, 0], sizes = [16, 32], strides = [1, 1]} : vector<1024x32xbf16> to vector<16x32xbf16>
    %c0_10 = arith.constant 0 : index
    %c96 = arith.constant 96 : index
    %16 = vector.load %arg13[%c0_10, %c96] : memref<144x512xbf16, #tpu.memory_space<vmem>>, vector<16x32xbf16>
    tpu.vector_store %arg13[%c0_10, %c96], %15 {strides = array<i32>} : memref<144x512xbf16, #tpu.memory_space<vmem>>, vector<16x32xbf16>,
    %17 = vector.extract_strided_slice %8 {offsets = [128, 0], sizes = [16, 32], strides = [1, 1]} : vector<1024x32xbf16> to vector<16x32xbf16>
    %c0_11 = arith.constant 0 : index
    %c128 = arith.constant 128 : index
    %18 = vector.load %arg13[%c0_11, %c128] : memref<144x512xbf16, #tpu.memory_space<vmem>>, vector<16x32xbf16>
    tpu.vector_store %arg13[%c0_11, %c128], %17 {strides = array<i32>} : memref<144x512xbf16, #tpu.memory_space<vmem>>, vector<16x32xbf16>,
    %19 = vector.extract_strided_slice %8 {offsets = [144, 0], sizes = [16, 32], strides = [1, 1]} : vector<1024x32xbf16> to vector<16x32xbf16>
    %c0_12 = arith.constant 0 : index
    %c160 = arith.constant 160 : index
    %20 = vector.load %arg13[%c0_12, %c160] : memref<144x512xbf16, #tpu.memory_space<vmem>>, vector<16x32xbf16>
    tpu.vector_store %arg13[%c0_12, %c160], %19 {strides = array<i32>} : memref<144x512xbf16, #tpu.memory_space<vmem>>, vector<16x32xbf16>,
    %21 = vector.extract_strided_slice %8 {offsets = [160, 0], sizes = [16, 32], strides = [1, 1]} : vector<1024x32xbf16> to vector<16x32xbf16>
    %c0_13 = arith.constant 0 : index
    %c192 = arith.constant 192 : index
    %22 = vector.load %arg13[%c0_13, %c192] : memref<144x512xbf16, #tpu.memory_space<vmem>>, vector<16x32xbf16>
    tpu.vector_store %arg13[%c0_13, %c192], %21 {strides = array<i32>} : memref<144x512xbf16, #tpu.memory_space<vmem>>, vector<16x32xbf16>,
    %23 = vector.extract_strided_slice %8 {offsets = [176, 0], sizes = [16, 32], strides = [1, 1]} : vector<1024x32xbf16> to vector<16x32xbf16>
    %c0_14 = arith.constant 0 : index
    %c224 = arith.constant 224 : index
    %24 = vector.load %arg13[%c0_14, %c224] : memref<144x512xbf16, #tpu.memory_space<vmem>>, vector<16x32xbf16>
    tpu.vector_store %arg13[%c0_14, %c224], %23 {strides = array<i32>} : memref<144x512xbf16, #tpu.memory_space<vmem>>, vector<16x32xbf16>,
    %25 = vector.extract_strided_slice %8 {offsets = [256, 0], sizes = [16, 32], strides = [1, 1]} : vector<1024x32xbf16> to vector<16x32xbf16>
    %c0_15 = arith.constant 0 : index
    %c256 = arith.constant 256 : index
    %26 = vector.load %arg13[%c0_15, %c256] : memref<144x512xbf16, #tpu.memory_space<vmem>>, vector<16x32xbf16>
    tpu.vector_store %arg13[%c0_15, %c256], %25 {strides = array<i32>} : memref<144x512xbf16, #tpu.memory_space<vmem>>, vector<16x32xbf16>,
    %27 = vector.extract_strided_slice %8 {offsets = [272, 0], sizes = [16, 32], strides = [1, 1]} : vector<1024x32xbf16> to vector<16x32xbf16>
    %c0_16 = arith.constant 0 : index
    %c288 = arith.constant 288 : index
    %28 = vector.load %arg13[%c0_16, %c288] : memref<144x512xbf16, #tpu.memory_space<vmem>>, vector<16x32xbf16>
    tpu.vector_store %arg13[%c0_16, %c288], %27 {strides = array<i32>} : memref<144x512xbf16, #tpu.memory_space<vmem>>, vector<16x32xbf16>,
    %29 = vector.extract_strided_slice %8 {offsets = [288, 0], sizes = [16, 32], strides = [1, 1]} : vector<1024x32xbf16> to vector<16x32xbf16>
    %c0_17 = arith.constant 0 : index
    %c320 = arith.constant 320 : index
    %30 = vector.load %arg13[%c0_17, %c320] : memref<144x512xbf16, #tpu.memory_space<vmem>>, vector<16x32xbf16>
    tpu.vector_store %arg13[%c0_17, %c320], %29 {strides = array<i32>} : memref<144x512xbf16, #tpu.memory_space<vmem>>, vector<16x32xbf16>,
    %31 = vector.extract_strided_slice %8 {offsets = [304, 0], sizes = [16, 32], strides = [1, 1]} : vector<1024x32xbf16> to vector<16x32xbf16>
    %c0_18 = arith.constant 0 : index
    %c352 = arith.constant 352 : index
    %32 = vector.load %arg13[%c0_18, %c352] : memref<144x512xbf16, #tpu.memory_space<vmem>>, vector<16x32xbf16>
    tpu.vector_store %arg13[%c0_18, %c352], %31 {strides = array<i32>} : memref<144x512xbf16, #tpu.memory_space<vmem>>, vector<16x32xbf16>,
    %33 = vector.extract_strided_slice %8 {offsets = [384, 0], sizes = [16, 32], strides = [1, 1]} : vector<1024x32xbf16> to vector<16x32xbf16>
    %c0_19 = arith.constant 0 : index
    %c384 = arith.constant 384 : index
    %34 = vector.load %arg13[%c0_19, %c384] : memref<144x512xbf16, #tpu.memory_space<vmem>>, vector<16x32xbf16>
    tpu.vector_store %arg13[%c0_19, %c384], %33 {strides = array<i32>} : memref<144x512xbf16, #tpu.memory_space<vmem>>, vector<16x32xbf16>,
    %35 = vector.extract_strided_slice %8 {offsets = [400, 0], sizes = [16, 32], strides = [1, 1]} : vector<1024x32xbf16> to vector<16x32xbf16>
    %c0_20 = arith.constant 0 : index
    %c416 = arith.constant 416 : index
    %36 = vector.load %arg13[%c0_20, %c416] : memref<144x512xbf16, #tpu.memory_space<vmem>>, vector<16x32xbf16>
    tpu.vector_store %arg13[%c0_20, %c416], %35 {strides = array<i32>} : memref<144x512xbf16, #tpu.memory_space<vmem>>, vector<16x32xbf16>,
    %37 = vector.extract_strided_slice %8 {offsets = [416, 0], sizes = [16, 32], strides = [1, 1]} : vector<1024x32xbf16> to vector<16x32xbf16>
    %c0_21 = arith.constant 0 : index
    %c448 = arith.constant 448 : index
    %38 = vector.load %arg13[%c0_21, %c448] : memref<144x512xbf16, #tpu.memory_space<vmem>>, vector<16x32xbf16>
    tpu.vector_store %arg13[%c0_21, %c448], %37 {strides = array<i32>} : memref<144x512xbf16, #tpu.memory_space<vmem>>, vector<16x32xbf16>,
    %39 = vector.extract_strided_slice %8 {offsets = [432, 0], sizes = [16, 32], strides = [1, 1]} : vector<1024x32xbf16> to vector<16x32xbf16>
    %c0_22 = arith.constant 0 : index
    %c480 = arith.constant 480 : index
    %40 = vector.load %arg13[%c0_22, %c480] : memref<144x512xbf16, #tpu.memory_space<vmem>>, vector<16x32xbf16>
    tpu.vector_store %arg13[%c0_22, %c480], %39 {strides = array<i32>} : memref<144x512xbf16, #tpu.memory_space<vmem>>, vector<16x32xbf16>,
    %41 = vector.extract_strided_slice %8 {offsets = [32, 0], sizes = [16, 32], strides = [1, 1]} : vector<1024x32xbf16> to vector<16x32xbf16>
    %c16 = arith.constant 16 : index
    %c0_23 = arith.constant 0 : index
    %42 = vector.load %arg13[%c16, %c0_23] : memref<144x512xbf16, #tpu.memory_space<vmem>>, vector<16x32xbf16>
    tpu.vector_store %arg13[%c16, %c0_23], %41 {strides = array<i32>} : memref<144x512xbf16, #tpu.memory_space<vmem>>, vector<16x32xbf16>,
    %43 = vector.extract_strided_slice %8 {offsets = [48, 0], sizes = [16, 32], strides = [1, 1]} : vector<1024x32xbf16> to vector<16x32xbf16>
    %c16_24 = arith.constant 16 : index
    %c32_25 = arith.constant 32 : index
    %44 = vector.load %arg13[%c16_24, %c32_25] : memref<144x512xbf16, #tpu.memory_space<vmem>>, vector<16x32xbf16>
    tpu.vector_store %arg13[%c16_24, %c32_25], %43 {strides = array<i32>} : memref<144x512xbf16, #tpu.memory_space<vmem>>, vector<16x32xbf16>,
    %45 = vector.extract_strided_slice %8 {offsets = [64, 0], sizes = [16, 32], strides = [1, 1]} : vector<1024x32xbf16> to vector<16x32xbf16>
    %c16_26 = arith.constant 16 : index
    %c64_27 = arith.constant 64 : index
    %46 = vector.load %arg13[%c16_26, %c64_27] : memref<144x512xbf16, #tpu.memory_space<vmem>>, vector<16x32xbf16>
    tpu.vector_store %arg13[%c16_26, %c64_27], %45 {strides = array<i32>} : memref<144x512xbf16, #tpu.memory_space<vmem>>, vector<16x32xbf16>,
    %47 = vector.extract_strided_slice %8 {offsets = [80, 0], sizes = [16, 32], strides = [1, 1]} : vector<1024x32xbf16> to vector<16x32xbf16>
    %c16_28 = arith.constant 16 : index
    %c96_29 = arith.constant 96 : index
    %48 = vector.load %arg13[%c16_28, %c96_29] : memref<144x512xbf16, #tpu.memory_space<vmem>>, vector<16x32xbf16>
    tpu.vector_store %arg13[%c16_28, %c96_29], %47 {strides = array<i32>} : memref<144x512xbf16, #tpu.memory_space<vmem>>, vector<16x32xbf16>,
    %49 = vector.extract_strided_slice %8 {offsets = [160, 0], sizes = [16, 32], strides = [1, 1]} : vector<1024x32xbf16> to vector<16x32xbf16>
    %c16_30 = arith.constant 16 : index
    %c128_31 = arith.constant 128 : index
    %50 = vector.load %arg13[%c16_30, %c128_31] : memref<144x512xbf16, #tpu.memory_space<vmem>>, vector<16x32xbf16>
    tpu.vector_store %arg13[%c16_30, %c128_31], %49 {strides = array<i32>} : memref<144x512xbf16, #tpu.memory_space<vmem>>, vector<16x32xbf16>,
    %51 = vector.extract_strided_slice %8 {offsets = [176, 0], sizes = [16, 32], strides = [1, 1]} : vector<1024x32xbf16> to vector<16x32xbf16>
    %c16_32 = arith.constant 16 : index
    %c160_33 = arith.constant 160 : index
    %52 = vector.load %arg13[%c16_32, %c160_33] : memref<144x512xbf16, #tpu.memory_space<vmem>>, vector<16x32xbf16>
    tpu.vector_store %arg13[%c16_32, %c160_33], %51 {strides = array<i32>} : memref<144x512xbf16, #tpu.memory_space<vmem>>, vector<16x32xbf16>,
    %53 = vector.extract_strided_slice %8 {offsets = [192, 0], sizes = [16, 32], strides = [1, 1]} : vector<1024x32xbf16> to vector<16x32xbf16>
    %c16_34 = arith.constant 16 : index
    %c192_35 = arith.constant 192 : index
    %54 = vector.load %arg13[%c16_34, %c192_35] : memref<144x512xbf16, #tpu.memory_space<vmem>>, vector<16x32xbf16>
    tpu.vector_store %arg13[%c16_34, %c192_35], %53 {strides = array<i32>} : memref<144x512xbf16, #tpu.memory_space<vmem>>, vector<16x32xbf16>,
    %55 = vector.extract_strided_slice %8 {offsets = [208, 0], sizes = [16, 32], strides = [1, 1]} : vector<1024x32xbf16> to vector<16x32xbf16>
    %c16_36 = arith.constant 16 : index
    %c224_37 = arith.constant 224 : index
    %56 = vector.load %arg13[%c16_36, %c224_37] : memref<144x512xbf16, #tpu.memory_space<vmem>>, vector<16x32xbf16>
    tpu.vector_store %arg13[%c16_36, %c224_37], %55 {strides = array<i32>} : memref<144x512xbf16, #tpu.memory_space<vmem>>, vector<16x32xbf16>,
    %57 = vector.extract_strided_slice %8 {offsets = [288, 0], sizes = [16, 32], strides = [1, 1]} : vector<1024x32xbf16> to vector<16x32xbf16>
    %c16_38 = arith.constant 16 : index
    %c256_39 = arith.constant 256 : index
    %58 = vector.load %arg13[%c16_38, %c256_39] : memref<144x512xbf16, #tpu.memory_space<vmem>>, vector<16x32xbf16>
    tpu.vector_store %arg13[%c16_38, %c256_39], %57 {strides = array<i32>} : memref<144x512xbf16, #tpu.memory_space<vmem>>, vector<16x32xbf16>,
    %59 = vector.extract_strided_slice %8 {offsets = [304, 0], sizes = [16, 32], strides = [1, 1]} : vector<1024x32xbf16> to vector<16x32xbf16>
    %c16_40 = arith.constant 16 : index
    %c288_41 = arith.constant 288 : index
    %60 = vector.load %arg13[%c16_40, %c288_41] : memref<144x512xbf16, #tpu.memory_space<vmem>>, vector<16x32xbf16>
    tpu.vector_store %arg13[%c16_40, %c288_41], %59 {strides = array<i32>} : memref<144x512xbf16, #tpu.memory_space<vmem>>, vector<16x32xbf16>,
    %61 = vector.extract_strided_slice %8 {offsets = [320, 0], sizes = [16, 32], strides = [1, 1]} : vector<1024x32xbf16> to vector<16x32xbf16>
    %c16_42 = arith.constant 16 : index
    %c320_43 = arith.constant 320 : index
    %62 = vector.load %arg13[%c16_42, %c320_43] : memref<144x512xbf16, #tpu.memory_space<vmem>>, vector<16x32xbf16>
    tpu.vector_store %arg13[%c16_42, %c320_43], %61 {strides = array<i32>} : memref<144x512xbf16, #tpu.memory_space<vmem>>, vector<16x32xbf16>,
    %63 = vector.extract_strided_slice %8 {offsets = [336, 0], sizes = [16, 32], strides = [1, 1]} : vector<1024x32xbf16> to vector<16x32xbf16>
    %c16_44 = arith.constant 16 : index
    %c352_45 = arith.constant 352 : index
    %64 = vector.load %arg13[%c16_44, %c352_45] : memref<144x512xbf16, #tpu.memory_space<vmem>>, vector<16x32xbf16>
    tpu.vector_store %arg13[%c16_44, %c352_45], %63 {strides = array<i32>} : memref<144x512xbf16, #tpu.memory_space<vmem>>, vector<16x32xbf16>,
    %65 = vector.extract_strided_slice %8 {offsets = [416, 0], sizes = [16, 32], strides = [1, 1]} : vector<1024x32xbf16> to vector<16x32xbf16>
    %c16_46 = arith.constant 16 : index
    %c384_47 = arith.constant 384 : index
    %66 = vector.load %arg13[%c16_46, %c384_47] : memref<144x512xbf16, #tpu.memory_space<vmem>>, vector<16x32xbf16>
    tpu.vector_store %arg13[%c16_46, %c384_47], %65 {strides = array<i32>} : memref<144x512xbf16, #tpu.memory_space<vmem>>, vector<16x32xbf16>,
    %67 = vector.extract_strided_slice %8 {offsets = [432, 0], sizes = [16, 32], strides = [1, 1]} : vector<1024x32xbf16> to vector<16x32xbf16>
    %c16_48 = arith.constant 16 : index
    %c416_49 = arith.constant 416 : index
    %68 = vector.load %arg13[%c16_48, %c416_49] : memref<144x512xbf16, #tpu.memory_space<vmem>>, vector<16x32xbf16>
    tpu.vector_store %arg13[%c16_48, %c416_49], %67 {strides = array<i32>} : memref<144x512xbf16, #tpu.memory_space<vmem>>, vector<16x32xbf16>,
    %69 = vector.extract_strided_slice %8 {offsets = [448, 0], sizes = [16, 32], strides = [1, 1]} : vector<1024x32xbf16> to vector<16x32xbf16>
    %c16_50 = arith.constant 16 : index
    %c448_51 = arith.constant 448 : index
    %70 = vector.load %arg13[%c16_50, %c448_51] : memref<144x512xbf16, #tpu.memory_space<vmem>>, vector<16x32xbf16>
    tpu.vector_store %arg13[%c16_50, %c448_51], %69 {strides = array<i32>} : memref<144x512xbf16, #tpu.memory_space<vmem>>, vector<16x32xbf16>,
    %71 = vector.extract_strided_slice %8 {offsets = [464, 0], sizes = [16, 32], strides = [1, 1]} : vector<1024x32xbf16> to vector<16x32xbf16>
    %c16_52 = arith.constant 16 : index
    %c480_53 = arith.constant 480 : index
    %72 = vector.load %arg13[%c16_52, %c480_53] : memref<144x512xbf16, #tpu.memory_space<vmem>>, vector<16x32xbf16>
    tpu.vector_store %arg13[%c16_52, %c480_53], %71 {strides = array<i32>} : memref<144x512xbf16, #tpu.memory_space<vmem>>, vector<16x32xbf16>,
    %73 = vector.extract_strided_slice %8 {offsets = [64, 0], sizes = [16, 32], strides = [1, 1]} : vector<1024x32xbf16> to vector<16x32xbf16>
    %c32_54 = arith.constant 32 : index
    %c0_55 = arith.constant 0 : index
    %74 = vector.load %arg13[%c32_54, %c0_55] : memref<144x512xbf16, #tpu.memory_space<vmem>>, vector<16x32xbf16>
    tpu.vector_store %arg13[%c32_54, %c0_55], %73 {strides = array<i32>} : memref<144x512xbf16, #tpu.memory_space<vmem>>, vector<16x32xbf16>,
    %75 = vector.extract_strided_slice %8 {offsets = [80, 0], sizes = [16, 32], strides = [1, 1]} : vector<1024x32xbf16> to vector<16x32xbf16>
    %c32_56 = arith.constant 32 : index
    %c32_57 = arith.constant 32 : index
    %76 = vector.load %arg13[%c32_56, %c32_57] : memref<144x512xbf16, #tpu.memory_space<vmem>>, vector<16x32xbf16>
    tpu.vector_store %arg13[%c32_56, %c32_57], %75 {strides = array<i32>} : memref<144x512xbf16, #tpu.memory_space<vmem>>, vector<16x32xbf16>,
    %77 = vector.extract_strided_slice %8 {offsets = [96, 0], sizes = [16, 32], strides = [1, 1]} : vector<1024x32xbf16> to vector<16x32xbf16>
    %c32_58 = arith.constant 32 : index
    %c64_59 = arith.constant 64 : index
    %78 = vector.load %arg13[%c32_58, %c64_59] : memref<144x512xbf16, #tpu.memory_space<vmem>>, vector<16x32xbf16>
    tpu.vector_store %arg13[%c32_58, %c64_59], %77 {strides = array<i32>} : memref<144x512xbf16, #tpu.memory_space<vmem>>, vector<16x32xbf16>,
    %79 = vector.extract_strided_slice %8 {offsets = [112, 0], sizes = [16, 32], strides = [1, 1]} : vector<1024x32xbf16> to vector<16x32xbf16>
    %c32_60 = arith.constant 32 : index
    %c96_61 = arith.constant 96 : index
    %80 = vector.load %arg13[%c32_60, %c96_61] : memref<144x512xbf16, #tpu.memory_space<vmem>>, vector<16x32xbf16>
    tpu.vector_store %arg13[%c32_60, %c96_61], %79 {strides = array<i32>} : memref<144x512xbf16, #tpu.memory_space<vmem>>, vector<16x32xbf16>,
    %81 = vector.extract_strided_slice %8 {offsets = [192, 0], sizes = [16, 32], strides = [1, 1]} : vector<1024x32xbf16> to vector<16x32xbf16>
    %c32_62 = arith.constant 32 : index
    %c128_63 = arith.constant 128 : index
    %82 = vector.load %arg13[%c32_62, %c128_63] : memref<144x512xbf16, #tpu.memory_space<vmem>>, vector<16x32xbf16>
    tpu.vector_store %arg13[%c32_62, %c128_63], %81 {strides = array<i32>} : memref<144x512xbf16, #tpu.memory_space<vmem>>, vector<16x32xbf16>,
    %83 = vector.extract_strided_slice %8 {offsets = [208, 0], sizes = [16, 32], strides = [1, 1]} : vector<1024x32xbf16> to vector<16x32xbf16>
    %c32_64 = arith.constant 32 : index
    %c160_65 = arith.constant 160 : index
    %84 = vector.load %arg13[%c32_64, %c160_65] : memref<144x512xbf16, #tpu.memory_space<vmem>>, vector<16x32xbf16>
    tpu.vector_store %arg13[%c32_64, %c160_65], %83 {strides = array<i32>} : memref<144x512xbf16, #tpu.memory_space<vmem>>, vector<16x32xbf16>,
    %85 = vector.extract_strided_slice %8 {offsets = [224, 0], sizes = [16, 32], strides = [1, 1]} : vector<1024x32xbf16> to vector<16x32xbf16>
    %c32_66 = arith.constant 32 : index
    %c192_67 = arith.constant 192 : index
    %86 = vector.load %arg13[%c32_66, %c192_67] : memref<144x512xbf16, #tpu.memory_space<vmem>>, vector<16x32xbf16>
    tpu.vector_store %arg13[%c32_66, %c192_67], %85 {strides = array<i32>} : memref<144x512xbf16, #tpu.memory_space<vmem>>, vector<16x32xbf16>,
    %87 = vector.extract_strided_slice %8 {offsets = [240, 0], sizes = [16, 32], strides = [1, 1]} : vector<1024x32xbf16> to vector<16x32xbf16>
    %c32_68 = arith.constant 32 : index
    %c224_69 = arith.constant 224 : index
    %88 = vector.load %arg13[%c32_68, %c224_69] : memref<144x512xbf16, #tpu.memory_space<vmem>>, vector<16x32xbf16>
    tpu.vector_store %arg13[%c32_68, %c224_69], %87 {strides = array<i32>} : memref<144x512xbf16, #tpu.memory_space<vmem>>, vector<16x32xbf16>,
    %89 = vector.extract_strided_slice %8 {offsets = [320, 0], sizes = [16, 32], strides = [1, 1]} : vector<1024x32xbf16> to vector<16x32xbf16>
    %c32_70 = arith.constant 32 : index
    %c256_71 = arith.constant 256 : index
    %90 = vector.load %arg13[%c32_70, %c256_71] : memref<144x512xbf16, #tpu.memory_space<vmem>>, vector<16x32xbf16>
    tpu.vector_store %arg13[%c32_70, %c256_71], %89 {strides = array<i32>} : memref<144x512xbf16, #tpu.memory_space<vmem>>, vector<16x32xbf16>,
    %91 = vector.extract_strided_slice %8 {offsets = [336, 0], sizes = [16, 32], strides = [1, 1]} : vector<1024x32xbf16> to vector<16x32xbf16>
    %c32_72 = arith.constant 32 : index
    %c288_73 = arith.constant 288 : index
    %92 = vector.load %arg13[%c32_72, %c288_73] : memref<144x512xbf16, #tpu.memory_space<vmem>>, vector<16x32xbf16>
    tpu.vector_store %arg13[%c32_72, %c288_73], %91 {strides = array<i32>} : memref<144x512xbf16, #tpu.memory_space<vmem>>, vector<16x32xbf16>,
    %93 = vector.extract_strided_slice %8 {offsets = [352, 0], sizes = [16, 32], strides = [1, 1]} : vector<1024x32xbf16> to vector<16x32xbf16>
    %c32_74 = arith.constant 32 : index
    %c320_75 = arith.constant 320 : index
    %94 = vector.load %arg13[%c32_74, %c320_75] : memref<144x512xbf16, #tpu.memory_space<vmem>>, vector<16x32xbf16>
    tpu.vector_store %arg13[%c32_74, %c320_75], %93 {strides = array<i32>} : memref<144x512xbf16, #tpu.memory_space<vmem>>, vector<16x32xbf16>,
    %95 = vector.extract_strided_slice %8 {offsets = [368, 0], sizes = [16, 32], strides = [1, 1]} : vector<1024x32xbf16> to vector<16x32xbf16>
    %c32_76 = arith.constant 32 : index
    %c352_77 = arith.constant 352 : index
    %96 = vector.load %arg13[%c32_76, %c352_77] : memref<144x512xbf16, #tpu.memory_space<vmem>>, vector<16x32xbf16>
    tpu.vector_store %arg13[%c32_76, %c352_77], %95 {strides = array<i32>} : memref<144x512xbf16, #tpu.memory_space<vmem>>, vector<16x32xbf16>,
    %97 = vector.extract_strided_slice %8 {offsets = [448, 0], sizes = [16, 32], strides = [1, 1]} : vector<1024x32xbf16> to vector<16x32xbf16>
    %c32_78 = arith.constant 32 : index
    %c384_79 = arith.constant 384 : index
    %98 = vector.load %arg13[%c32_78, %c384_79] : memref<144x512xbf16, #tpu.memory_space<vmem>>, vector<16x32xbf16>
    tpu.vector_store %arg13[%c32_78, %c384_79], %97 {strides = array<i32>} : memref<144x512xbf16, #tpu.memory_space<vmem>>, vector<16x32xbf16>,
    %99 = vector.extract_strided_slice %8 {offsets = [464, 0], sizes = [16, 32], strides = [1, 1]} : vector<1024x32xbf16> to vector<16x32xbf16>
    %c32_80 = arith.constant 32 : index
    %c416_81 = arith.constant 416 : index
    %100 = vector.load %arg13[%c32_80, %c416_81] : memref<144x512xbf16, #tpu.memory_space<vmem>>, vector<16x32xbf16>
    tpu.vector_store %arg13[%c32_80, %c416_81], %99 {strides = array<i32>} : memref<144x512xbf16, #tpu.memory_space<vmem>>, vector<16x32xbf16>,
    %101 = vector.extract_strided_slice %8 {offsets = [480, 0], sizes = [16, 32], strides = [1, 1]} : vector<1024x32xbf16> to vector<16x32xbf16>
    %c32_82 = arith.constant 32 : index
    %c448_83 = arith.constant 448 : index
    %102 = vector.load %arg13[%c32_82, %c448_83] : memref<144x512xbf16, #tpu.memory_space<vmem>>, vector<16x32xbf16>
    tpu.vector_store %arg13[%c32_82, %c448_83], %101 {strides = array<i32>} : memref<144x512xbf16, #tpu.memory_space<vmem>>, vector<16x32xbf16>,
    %103 = vector.extract_strided_slice %8 {offsets = [496, 0], sizes = [16, 32], strides = [1, 1]} : vector<1024x32xbf16> to vector<16x32xbf16>
    %c32_84 = arith.constant 32 : index
    %c480_85 = arith.constant 480 : index
    %104 = vector.load %arg13[%c32_84, %c480_85] : memref<144x512xbf16, #tpu.memory_space<vmem>>, vector<16x32xbf16>
    tpu.vector_store %arg13[%c32_84, %c480_85], %103 {strides = array<i32>} : memref<144x512xbf16, #tpu.memory_space<vmem>>, vector<16x32xbf16>,
    %105 = vector.extract_strided_slice %8 {offsets = [256, 0], sizes = [16, 32], strides = [1, 1]} : vector<1024x32xbf16> to vector<16x32xbf16>
    %c48 = arith.constant 48 : index
    %c0_86 = arith.constant 0 : index
    %106 = vector.load %arg13[%c48, %c0_86] : memref<144x512xbf16, #tpu.memory_space<vmem>>, vector<16x32xbf16>
    tpu.vector_store %arg13[%c48, %c0_86], %105 {strides = array<i32>} : memref<144x512xbf16, #tpu.memory_space<vmem>>, vector<16x32xbf16>,
    %107 = vector.extract_strided_slice %8 {offsets = [272, 0], sizes = [16, 32], strides = [1, 1]} : vector<1024x32xbf16> to vector<16x32xbf16>
    %c48_87 = arith.constant 48 : index
    %c32_88 = arith.constant 32 : index
    %108 = vector.load %arg13[%c48_87, %c32_88] : memref<144x512xbf16, #tpu.memory_space<vmem>>, vector<16x32xbf16>
    tpu.vector_store %arg13[%c48_87, %c32_88], %107 {strides = array<i32>} : memref<144x512xbf16, #tpu.memory_space<vmem>>, vector<16x32xbf16>,
    %109 = vector.extract_strided_slice %8 {offsets = [288, 0], sizes = [16, 32], strides = [1, 1]} : vector<1024x32xbf16> to vector<16x32xbf16>
    %c48_89 = arith.constant 48 : index
    %c64_90 = arith.constant 64 : index
    %110 = vector.load %arg13[%c48_89, %c64_90] : memref<144x512xbf16, #tpu.memory_space<vmem>>, vector<16x32xbf16>
    tpu.vector_store %arg13[%c48_89, %c64_90], %109 {strides = array<i32>} : memref<144x512xbf16, #tpu.memory_space<vmem>>, vector<16x32xbf16>,
    %111 = vector.extract_strided_slice %8 {offsets = [304, 0], sizes = [16, 32], strides = [1, 1]} : vector<1024x32xbf16> to vector<16x32xbf16>
    %c48_91 = arith.constant 48 : index
    %c96_92 = arith.constant 96 : index
    %112 = vector.load %arg13[%c48_91, %c96_92] : memref<144x512xbf16, #tpu.memory_space<vmem>>, vector<16x32xbf16>
    tpu.vector_store %arg13[%c48_91, %c96_92], %111 {strides = array<i32>} : memref<144x512xbf16, #tpu.memory_space<vmem>>, vector<16x32xbf16>,
    %113 = vector.extract_strided_slice %8 {offsets = [384, 0], sizes = [16, 32], strides = [1, 1]} : vector<1024x32xbf16> to vector<16x32xbf16>
    %c48_93 = arith.constant 48 : index
    %c128_94 = arith.constant 128 : index
    %114 = vector.load %arg13[%c48_93, %c128_94] : memref<144x512xbf16, #tpu.memory_space<vmem>>, vector<16x32xbf16>
    tpu.vector_store %arg13[%c48_93, %c128_94], %113 {strides = array<i32>} : memref<144x512xbf16, #tpu.memory_space<vmem>>, vector<16x32xbf16>,
    %115 = vector.extract_strided_slice %8 {offsets = [400, 0], sizes = [16, 32], strides = [1, 1]} : vector<1024x32xbf16> to vector<16x32xbf16>
    %c48_95 = arith.constant 48 : index
    %c160_96 = arith.constant 160 : index
    %116 = vector.load %arg13[%c48_95, %c160_96] : memref<144x512xbf16, #tpu.memory_space<vmem>>, vector<16x32xbf16>
    tpu.vector_store %arg13[%c48_95, %c160_96], %115 {strides = array<i32>} : memref<144x512xbf16, #tpu.memory_space<vmem>>, vector<16x32xbf16>,
    %117 = vector.extract_strided_slice %8 {offsets = [416, 0], sizes = [16, 32], strides = [1, 1]} : vector<1024x32xbf16> to vector<16x32xbf16>
    %c48_97 = arith.constant 48 : index
    %c192_98 = arith.constant 192 : index
    %118 = vector.load %arg13[%c48_97, %c192_98] : memref<144x512xbf16, #tpu.memory_space<vmem>>, vector<16x32xbf16>
    tpu.vector_store %arg13[%c48_97, %c192_98], %117 {strides = array<i32>} : memref<144x512xbf16, #tpu.memory_space<vmem>>, vector<16x32xbf16>,
    %119 = vector.extract_strided_slice %8 {offsets = [432, 0], sizes = [16, 32], strides = [1, 1]} : vector<1024x32xbf16> to vector<16x32xbf16>
    %c48_99 = arith.constant 48 : index
    %c224_100 = arith.constant 224 : index
    %120 = vector.load %arg13[%c48_99, %c224_100] : memref<144x512xbf16, #tpu.memory_space<vmem>>, vector<16x32xbf16>
    tpu.vector_store %arg13[%c48_99, %c224_100], %119 {strides = array<i32>} : memref<144x512xbf16, #tpu.memory_space<vmem>>, vector<16x32xbf16>,
    %121 = vector.extract_strided_slice %8 {offsets = [512, 0], sizes = [16, 32], strides = [1, 1]} : vector<1024x32xbf16> to vector<16x32xbf16>
    %c48_101 = arith.constant 48 : index
    %c256_102 = arith.constant 256 : index
    %122 = vector.load %arg13[%c48_101, %c256_102] : memref<144x512xbf16, #tpu.memory_space<vmem>>, vector<16x32xbf16>
    tpu.vector_store %arg13[%c48_101, %c256_102], %121 {strides = array<i32>} : memref<144x512xbf16, #tpu.memory_space<vmem>>, vector<16x32xbf16>,
    %123 = vector.extract_strided_slice %8 {offsets = [528, 0], sizes = [16, 32], strides = [1, 1]} : vector<1024x32xbf16> to vector<16x32xbf16>
    %c48_103 = arith.constant 48 : index
    %c288_104 = arith.constant 288 : index
    %124 = vector.load %arg13[%c48_103, %c288_104] : memref<144x512xbf16, #tpu.memory_space<vmem>>, vector<16x32xbf16>
    tpu.vector_store %arg13[%c48_103, %c288_104], %123 {strides = array<i32>} : memref<144x512xbf16, #tpu.memory_space<vmem>>, vector<16x32xbf16>,
    %125 = vector.extract_strided_slice %8 {offsets = [544, 0], sizes = [16, 32], strides = [1, 1]} : vector<1024x32xbf16> to vector<16x32xbf16>
    %c48_105 = arith.constant 48 : index
    %c320_106 = arith.constant 320 : index
    %126 = vector.load %arg13[%c48_105, %c320_106] : memref<144x512xbf16, #tpu.memory_space<vmem>>, vector<16x32xbf16>
    tpu.vector_store %arg13[%c48_105, %c320_106], %125 {strides = array<i32>} : memref<144x512xbf16, #tpu.memory_space<vmem>>, vector<16x32xbf16>,
    %127 = vector.extract_strided_slice %8 {offsets = [560, 0], sizes = [16, 32], strides = [1, 1]} : vector<1024x32xbf16> to vector<16x32xbf16>
    %c48_107 = arith.constant 48 : index
    %c352_108 = arith.constant 352 : index
    %128 = vector.load %arg13[%c48_107, %c352_108] : memref<144x512xbf16, #tpu.memory_space<vmem>>, vector<16x32xbf16>
    tpu.vector_store %arg13[%c48_107, %c352_108], %127 {strides = array<i32>} : memref<144x512xbf16, #tpu.memory_space<vmem>>, vector<16x32xbf16>,
    %129 = vector.extract_strided_slice %8 {offsets = [640, 0], sizes = [16, 32], strides = [1, 1]} : vector<1024x32xbf16> to vector<16x32xbf16>
    %c48_109 = arith.constant 48 : index
    %c384_110 = arith.constant 384 : index
    %130 = vector.load %arg13[%c48_109, %c384_110] : memref<144x512xbf16, #tpu.memory_space<vmem>>, vector<16x32xbf16>
    tpu.vector_store %arg13[%c48_109, %c384_110], %129 {strides = array<i32>} : memref<144x512xbf16, #tpu.memory_space<vmem>>, vector<16x32xbf16>,
    %131 = vector.extract_strided_slice %8 {offsets = [656, 0], sizes = [16, 32], strides = [1, 1]} : vector<1024x32xbf16> to vector<16x32xbf16>
    %c48_111 = arith.constant 48 : index
    %c416_112 = arith.constant 416 : index
    %132 = vector.load %arg13[%c48_111, %c416_112] : memref<144x512xbf16, #tpu.memory_space<vmem>>, vector<16x32xbf16>
    tpu.vector_store %arg13[%c48_111, %c416_112], %131 {strides = array<i32>} : memref<144x512xbf16, #tpu.memory_space<vmem>>, vector<16x32xbf16>,
    %133 = vector.extract_strided_slice %8 {offsets = [672, 0], sizes = [16, 32], strides = [1, 1]} : vector<1024x32xbf16> to vector<16x32xbf16>
    %c48_113 = arith.constant 48 : index
    %c448_114 = arith.constant 448 : index
    %134 = vector.load %arg13[%c48_113, %c448_114] : memref<144x512xbf16, #tpu.memory_space<vmem>>, vector<16x32xbf16>
    tpu.vector_store %arg13[%c48_113, %c448_114], %133 {strides = array<i32>} : memref<144x512xbf16, #tpu.memory_space<vmem>>, vector<16x32xbf16>,
    %135 = vector.extract_strided_slice %8 {offsets = [688, 0], sizes = [16, 32], strides = [1, 1]} : vector<1024x32xbf16> to vector<16x32xbf16>
    %c48_115 = arith.constant 48 : index
    %c480_116 = arith.constant 480 : index
    %136 = vector.load %arg13[%c48_115, %c480_116] : memref<144x512xbf16, #tpu.memory_space<vmem>>, vector<16x32xbf16>
    tpu.vector_store %arg13[%c48_115, %c480_116], %135 {strides = array<i32>} : memref<144x512xbf16, #tpu.memory_space<vmem>>, vector<16x32xbf16>,
    %137 = vector.extract_strided_slice %8 {offsets = [288, 0], sizes = [16, 32], strides = [1, 1]} : vector<1024x32xbf16> to vector<16x32xbf16>
    %c64_117 = arith.constant 64 : index
    %c0_118 = arith.constant 0 : index
    %138 = vector.load %arg13[%c64_117, %c0_118] : memref<144x512xbf16, #tpu.memory_space<vmem>>, vector<16x32xbf16>
    tpu.vector_store %arg13[%c64_117, %c0_118], %137 {strides = array<i32>} : memref<144x512xbf16, #tpu.memory_space<vmem>>, vector<16x32xbf16>,
    %139 = vector.extract_strided_slice %8 {offsets = [304, 0], sizes = [16, 32], strides = [1, 1]} : vector<1024x32xbf16> to vector<16x32xbf16>
    %c64_119 = arith.constant 64 : index
    %c32_120 = arith.constant 32 : index
    %140 = vector.load %arg13[%c64_119, %c32_120] : memref<144x512xbf16, #tpu.memory_space<vmem>>, vector<16x32xbf16>
    tpu.vector_store %arg13[%c64_119, %c32_120], %139 {strides = array<i32>} : memref<144x512xbf16, #tpu.memory_space<vmem>>, vector<16x32xbf16>,
    %141 = vector.extract_strided_slice %8 {offsets = [320, 0], sizes = [16, 32], strides = [1, 1]} : vector<1024x32xbf16> to vector<16x32xbf16>
    %c64_121 = arith.constant 64 : index
    %c64_122 = arith.constant 64 : index
    %142 = vector.load %arg13[%c64_121, %c64_122] : memref<144x512xbf16, #tpu.memory_space<vmem>>, vector<16x32xbf16>
    tpu.vector_store %arg13[%c64_121, %c64_122], %141 {strides = array<i32>} : memref<144x512xbf16, #tpu.memory_space<vmem>>, vector<16x32xbf16>,
    %143 = vector.extract_strided_slice %8 {offsets = [336, 0], sizes = [16, 32], strides = [1, 1]} : vector<1024x32xbf16> to vector<16x32xbf16>
    %c64_123 = arith.constant 64 : index
    %c96_124 = arith.constant 96 : index
    %144 = vector.load %arg13[%c64_123, %c96_124] : memref<144x512xbf16, #tpu.memory_space<vmem>>, vector<16x32xbf16>
    tpu.vector_store %arg13[%c64_123, %c96_124], %143 {strides = array<i32>} : memref<144x512xbf16, #tpu.memory_space<vmem>>, vector<16x32xbf16>,
    %145 = vector.extract_strided_slice %8 {offsets = [416, 0], sizes = [16, 32], strides = [1, 1]} : vector<1024x32xbf16> to vector<16x32xbf16>
    %c64_125 = arith.constant 64 : index
    %c128_126 = arith.constant 128 : index
    %146 = vector.load %arg13[%c64_125, %c128_126] : memref<144x512xbf16, #tpu.memory_space<vmem>>, vector<16x32xbf16>
    tpu.vector_store %arg13[%c64_125, %c128_126], %145 {strides = array<i32>} : memref<144x512xbf16, #tpu.memory_space<vmem>>, vector<16x32xbf16>,
    %147 = vector.extract_strided_slice %8 {offsets = [432, 0], sizes = [16, 32], strides = [1, 1]} : vector<1024x32xbf16> to vector<16x32xbf16>
    %c64_127 = arith.constant 64 : index
    %c160_128 = arith.constant 160 : index
    %148 = vector.load %arg13[%c64_127, %c160_128] : memref<144x512xbf16, #tpu.memory_space<vmem>>, vector<16x32xbf16>
    tpu.vector_store %arg13[%c64_127, %c160_128], %147 {strides = array<i32>} : memref<144x512xbf16, #tpu.memory_space<vmem>>, vector<16x32xbf16>,
    %149 = vector.extract_strided_slice %8 {offsets = [448, 0], sizes = [16, 32], strides = [1, 1]} : vector<1024x32xbf16> to vector<16x32xbf16>
    %c64_129 = arith.constant 64 : index
    %c192_130 = arith.constant 192 : index
    %150 = vector.load %arg13[%c64_129, %c192_130] : memref<144x512xbf16, #tpu.memory_space<vmem>>, vector<16x32xbf16>
    tpu.vector_store %arg13[%c64_129, %c192_130], %149 {strides = array<i32>} : memref<144x512xbf16, #tpu.memory_space<vmem>>, vector<16x32xbf16>,
    %151 = vector.extract_strided_slice %8 {offsets = [464, 0], sizes = [16, 32], strides = [1, 1]} : vector<1024x32xbf16> to vector<16x32xbf16>
    %c64_131 = arith.constant 64 : index
    %c224_132 = arith.constant 224 : index
    %152 = vector.load %arg13[%c64_131, %c224_132] : memref<144x512xbf16, #tpu.memory_space<vmem>>, vector<16x32xbf16>
    tpu.vector_store %arg13[%c64_131, %c224_132], %151 {strides = array<i32>} : memref<144x512xbf16, #tpu.memory_space<vmem>>, vector<16x32xbf16>,
    %153 = vector.extract_strided_slice %8 {offsets = [544, 0], sizes = [16, 32], strides = [1, 1]} : vector<1024x32xbf16> to vector<16x32xbf16>
    %c64_133 = arith.constant 64 : index
    %c256_134 = arith.constant 256 : index
    %154 = vector.load %arg13[%c64_133, %c256_134] : memref<144x512xbf16, #tpu.memory_space<vmem>>, vector<16x32xbf16>
    tpu.vector_store %arg13[%c64_133, %c256_134], %153 {strides = array<i32>} : memref<144x512xbf16, #tpu.memory_space<vmem>>, vector<16x32xbf16>,
    %155 = vector.extract_strided_slice %8 {offsets = [560, 0], sizes = [16, 32], strides = [1, 1]} : vector<1024x32xbf16> to vector<16x32xbf16>
    %c64_135 = arith.constant 64 : index
    %c288_136 = arith.constant 288 : index
    %156 = vector.load %arg13[%c64_135, %c288_136] : memref<144x512xbf16, #tpu.memory_space<vmem>>, vector<16x32xbf16>
    tpu.vector_store %arg13[%c64_135, %c288_136], %155 {strides = array<i32>} : memref<144x512xbf16, #tpu.memory_space<vmem>>, vector<16x32xbf16>,
    %157 = vector.extract_strided_slice %8 {offsets = [576, 0], sizes = [16, 32], strides = [1, 1]} : vector<1024x32xbf16> to vector<16x32xbf16>
    %c64_137 = arith.constant 64 : index
    %c320_138 = arith.constant 320 : index
    %158 = vector.load %arg13[%c64_137, %c320_138] : memref<144x512xbf16, #tpu.memory_space<vmem>>, vector<16x32xbf16>
    tpu.vector_store %arg13[%c64_137, %c320_138], %157 {strides = array<i32>} : memref<144x512xbf16, #tpu.memory_space<vmem>>, vector<16x32xbf16>,
    %159 = vector.extract_strided_slice %8 {offsets = [592, 0], sizes = [16, 32], strides = [1, 1]} : vector<1024x32xbf16> to vector<16x32xbf16>
    %c64_139 = arith.constant 64 : index
    %c352_140 = arith.constant 352 : index
    %160 = vector.load %arg13[%c64_139, %c352_140] : memref<144x512xbf16, #tpu.memory_space<vmem>>, vector<16x32xbf16>
    tpu.vector_store %arg13[%c64_139, %c352_140], %159 {strides = array<i32>} : memref<144x512xbf16, #tpu.memory_space<vmem>>, vector<16x32xbf16>,
    %161 = vector.extract_strided_slice %8 {offsets = [672, 0], sizes = [16, 32], strides = [1, 1]} : vector<1024x32xbf16> to vector<16x32xbf16>
    %c64_141 = arith.constant 64 : index
    %c384_142 = arith.constant 384 : index
    %162 = vector.load %arg13[%c64_141, %c384_142] : memref<144x512xbf16, #tpu.memory_space<vmem>>, vector<16x32xbf16>
    tpu.vector_store %arg13[%c64_141, %c384_142], %161 {strides = array<i32>} : memref<144x512xbf16, #tpu.memory_space<vmem>>, vector<16x32xbf16>,
    %163 = vector.extract_strided_slice %8 {offsets = [688, 0], sizes = [16, 32], strides = [1, 1]} : vector<1024x32xbf16> to vector<16x32xbf16>
    %c64_143 = arith.constant 64 : index
    %c416_144 = arith.constant 416 : index
    %164 = vector.load %arg13[%c64_143, %c416_144] : memref<144x512xbf16, #tpu.memory_space<vmem>>, vector<16x32xbf16>
    tpu.vector_store %arg13[%c64_143, %c416_144], %163 {strides = array<i32>} : memref<144x512xbf16, #tpu.memory_space<vmem>>, vector<16x32xbf16>,
    %165 = vector.extract_strided_slice %8 {offsets = [704, 0], sizes = [16, 32], strides = [1, 1]} : vector<1024x32xbf16> to vector<16x32xbf16>
    %c64_145 = arith.constant 64 : index
    %c448_146 = arith.constant 448 : index
    %166 = vector.load %arg13[%c64_145, %c448_146] : memref<144x512xbf16, #tpu.memory_space<vmem>>, vector<16x32xbf16>
    tpu.vector_store %arg13[%c64_145, %c448_146], %165 {strides = array<i32>} : memref<144x512xbf16, #tpu.memory_space<vmem>>, vector<16x32xbf16>,
    %167 = vector.extract_strided_slice %8 {offsets = [720, 0], sizes = [16, 32], strides = [1, 1]} : vector<1024x32xbf16> to vector<16x32xbf16>
    %c64_147 = arith.constant 64 : index
    %c480_148 = arith.constant 480 : index
    %168 = vector.load %arg13[%c64_147, %c480_148] : memref<144x512xbf16, #tpu.memory_space<vmem>>, vector<16x32xbf16>
    tpu.vector_store %arg13[%c64_147, %c480_148], %167 {strides = array<i32>} : memref<144x512xbf16, #tpu.memory_space<vmem>>, vector<16x32xbf16>,
    %169 = vector.extract_strided_slice %8 {offsets = [320, 0], sizes = [16, 32], strides = [1, 1]} : vector<1024x32xbf16> to vector<16x32xbf16>
    %c80 = arith.constant 80 : index
    %c0_149 = arith.constant 0 : index
    %170 = vector.load %arg13[%c80, %c0_149] : memref<144x512xbf16, #tpu.memory_space<vmem>>, vector<16x32xbf16>
    tpu.vector_store %arg13[%c80, %c0_149], %169 {strides = array<i32>} : memref<144x512xbf16, #tpu.memory_space<vmem>>, vector<16x32xbf16>,
    %171 = vector.extract_strided_slice %8 {offsets = [336, 0], sizes = [16, 32], strides = [1, 1]} : vector<1024x32xbf16> to vector<16x32xbf16>
    %c80_150 = arith.constant 80 : index
    %c32_151 = arith.constant 32 : index
    %172 = vector.load %arg13[%c80_150, %c32_151] : memref<144x512xbf16, #tpu.memory_space<vmem>>, vector<16x32xbf16>
    tpu.vector_store %arg13[%c80_150, %c32_151], %171 {strides = array<i32>} : memref<144x512xbf16, #tpu.memory_space<vmem>>, vector<16x32xbf16>,
    %173 = vector.extract_strided_slice %8 {offsets = [352, 0], sizes = [16, 32], strides = [1, 1]} : vector<1024x32xbf16> to vector<16x32xbf16>
    %c80_152 = arith.constant 80 : index
    %c64_153 = arith.constant 64 : index
    %174 = vector.load %arg13[%c80_152, %c64_153] : memref<144x512xbf16, #tpu.memory_space<vmem>>, vector<16x32xbf16>
    tpu.vector_store %arg13[%c80_152, %c64_153], %173 {strides = array<i32>} : memref<144x512xbf16, #tpu.memory_space<vmem>>, vector<16x32xbf16>,
    %175 = vector.extract_strided_slice %8 {offsets = [368, 0], sizes = [16, 32], strides = [1, 1]} : vector<1024x32xbf16> to vector<16x32xbf16>
    %c80_154 = arith.constant 80 : index
    %c96_155 = arith.constant 96 : index
    %176 = vector.load %arg13[%c80_154, %c96_155] : memref<144x512xbf16, #tpu.memory_space<vmem>>, vector<16x32xbf16>
    tpu.vector_store %arg13[%c80_154, %c96_155], %175 {strides = array<i32>} : memref<144x512xbf16, #tpu.memory_space<vmem>>, vector<16x32xbf16>,
    %177 = vector.extract_strided_slice %8 {offsets = [448, 0], sizes = [16, 32], strides = [1, 1]} : vector<1024x32xbf16> to vector<16x32xbf16>
    %c80_156 = arith.constant 80 : index
    %c128_157 = arith.constant 128 : index
    %178 = vector.load %arg13[%c80_156, %c128_157] : memref<144x512xbf16, #tpu.memory_space<vmem>>, vector<16x32xbf16>
    tpu.vector_store %arg13[%c80_156, %c128_157], %177 {strides = array<i32>} : memref<144x512xbf16, #tpu.memory_space<vmem>>, vector<16x32xbf16>,
    %179 = vector.extract_strided_slice %8 {offsets = [464, 0], sizes = [16, 32], strides = [1, 1]} : vector<1024x32xbf16> to vector<16x32xbf16>
    %c80_158 = arith.constant 80 : index
    %c160_159 = arith.constant 160 : index
    %180 = vector.load %arg13[%c80_158, %c160_159] : memref<144x512xbf16, #tpu.memory_space<vmem>>, vector<16x32xbf16>
    tpu.vector_store %arg13[%c80_158, %c160_159], %179 {strides = array<i32>} : memref<144x512xbf16, #tpu.memory_space<vmem>>, vector<16x32xbf16>,
    %181 = vector.extract_strided_slice %8 {offsets = [480, 0], sizes = [16, 32], strides = [1, 1]} : vector<1024x32xbf16> to vector<16x32xbf16>
    %c80_160 = arith.constant 80 : index
    %c192_161 = arith.constant 192 : index
    %182 = vector.load %arg13[%c80_160, %c192_161] : memref<144x512xbf16, #tpu.memory_space<vmem>>, vector<16x32xbf16>
    tpu.vector_store %arg13[%c80_160, %c192_161], %181 {strides = array<i32>} : memref<144x512xbf16, #tpu.memory_space<vmem>>, vector<16x32xbf16>,
    %183 = vector.extract_strided_slice %8 {offsets = [496, 0], sizes = [16, 32], strides = [1, 1]} : vector<1024x32xbf16> to vector<16x32xbf16>
    %c80_162 = arith.constant 80 : index
    %c224_163 = arith.constant 224 : index
    %184 = vector.load %arg13[%c80_162, %c224_163] : memref<144x512xbf16, #tpu.memory_space<vmem>>, vector<16x32xbf16>
    tpu.vector_store %arg13[%c80_162, %c224_163], %183 {strides = array<i32>} : memref<144x512xbf16, #tpu.memory_space<vmem>>, vector<16x32xbf16>,
    %185 = vector.extract_strided_slice %8 {offsets = [576, 0], sizes = [16, 32], strides = [1, 1]} : vector<1024x32xbf16> to vector<16x32xbf16>
    %c80_164 = arith.constant 80 : index
    %c256_165 = arith.constant 256 : index
    %186 = vector.load %arg13[%c80_164, %c256_165] : memref<144x512xbf16, #tpu.memory_space<vmem>>, vector<16x32xbf16>
    tpu.vector_store %arg13[%c80_164, %c256_165], %185 {strides = array<i32>} : memref<144x512xbf16, #tpu.memory_space<vmem>>, vector<16x32xbf16>,
    %187 = vector.extract_strided_slice %8 {offsets = [592, 0], sizes = [16, 32], strides = [1, 1]} : vector<1024x32xbf16> to vector<16x32xbf16>
    %c80_166 = arith.constant 80 : index
    %c288_167 = arith.constant 288 : index
    %188 = vector.load %arg13[%c80_166, %c288_167] : memref<144x512xbf16, #tpu.memory_space<vmem>>, vector<16x32xbf16>
    tpu.vector_store %arg13[%c80_166, %c288_167], %187 {strides = array<i32>} : memref<144x512xbf16, #tpu.memory_space<vmem>>, vector<16x32xbf16>,
    %189 = vector.extract_strided_slice %8 {offsets = [608, 0], sizes = [16, 32], strides = [1, 1]} : vector<1024x32xbf16> to vector<16x32xbf16>
    %c80_168 = arith.constant 80 : index
    %c320_169 = arith.constant 320 : index
    %190 = vector.load %arg13[%c80_168, %c320_169] : memref<144x512xbf16, #tpu.memory_space<vmem>>, vector<16x32xbf16>
    tpu.vector_store %arg13[%c80_168, %c320_169], %189 {strides = array<i32>} : memref<144x512xbf16, #tpu.memory_space<vmem>>, vector<16x32xbf16>,
    %191 = vector.extract_strided_slice %8 {offsets = [624, 0], sizes = [16, 32], strides = [1, 1]} : vector<1024x32xbf16> to vector<16x32xbf16>
    %c80_170 = arith.constant 80 : index
    %c352_171 = arith.constant 352 : index
    %192 = vector.load %arg13[%c80_170, %c352_171] : memref<144x512xbf16, #tpu.memory_space<vmem>>, vector<16x32xbf16>
    tpu.vector_store %arg13[%c80_170, %c352_171], %191 {strides = array<i32>} : memref<144x512xbf16, #tpu.memory_space<vmem>>, vector<16x32xbf16>,
    %193 = vector.extract_strided_slice %8 {offsets = [704, 0], sizes = [16, 32], strides = [1, 1]} : vector<1024x32xbf16> to vector<16x32xbf16>
    %c80_172 = arith.constant 80 : index
    %c384_173 = arith.constant 384 : index
    %194 = vector.load %arg13[%c80_172, %c384_173] : memref<144x512xbf16, #tpu.memory_space<vmem>>, vector<16x32xbf16>
    tpu.vector_store %arg13[%c80_172, %c384_173], %193 {strides = array<i32>} : memref<144x512xbf16, #tpu.memory_space<vmem>>, vector<16x32xbf16>,
    %195 = vector.extract_strided_slice %8 {offsets = [720, 0], sizes = [16, 32], strides = [1, 1]} : vector<1024x32xbf16> to vector<16x32xbf16>
    %c80_174 = arith.constant 80 : index
    %c416_175 = arith.constant 416 : index
    %196 = vector.load %arg13[%c80_174, %c416_175] : memref<144x512xbf16, #tpu.memory_space<vmem>>, vector<16x32xbf16>
    tpu.vector_store %arg13[%c80_174, %c416_175], %195 {strides = array<i32>} : memref<144x512xbf16, #tpu.memory_space<vmem>>, vector<16x32xbf16>,
    %197 = vector.extract_strided_slice %8 {offsets = [736, 0], sizes = [16, 32], strides = [1, 1]} : vector<1024x32xbf16> to vector<16x32xbf16>
    %c80_176 = arith.constant 80 : index
    %c448_177 = arith.constant 448 : index
    %198 = vector.load %arg13[%c80_176, %c448_177] : memref<144x512xbf16, #tpu.memory_space<vmem>>, vector<16x32xbf16>
    tpu.vector_store %arg13[%c80_176, %c448_177], %197 {strides = array<i32>} : memref<144x512xbf16, #tpu.memory_space<vmem>>, vector<16x32xbf16>,
    %199 = vector.extract_strided_slice %8 {offsets = [752, 0], sizes = [16, 32], strides = [1, 1]} : vector<1024x32xbf16> to vector<16x32xbf16>
    %c80_178 = arith.constant 80 : index
    %c480_179 = arith.constant 480 : index
    %200 = vector.load %arg13[%c80_178, %c480_179] : memref<144x512xbf16, #tpu.memory_space<vmem>>, vector<16x32xbf16>
    tpu.vector_store %arg13[%c80_178, %c480_179], %199 {strides = array<i32>} : memref<144x512xbf16, #tpu.memory_space<vmem>>, vector<16x32xbf16>,
    %201 = vector.extract_strided_slice %8 {offsets = [512, 0], sizes = [16, 32], strides = [1, 1]} : vector<1024x32xbf16> to vector<16x32xbf16>
    %c96_180 = arith.constant 96 : index
    %c0_181 = arith.constant 0 : index
    %202 = vector.load %arg13[%c96_180, %c0_181] : memref<144x512xbf16, #tpu.memory_space<vmem>>, vector<16x32xbf16>
    tpu.vector_store %arg13[%c96_180, %c0_181], %201 {strides = array<i32>} : memref<144x512xbf16, #tpu.memory_space<vmem>>, vector<16x32xbf16>,
    %203 = vector.extract_strided_slice %8 {offsets = [528, 0], sizes = [16, 32], strides = [1, 1]} : vector<1024x32xbf16> to vector<16x32xbf16>
    %c96_182 = arith.constant 96 : index
    %c32_183 = arith.constant 32 : index
    %204 = vector.load %arg13[%c96_182, %c32_183] : memref<144x512xbf16, #tpu.memory_space<vmem>>, vector<16x32xbf16>
    tpu.vector_store %arg13[%c96_182, %c32_183], %203 {strides = array<i32>} : memref<144x512xbf16, #tpu.memory_space<vmem>>, vector<16x32xbf16>,
    %205 = vector.extract_strided_slice %8 {offsets = [544, 0], sizes = [16, 32], strides = [1, 1]} : vector<1024x32xbf16> to vector<16x32xbf16>
    %c96_184 = arith.constant 96 : index
    %c64_185 = arith.constant 64 : index
    %206 = vector.load %arg13[%c96_184, %c64_185] : memref<144x512xbf16, #tpu.memory_space<vmem>>, vector<16x32xbf16>
    tpu.vector_store %arg13[%c96_184, %c64_185], %205 {strides = array<i32>} : memref<144x512xbf16, #tpu.memory_space<vmem>>, vector<16x32xbf16>,
    %207 = vector.extract_strided_slice %8 {offsets = [560, 0], sizes = [16, 32], strides = [1, 1]} : vector<1024x32xbf16> to vector<16x32xbf16>
    %c96_186 = arith.constant 96 : index
    %c96_187 = arith.constant 96 : index
    %208 = vector.load %arg13[%c96_186, %c96_187] : memref<144x512xbf16, #tpu.memory_space<vmem>>, vector<16x32xbf16>
    tpu.vector_store %arg13[%c96_186, %c96_187], %207 {strides = array<i32>} : memref<144x512xbf16, #tpu.memory_space<vmem>>, vector<16x32xbf16>,
    %209 = vector.extract_strided_slice %8 {offsets = [640, 0], sizes = [16, 32], strides = [1, 1]} : vector<1024x32xbf16> to vector<16x32xbf16>
    %c96_188 = arith.constant 96 : index
    %c128_189 = arith.constant 128 : index
    %210 = vector.load %arg13[%c96_188, %c128_189] : memref<144x512xbf16, #tpu.memory_space<vmem>>, vector<16x32xbf16>
    tpu.vector_store %arg13[%c96_188, %c128_189], %209 {strides = array<i32>} : memref<144x512xbf16, #tpu.memory_space<vmem>>, vector<16x32xbf16>,
    %211 = vector.extract_strided_slice %8 {offsets = [656, 0], sizes = [16, 32], strides = [1, 1]} : vector<1024x32xbf16> to vector<16x32xbf16>
    %c96_190 = arith.constant 96 : index
    %c160_191 = arith.constant 160 : index
    %212 = vector.load %arg13[%c96_190, %c160_191] : memref<144x512xbf16, #tpu.memory_space<vmem>>, vector<16x32xbf16>
    tpu.vector_store %arg13[%c96_190, %c160_191], %211 {strides = array<i32>} : memref<144x512xbf16, #tpu.memory_space<vmem>>, vector<16x32xbf16>,
    %213 = vector.extract_strided_slice %8 {offsets = [672, 0], sizes = [16, 32], strides = [1, 1]} : vector<1024x32xbf16> to vector<16x32xbf16>
    %c96_192 = arith.constant 96 : index
    %c192_193 = arith.constant 192 : index
    %214 = vector.load %arg13[%c96_192, %c192_193] : memref<144x512xbf16, #tpu.memory_space<vmem>>, vector<16x32xbf16>
    tpu.vector_store %arg13[%c96_192, %c192_193], %213 {strides = array<i32>} : memref<144x512xbf16, #tpu.memory_space<vmem>>, vector<16x32xbf16>,
    %215 = vector.extract_strided_slice %8 {offsets = [688, 0], sizes = [16, 32], strides = [1, 1]} : vector<1024x32xbf16> to vector<16x32xbf16>
    %c96_194 = arith.constant 96 : index
    %c224_195 = arith.constant 224 : index
    %216 = vector.load %arg13[%c96_194, %c224_195] : memref<144x512xbf16, #tpu.memory_space<vmem>>, vector<16x32xbf16>
    tpu.vector_store %arg13[%c96_194, %c224_195], %215 {strides = array<i32>} : memref<144x512xbf16, #tpu.memory_space<vmem>>, vector<16x32xbf16>,
    %217 = vector.extract_strided_slice %8 {offsets = [768, 0], sizes = [16, 32], strides = [1, 1]} : vector<1024x32xbf16> to vector<16x32xbf16>
    %c96_196 = arith.constant 96 : index
    %c256_197 = arith.constant 256 : index
    %218 = vector.load %arg13[%c96_196, %c256_197] : memref<144x512xbf16, #tpu.memory_space<vmem>>, vector<16x32xbf16>
    tpu.vector_store %arg13[%c96_196, %c256_197], %217 {strides = array<i32>} : memref<144x512xbf16, #tpu.memory_space<vmem>>, vector<16x32xbf16>,
    %219 = vector.extract_strided_slice %8 {offsets = [784, 0], sizes = [16, 32], strides = [1, 1]} : vector<1024x32xbf16> to vector<16x32xbf16>
    %c96_198 = arith.constant 96 : index
    %c288_199 = arith.constant 288 : index
    %220 = vector.load %arg13[%c96_198, %c288_199] : memref<144x512xbf16, #tpu.memory_space<vmem>>, vector<16x32xbf16>
    tpu.vector_store %arg13[%c96_198, %c288_199], %219 {strides = array<i32>} : memref<144x512xbf16, #tpu.memory_space<vmem>>, vector<16x32xbf16>,
    %221 = vector.extract_strided_slice %8 {offsets = [800, 0], sizes = [16, 32], strides = [1, 1]} : vector<1024x32xbf16> to vector<16x32xbf16>
    %c96_200 = arith.constant 96 : index
    %c320_201 = arith.constant 320 : index
    %222 = vector.load %arg13[%c96_200, %c320_201] : memref<144x512xbf16, #tpu.memory_space<vmem>>, vector<16x32xbf16>
    tpu.vector_store %arg13[%c96_200, %c320_201], %221 {strides = array<i32>} : memref<144x512xbf16, #tpu.memory_space<vmem>>, vector<16x32xbf16>,
    %223 = vector.extract_strided_slice %8 {offsets = [816, 0], sizes = [16, 32], strides = [1, 1]} : vector<1024x32xbf16> to vector<16x32xbf16>
    %c96_202 = arith.constant 96 : index
    %c352_203 = arith.constant 352 : index
    %224 = vector.load %arg13[%c96_202, %c352_203] : memref<144x512xbf16, #tpu.memory_space<vmem>>, vector<16x32xbf16>
    tpu.vector_store %arg13[%c96_202, %c352_203], %223 {strides = array<i32>} : memref<144x512xbf16, #tpu.memory_space<vmem>>, vector<16x32xbf16>,
    %225 = vector.extract_strided_slice %8 {offsets = [896, 0], sizes = [16, 32], strides = [1, 1]} : vector<1024x32xbf16> to vector<16x32xbf16>
    %c96_204 = arith.constant 96 : index
    %c384_205 = arith.constant 384 : index
    %226 = vector.load %arg13[%c96_204, %c384_205] : memref<144x512xbf16, #tpu.memory_space<vmem>>, vector<16x32xbf16>
    tpu.vector_store %arg13[%c96_204, %c384_205], %225 {strides = array<i32>} : memref<144x512xbf16, #tpu.memory_space<vmem>>, vector<16x32xbf16>,
    %227 = vector.extract_strided_slice %8 {offsets = [912, 0], sizes = [16, 32], strides = [1, 1]} : vector<1024x32xbf16> to vector<16x32xbf16>
    %c96_206 = arith.constant 96 : index
    %c416_207 = arith.constant 416 : index
    %228 = vector.load %arg13[%c96_206, %c416_207] : memref<144x512xbf16, #tpu.memory_space<vmem>>, vector<16x32xbf16>
    tpu.vector_store %arg13[%c96_206, %c416_207], %227 {strides = array<i32>} : memref<144x512xbf16, #tpu.memory_space<vmem>>, vector<16x32xbf16>,
    %229 = vector.extract_strided_slice %8 {offsets = [928, 0], sizes = [16, 32], strides = [1, 1]} : vector<1024x32xbf16> to vector<16x32xbf16>
    %c96_208 = arith.constant 96 : index
    %c448_209 = arith.constant 448 : index
    %230 = vector.load %arg13[%c96_208, %c448_209] : memref<144x512xbf16, #tpu.memory_space<vmem>>, vector<16x32xbf16>
    tpu.vector_store %arg13[%c96_208, %c448_209], %229 {strides = array<i32>} : memref<144x512xbf16, #tpu.memory_space<vmem>>, vector<16x32xbf16>,
    %231 = vector.extract_strided_slice %8 {offsets = [944, 0], sizes = [16, 32], strides = [1, 1]} : vector<1024x32xbf16> to vector<16x32xbf16>
    %c96_210 = arith.constant 96 : index
    %c480_211 = arith.constant 480 : index
    %232 = vector.load %arg13[%c96_210, %c480_211] : memref<144x512xbf16, #tpu.memory_space<vmem>>, vector<16x32xbf16>
    tpu.vector_store %arg13[%c96_210, %c480_211], %231 {strides = array<i32>} : memref<144x512xbf16, #tpu.memory_space<vmem>>, vector<16x32xbf16>,
    %233 = vector.extract_strided_slice %8 {offsets = [544, 0], sizes = [16, 32], strides = [1, 1]} : vector<1024x32xbf16> to vector<16x32xbf16>
    %c112 = arith.constant 112 : index
    %c0_212 = arith.constant 0 : index
    %234 = vector.load %arg13[%c112, %c0_212] : memref<144x512xbf16, #tpu.memory_space<vmem>>, vector<16x32xbf16>
    tpu.vector_store %arg13[%c112, %c0_212], %233 {strides = array<i32>} : memref<144x512xbf16, #tpu.memory_space<vmem>>, vector<16x32xbf16>,
    %235 = vector.extract_strided_slice %8 {offsets = [560, 0], sizes = [16, 32], strides = [1, 1]} : vector<1024x32xbf16> to vector<16x32xbf16>
    %c112_213 = arith.constant 112 : index
    %c32_214 = arith.constant 32 : index
    %236 = vector.load %arg13[%c112_213, %c32_214] : memref<144x512xbf16, #tpu.memory_space<vmem>>, vector<16x32xbf16>
    tpu.vector_store %arg13[%c112_213, %c32_214], %235 {strides = array<i32>} : memref<144x512xbf16, #tpu.memory_space<vmem>>, vector<16x32xbf16>,
    %237 = vector.extract_strided_slice %8 {offsets = [576, 0], sizes = [16, 32], strides = [1, 1]} : vector<1024x32xbf16> to vector<16x32xbf16>
    %c112_215 = arith.constant 112 : index
    %c64_216 = arith.constant 64 : index
    %238 = vector.load %arg13[%c112_215, %c64_216] : memref<144x512xbf16, #tpu.memory_space<vmem>>, vector<16x32xbf16>
    tpu.vector_store %arg13[%c112_215, %c64_216], %237 {strides = array<i32>} : memref<144x512xbf16, #tpu.memory_space<vmem>>, vector<16x32xbf16>,
    %239 = vector.extract_strided_slice %8 {offsets = [592, 0], sizes = [16, 32], strides = [1, 1]} : vector<1024x32xbf16> to vector<16x32xbf16>
    %c112_217 = arith.constant 112 : index
    %c96_218 = arith.constant 96 : index
    %240 = vector.load %arg13[%c112_217, %c96_218] : memref<144x512xbf16, #tpu.memory_space<vmem>>, vector<16x32xbf16>
    tpu.vector_store %arg13[%c112_217, %c96_218], %239 {strides = array<i32>} : memref<144x512xbf16, #tpu.memory_space<vmem>>, vector<16x32xbf16>,
    %241 = vector.extract_strided_slice %8 {offsets = [672, 0], sizes = [16, 32], strides = [1, 1]} : vector<1024x32xbf16> to vector<16x32xbf16>
    %c112_219 = arith.constant 112 : index
    %c128_220 = arith.constant 128 : index
    %242 = vector.load %arg13[%c112_219, %c128_220] : memref<144x512xbf16, #tpu.memory_space<vmem>>, vector<16x32xbf16>
    tpu.vector_store %arg13[%c112_219, %c128_220], %241 {strides = array<i32>} : memref<144x512xbf16, #tpu.memory_space<vmem>>, vector<16x32xbf16>,
    %243 = vector.extract_strided_slice %8 {offsets = [688, 0], sizes = [16, 32], strides = [1, 1]} : vector<1024x32xbf16> to vector<16x32xbf16>
    %c112_221 = arith.constant 112 : index
    %c160_222 = arith.constant 160 : index
    %244 = vector.load %arg13[%c112_221, %c160_222] : memref<144x512xbf16, #tpu.memory_space<vmem>>, vector<16x32xbf16>
    tpu.vector_store %arg13[%c112_221, %c160_222], %243 {strides = array<i32>} : memref<144x512xbf16, #tpu.memory_space<vmem>>, vector<16x32xbf16>,
    %245 = vector.extract_strided_slice %8 {offsets = [704, 0], sizes = [16, 32], strides = [1, 1]} : vector<1024x32xbf16> to vector<16x32xbf16>
    %c112_223 = arith.constant 112 : index
    %c192_224 = arith.constant 192 : index
    %246 = vector.load %arg13[%c112_223, %c192_224] : memref<144x512xbf16, #tpu.memory_space<vmem>>, vector<16x32xbf16>
    tpu.vector_store %arg13[%c112_223, %c192_224], %245 {strides = array<i32>} : memref<144x512xbf16, #tpu.memory_space<vmem>>, vector<16x32xbf16>,
    %247 = vector.extract_strided_slice %8 {offsets = [720, 0], sizes = [16, 32], strides = [1, 1]} : vector<1024x32xbf16> to vector<16x32xbf16>
    %c112_225 = arith.constant 112 : index
    %c224_226 = arith.constant 224 : index
    %248 = vector.load %arg13[%c112_225, %c224_226] : memref<144x512xbf16, #tpu.memory_space<vmem>>, vector<16x32xbf16>
    tpu.vector_store %arg13[%c112_225, %c224_226], %247 {strides = array<i32>} : memref<144x512xbf16, #tpu.memory_space<vmem>>, vector<16x32xbf16>,
    %249 = vector.extract_strided_slice %8 {offsets = [800, 0], sizes = [16, 32], strides = [1, 1]} : vector<1024x32xbf16> to vector<16x32xbf16>
    %c112_227 = arith.constant 112 : index
    %c256_228 = arith.constant 256 : index
    %250 = vector.load %arg13[%c112_227, %c256_228] : memref<144x512xbf16, #tpu.memory_space<vmem>>, vector<16x32xbf16>
    tpu.vector_store %arg13[%c112_227, %c256_228], %249 {strides = array<i32>} : memref<144x512xbf16, #tpu.memory_space<vmem>>, vector<16x32xbf16>,
    %251 = vector.extract_strided_slice %8 {offsets = [816, 0], sizes = [16, 32], strides = [1, 1]} : vector<1024x32xbf16> to vector<16x32xbf16>
    %c112_229 = arith.constant 112 : index
    %c288_230 = arith.constant 288 : index
    %252 = vector.load %arg13[%c112_229, %c288_230] : memref<144x512xbf16, #tpu.memory_space<vmem>>, vector<16x32xbf16>
    tpu.vector_store %arg13[%c112_229, %c288_230], %251 {strides = array<i32>} : memref<144x512xbf16, #tpu.memory_space<vmem>>, vector<16x32xbf16>,
    %253 = vector.extract_strided_slice %8 {offsets = [832, 0], sizes = [16, 32], strides = [1, 1]} : vector<1024x32xbf16> to vector<16x32xbf16>
    %c112_231 = arith.constant 112 : index
    %c320_232 = arith.constant 320 : index
    %254 = vector.load %arg13[%c112_231, %c320_232] : memref<144x512xbf16, #tpu.memory_space<vmem>>, vector<16x32xbf16>
    tpu.vector_store %arg13[%c112_231, %c320_232], %253 {strides = array<i32>} : memref<144x512xbf16, #tpu.memory_space<vmem>>, vector<16x32xbf16>,
    %255 = vector.extract_strided_slice %8 {offsets = [848, 0], sizes = [16, 32], strides = [1, 1]} : vector<1024x32xbf16> to vector<16x32xbf16>
    %c112_233 = arith.constant 112 : index
    %c352_234 = arith.constant 352 : index
    %256 = vector.load %arg13[%c112_233, %c352_234] : memref<144x512xbf16, #tpu.memory_space<vmem>>, vector<16x32xbf16>
    tpu.vector_store %arg13[%c112_233, %c352_234], %255 {strides = array<i32>} : memref<144x512xbf16, #tpu.memory_space<vmem>>, vector<16x32xbf16>,
    %257 = vector.extract_strided_slice %8 {offsets = [928, 0], sizes = [16, 32], strides = [1, 1]} : vector<1024x32xbf16> to vector<16x32xbf16>
    %c112_235 = arith.constant 112 : index
    %c384_236 = arith.constant 384 : index
    %258 = vector.load %arg13[%c112_235, %c384_236] : memref<144x512xbf16, #tpu.memory_space<vmem>>, vector<16x32xbf16>
    tpu.vector_store %arg13[%c112_235, %c384_236], %257 {strides = array<i32>} : memref<144x512xbf16, #tpu.memory_space<vmem>>, vector<16x32xbf16>,
    %259 = vector.extract_strided_slice %8 {offsets = [944, 0], sizes = [16, 32], strides = [1, 1]} : vector<1024x32xbf16> to vector<16x32xbf16>
    %c112_237 = arith.constant 112 : index
    %c416_238 = arith.constant 416 : index
    %260 = vector.load %arg13[%c112_237, %c416_238] : memref<144x512xbf16, #tpu.memory_space<vmem>>, vector<16x32xbf16>
    tpu.vector_store %arg13[%c112_237, %c416_238], %259 {strides = array<i32>} : memref<144x512xbf16, #tpu.memory_space<vmem>>, vector<16x32xbf16>,
    %261 = vector.extract_strided_slice %8 {offsets = [960, 0], sizes = [16, 32], strides = [1, 1]} : vector<1024x32xbf16> to vector<16x32xbf16>
    %c112_239 = arith.constant 112 : index
    %c448_240 = arith.constant 448 : index
    %262 = vector.load %arg13[%c112_239, %c448_240] : memref<144x512xbf16, #tpu.memory_space<vmem>>, vector<16x32xbf16>
    tpu.vector_store %arg13[%c112_239, %c448_240], %261 {strides = array<i32>} : memref<144x512xbf16, #tpu.memory_space<vmem>>, vector<16x32xbf16>,
    %263 = vector.extract_strided_slice %8 {offsets = [976, 0], sizes = [16, 32], strides = [1, 1]} : vector<1024x32xbf16> to vector<16x32xbf16>
    %c112_241 = arith.constant 112 : index
    %c480_242 = arith.constant 480 : index
    %264 = vector.load %arg13[%c112_241, %c480_242] : memref<144x512xbf16, #tpu.memory_space<vmem>>, vector<16x32xbf16>
    tpu.vector_store %arg13[%c112_241, %c480_242], %263 {strides = array<i32>} : memref<144x512xbf16, #tpu.memory_space<vmem>>, vector<16x32xbf16>,
    %265 = vector.extract_strided_slice %8 {offsets = [576, 0], sizes = [16, 32], strides = [1, 1]} : vector<1024x32xbf16> to vector<16x32xbf16>
    %c128_243 = arith.constant 128 : index
    %c0_244 = arith.constant 0 : index
    %266 = vector.load %arg13[%c128_243, %c0_244] : memref<144x512xbf16, #tpu.memory_space<vmem>>, vector<16x32xbf16>
    tpu.vector_store %arg13[%c128_243, %c0_244], %265 {strides = array<i32>} : memref<144x512xbf16, #tpu.memory_space<vmem>>, vector<16x32xbf16>,
    %267 = vector.extract_strided_slice %8 {offsets = [592, 0], sizes = [16, 32], strides = [1, 1]} : vector<1024x32xbf16> to vector<16x32xbf16>
    %c128_245 = arith.constant 128 : index
    %c32_246 = arith.constant 32 : index
    %268 = vector.load %arg13[%c128_245, %c32_246] : memref<144x512xbf16, #tpu.memory_space<vmem>>, vector<16x32xbf16>
    tpu.vector_store %arg13[%c128_245, %c32_246], %267 {strides = array<i32>} : memref<144x512xbf16, #tpu.memory_space<vmem>>, vector<16x32xbf16>,
    %269 = vector.extract_strided_slice %8 {offsets = [608, 0], sizes = [16, 32], strides = [1, 1]} : vector<1024x32xbf16> to vector<16x32xbf16>
    %c128_247 = arith.constant 128 : index
    %c64_248 = arith.constant 64 : index
    %270 = vector.load %arg13[%c128_247, %c64_248] : memref<144x512xbf16, #tpu.memory_space<vmem>>, vector<16x32xbf16>
    tpu.vector_store %arg13[%c128_247, %c64_248], %269 {strides = array<i32>} : memref<144x512xbf16, #tpu.memory_space<vmem>>, vector<16x32xbf16>,
    %271 = vector.extract_strided_slice %8 {offsets = [624, 0], sizes = [16, 32], strides = [1, 1]} : vector<1024x32xbf16> to vector<16x32xbf16>
    %c128_249 = arith.constant 128 : index
    %c96_250 = arith.constant 96 : index
    %272 = vector.load %arg13[%c128_249, %c96_250] : memref<144x512xbf16, #tpu.memory_space<vmem>>, vector<16x32xbf16>
    tpu.vector_store %arg13[%c128_249, %c96_250], %271 {strides = array<i32>} : memref<144x512xbf16, #tpu.memory_space<vmem>>, vector<16x32xbf16>,
    %273 = vector.extract_strided_slice %8 {offsets = [704, 0], sizes = [16, 32], strides = [1, 1]} : vector<1024x32xbf16> to vector<16x32xbf16>
    %c128_251 = arith.constant 128 : index
    %c128_252 = arith.constant 128 : index
    %274 = vector.load %arg13[%c128_251, %c128_252] : memref<144x512xbf16, #tpu.memory_space<vmem>>, vector<16x32xbf16>
    tpu.vector_store %arg13[%c128_251, %c128_252], %273 {strides = array<i32>} : memref<144x512xbf16, #tpu.memory_space<vmem>>, vector<16x32xbf16>,
    %275 = vector.extract_strided_slice %8 {offsets = [720, 0], sizes = [16, 32], strides = [1, 1]} : vector<1024x32xbf16> to vector<16x32xbf16>
    %c128_253 = arith.constant 128 : index
    %c160_254 = arith.constant 160 : index
    %276 = vector.load %arg13[%c128_253, %c160_254] : memref<144x512xbf16, #tpu.memory_space<vmem>>, vector<16x32xbf16>
    tpu.vector_store %arg13[%c128_253, %c160_254], %275 {strides = array<i32>} : memref<144x512xbf16, #tpu.memory_space<vmem>>, vector<16x32xbf16>,
    %277 = vector.extract_strided_slice %8 {offsets = [736, 0], sizes = [16, 32], strides = [1, 1]} : vector<1024x32xbf16> to vector<16x32xbf16>
    %c128_255 = arith.constant 128 : index
    %c192_256 = arith.constant 192 : index
    %278 = vector.load %arg13[%c128_255, %c192_256] : memref<144x512xbf16, #tpu.memory_space<vmem>>, vector<16x32xbf16>
    tpu.vector_store %arg13[%c128_255, %c192_256], %277 {strides = array<i32>} : memref<144x512xbf16, #tpu.memory_space<vmem>>, vector<16x32xbf16>,
    %279 = vector.extract_strided_slice %8 {offsets = [752, 0], sizes = [16, 32], strides = [1, 1]} : vector<1024x32xbf16> to vector<16x32xbf16>
    %c128_257 = arith.constant 128 : index
    %c224_258 = arith.constant 224 : index
    %280 = vector.load %arg13[%c128_257, %c224_258] : memref<144x512xbf16, #tpu.memory_space<vmem>>, vector<16x32xbf16>
    tpu.vector_store %arg13[%c128_257, %c224_258], %279 {strides = array<i32>} : memref<144x512xbf16, #tpu.memory_space<vmem>>, vector<16x32xbf16>,
    %281 = vector.extract_strided_slice %8 {offsets = [832, 0], sizes = [16, 32], strides = [1, 1]} : vector<1024x32xbf16> to vector<16x32xbf16>
    %c128_259 = arith.constant 128 : index
    %c256_260 = arith.constant 256 : index
    %282 = vector.load %arg13[%c128_259, %c256_260] : memref<144x512xbf16, #tpu.memory_space<vmem>>, vector<16x32xbf16>
    tpu.vector_store %arg13[%c128_259, %c256_260], %281 {strides = array<i32>} : memref<144x512xbf16, #tpu.memory_space<vmem>>, vector<16x32xbf16>,
    %283 = vector.extract_strided_slice %8 {offsets = [848, 0], sizes = [16, 32], strides = [1, 1]} : vector<1024x32xbf16> to vector<16x32xbf16>
    %c128_261 = arith.constant 128 : index
    %c288_262 = arith.constant 288 : index
    %284 = vector.load %arg13[%c128_261, %c288_262] : memref<144x512xbf16, #tpu.memory_space<vmem>>, vector<16x32xbf16>
    tpu.vector_store %arg13[%c128_261, %c288_262], %283 {strides = array<i32>} : memref<144x512xbf16, #tpu.memory_space<vmem>>, vector<16x32xbf16>,
    %285 = vector.extract_strided_slice %8 {offsets = [864, 0], sizes = [16, 32], strides = [1, 1]} : vector<1024x32xbf16> to vector<16x32xbf16>
    %c128_263 = arith.constant 128 : index
    %c320_264 = arith.constant 320 : index
    %286 = vector.load %arg13[%c128_263, %c320_264] : memref<144x512xbf16, #tpu.memory_space<vmem>>, vector<16x32xbf16>
    tpu.vector_store %arg13[%c128_263, %c320_264], %285 {strides = array<i32>} : memref<144x512xbf16, #tpu.memory_space<vmem>>, vector<16x32xbf16>,
    %287 = vector.extract_strided_slice %8 {offsets = [880, 0], sizes = [16, 32], strides = [1, 1]} : vector<1024x32xbf16> to vector<16x32xbf16>
    %c128_265 = arith.constant 128 : index
    %c352_266 = arith.constant 352 : index
    %288 = vector.load %arg13[%c128_265, %c352_266] : memref<144x512xbf16, #tpu.memory_space<vmem>>, vector<16x32xbf16>
    tpu.vector_store %arg13[%c128_265, %c352_266], %287 {strides = array<i32>} : memref<144x512xbf16, #tpu.memory_space<vmem>>, vector<16x32xbf16>,
    %289 = vector.extract_strided_slice %8 {offsets = [960, 0], sizes = [16, 32], strides = [1, 1]} : vector<1024x32xbf16> to vector<16x32xbf16>
    %c128_267 = arith.constant 128 : index
    %c384_268 = arith.constant 384 : index
    %290 = vector.load %arg13[%c128_267, %c384_268] : memref<144x512xbf16, #tpu.memory_space<vmem>>, vector<16x32xbf16>
    tpu.vector_store %arg13[%c128_267, %c384_268], %289 {strides = array<i32>} : memref<144x512xbf16, #tpu.memory_space<vmem>>, vector<16x32xbf16>,
    %291 = vector.extract_strided_slice %8 {offsets = [976, 0], sizes = [16, 32], strides = [1, 1]} : vector<1024x32xbf16> to vector<16x32xbf16>
    %c128_269 = arith.constant 128 : index
    %c416_270 = arith.constant 416 : index
    %292 = vector.load %arg13[%c128_269, %c416_270] : memref<144x512xbf16, #tpu.memory_space<vmem>>, vector<16x32xbf16>
    tpu.vector_store %arg13[%c128_269, %c416_270], %291 {strides = array<i32>} : memref<144x512xbf16, #tpu.memory_space<vmem>>, vector<16x32xbf16>,
    %293 = vector.extract_strided_slice %8 {offsets = [992, 0], sizes = [16, 32], strides = [1, 1]} : vector<1024x32xbf16> to vector<16x32xbf16>
    %c128_271 = arith.constant 128 : index
    %c448_272 = arith.constant 448 : index
    %294 = vector.load %arg13[%c128_271, %c448_272] : memref<144x512xbf16, #tpu.memory_space<vmem>>, vector<16x32xbf16>
    tpu.vector_store %arg13[%c128_271, %c448_272], %293 {strides = array<i32>} : memref<144x512xbf16, #tpu.memory_space<vmem>>, vector<16x32xbf16>,
    %295 = vector.extract_strided_slice %8 {offsets = [1008, 0], sizes = [16, 32], strides = [1, 1]} : vector<1024x32xbf16> to vector<16x32xbf16>
    %c128_273 = arith.constant 128 : index
    %c480_274 = arith.constant 480 : index
    %296 = vector.load %arg13[%c128_273, %c480_274] : memref<144x512xbf16, #tpu.memory_space<vmem>>, vector<16x32xbf16>
    tpu.vector_store %arg13[%c128_273, %c480_274], %295 {strides = array<i32>} : memref<144x512xbf16, #tpu.memory_space<vmem>>, vector<16x32xbf16>,
    %c0_275 = arith.constant 0 : index
    %c0_276 = arith.constant 0 : index
    %297 = vector.load %arg13[%c0_275, %c0_276] : memref<144x512xbf16, #tpu.memory_space<vmem>>, vector<144x512xbf16>
    %c0_277 = arith.constant 0 : index
    %c0_278 = arith.constant 0 : index
    %298 = vector.load %arg4[%c0_277, %c0_278] : memref<512x64xbf16, #tpu.memory_space<vmem>>, vector<512x64xbf16>
    %cst_279 = arith.constant dense<0.000000e+00> : vector<144x64xf32>
    %299 = tpu.matmul %297, %298, %cst_279 {dimension_numbers = #tpu.dot_dimension_numbers<[1], [0], [0], [1], [0, 0, 1, 1], [], []>} : vector<144x512xbf16>, vector<512x64xbf16>, vector<144x64xf32> -> vector<144x64xf32>
    %c0_280 = arith.constant 0 : index
    %c0_281 = arith.constant 0 : index
    %300 = vector.load %arg5[%c0_280, %c0_281] : memref<1x64xf32, #tpu.memory_space<vmem>>, vector<1x64xf32>
    %301 = vector.broadcast %300 : vector<1x64xf32> to vector<144x64xf32>
    %302 = arith.addf %299, %301 : vector<144x64xf32>
    %cst_282 = arith.constant 0.000000e+00 : f32
    %303 = vector.broadcast %cst_282 : f32 to vector<144x64xf32>
    %304 = arith.maximumf %302, %303 : vector<144x64xf32>
    %305 = arith.truncf %304 : vector<144x64xf32> to vector<144x64xbf16>
    %306 = vector.extract_strided_slice %305 {offsets = [0, 0], sizes = [16, 64], strides = [1, 1]} : vector<144x64xbf16> to vector<16x64xbf16>
    %c0_283 = arith.constant 0 : index
    %c0_284 = arith.constant 0 : index
    %307 = vector.load %arg14[%c0_283, %c0_284] : memref<16x576xbf16, #tpu.memory_space<vmem>>, vector<16x64xbf16>
    tpu.vector_store %arg14[%c0_283, %c0_284], %306 {strides = array<i32>} : memref<16x576xbf16, #tpu.memory_space<vmem>>, vector<16x64xbf16>,
    %308 = vector.extract_strided_slice %305 {offsets = [16, 0], sizes = [16, 64], strides = [1, 1]} : vector<144x64xbf16> to vector<16x64xbf16>
    %c0_285 = arith.constant 0 : index
    %c64_286 = arith.constant 64 : index
    %309 = vector.load %arg14[%c0_285, %c64_286] : memref<16x576xbf16, #tpu.memory_space<vmem>>, vector<16x64xbf16>
    tpu.vector_store %arg14[%c0_285, %c64_286], %308 {strides = array<i32>} : memref<16x576xbf16, #tpu.memory_space<vmem>>, vector<16x64xbf16>,
    %310 = vector.extract_strided_slice %305 {offsets = [32, 0], sizes = [16, 64], strides = [1, 1]} : vector<144x64xbf16> to vector<16x64xbf16>
    %c0_287 = arith.constant 0 : index
    %c128_288 = arith.constant 128 : index
    %311 = vector.load %arg14[%c0_287, %c128_288] : memref<16x576xbf16, #tpu.memory_space<vmem>>, vector<16x64xbf16>
    tpu.vector_store %arg14[%c0_287, %c128_288], %310 {strides = array<i32>} : memref<16x576xbf16, #tpu.memory_space<vmem>>, vector<16x64xbf16>,
    %312 = vector.extract_strided_slice %305 {offsets = [48, 0], sizes = [16, 64], strides = [1, 1]} : vector<144x64xbf16> to vector<16x64xbf16>
    %c0_289 = arith.constant 0 : index
    %c192_290 = arith.constant 192 : index
    %313 = vector.load %arg14[%c0_289, %c192_290] : memref<16x576xbf16, #tpu.memory_space<vmem>>, vector<16x64xbf16>
    tpu.vector_store %arg14[%c0_289, %c192_290], %312 {strides = array<i32>} : memref<16x576xbf16, #tpu.memory_space<vmem>>, vector<16x64xbf16>,
    %314 = vector.extract_strided_slice %305 {offsets = [64, 0], sizes = [16, 64], strides = [1, 1]} : vector<144x64xbf16> to vector<16x64xbf16>
    %c0_291 = arith.constant 0 : index
    %c256_292 = arith.constant 256 : index
    %315 = vector.load %arg14[%c0_291, %c256_292] : memref<16x576xbf16, #tpu.memory_space<vmem>>, vector<16x64xbf16>
    tpu.vector_store %arg14[%c0_291, %c256_292], %314 {strides = array<i32>} : memref<16x576xbf16, #tpu.memory_space<vmem>>, vector<16x64xbf16>,
    %316 = vector.extract_strided_slice %305 {offsets = [80, 0], sizes = [16, 64], strides = [1, 1]} : vector<144x64xbf16> to vector<16x64xbf16>
    %c0_293 = arith.constant 0 : index
    %c320_294 = arith.constant 320 : index
    %317 = vector.load %arg14[%c0_293, %c320_294] : memref<16x576xbf16, #tpu.memory_space<vmem>>, vector<16x64xbf16>
    tpu.vector_store %arg14[%c0_293, %c320_294], %316 {strides = array<i32>} : memref<16x576xbf16, #tpu.memory_space<vmem>>, vector<16x64xbf16>,
    %318 = vector.extract_strided_slice %305 {offsets = [96, 0], sizes = [16, 64], strides = [1, 1]} : vector<144x64xbf16> to vector<16x64xbf16>
    %c0_295 = arith.constant 0 : index
    %c384_296 = arith.constant 384 : index
    %319 = vector.load %arg14[%c0_295, %c384_296] : memref<16x576xbf16, #tpu.memory_space<vmem>>, vector<16x64xbf16>
    tpu.vector_store %arg14[%c0_295, %c384_296], %318 {strides = array<i32>} : memref<16x576xbf16, #tpu.memory_space<vmem>>, vector<16x64xbf16>,
    %320 = vector.extract_strided_slice %305 {offsets = [112, 0], sizes = [16, 64], strides = [1, 1]} : vector<144x64xbf16> to vector<16x64xbf16>
    %c0_297 = arith.constant 0 : index
    %c448_298 = arith.constant 448 : index
    %321 = vector.load %arg14[%c0_297, %c448_298] : memref<16x576xbf16, #tpu.memory_space<vmem>>, vector<16x64xbf16>
    tpu.vector_store %arg14[%c0_297, %c448_298], %320 {strides = array<i32>} : memref<16x576xbf16, #tpu.memory_space<vmem>>, vector<16x64xbf16>,
    %322 = vector.extract_strided_slice %305 {offsets = [128, 0], sizes = [16, 64], strides = [1, 1]} : vector<144x64xbf16> to vector<16x64xbf16>
    %c0_299 = arith.constant 0 : index
    %c512 = arith.constant 512 : index
    %323 = vector.load %arg14[%c0_299, %c512] : memref<16x576xbf16, #tpu.memory_space<vmem>>, vector<16x64xbf16>
    tpu.vector_store %arg14[%c0_299, %c512], %322 {strides = array<i32>} : memref<16x576xbf16, #tpu.memory_space<vmem>>, vector<16x64xbf16>,
    %c0_300 = arith.constant 0 : index
    %c0_301 = arith.constant 0 : index
    %324 = vector.load %arg14[%c0_300, %c0_301] : memref<16x576xbf16, #tpu.memory_space<vmem>>, vector<16x576xbf16>
    %c0_302 = arith.constant 0 : index
    %c0_303 = arith.constant 0 : index
    %325 = vector.load %arg6[%c0_302, %c0_303] : memref<576x64xbf16, #tpu.memory_space<vmem>>, vector<576x64xbf16>
    %cst_304 = arith.constant dense<0.000000e+00> : vector<16x64xf32>
    %326 = tpu.matmul %324, %325, %cst_304 {dimension_numbers = #tpu.dot_dimension_numbers<[1], [0], [0], [1], [0, 0, 1, 1], [], []>} : vector<16x576xbf16>, vector<576x64xbf16>, vector<16x64xf32> -> vector<16x64xf32>
    %c0_305 = arith.constant 0 : index
    %c0_306 = arith.constant 0 : index
    %327 = vector.load %arg7[%c0_305, %c0_306] : memref<1x64xf32, #tpu.memory_space<vmem>>, vector<1x64xf32>
    %328 = vector.broadcast %327 : vector<1x64xf32> to vector<16x64xf32>
    %329 = arith.addf %326, %328 : vector<16x64xf32>
    %cst_307 = arith.constant 0.000000e+00 : f32
    %330 = vector.broadcast %cst_307 : f32 to vector<16x64xf32>
    %331 = arith.maximumf %329, %330 : vector<16x64xf32>
    %332 = arith.truncf %331 : vector<16x64xf32> to vector<16x64xbf16>
    %c0_308 = arith.constant 0 : index
    %c0_309 = arith.constant 0 : index
    %333 = vector.load %arg8[%c0_308, %c0_309] : memref<64x512xbf16, #tpu.memory_space<vmem>>, vector<64x512xbf16>
    %cst_310 = arith.constant dense<0.000000e+00> : vector<16x512xf32>
    %334 = tpu.matmul %332, %333, %cst_310 {dimension_numbers = #tpu.dot_dimension_numbers<[1], [0], [0], [1], [0, 0, 1, 1], [], []>} : vector<16x64xbf16>, vector<64x512xbf16>, vector<16x512xf32> -> vector<16x512xf32>
    %c0_311 = arith.constant 0 : index
    %c0_312 = arith.constant 0 : index
    %335 = vector.load %arg9[%c0_311, %c0_312] : memref<1x512xf32, #tpu.memory_space<vmem>>, vector<1x512xf32>
    %336 = vector.broadcast %335 : vector<1x512xf32> to vector<16x512xf32>
    %337 = arith.addf %334, %336 : vector<16x512xf32>
    %cst_313 = arith.constant 0.000000e+00 : f32
    %338 = vector.broadcast %cst_313 : f32 to vector<16x512xf32>
    %339 = arith.maximumf %337, %338 : vector<16x512xf32>
    %340 = arith.truncf %339 : vector<16x512xf32> to vector<16x512xbf16>
    %c0_314 = arith.constant 0 : index
    %c0_315 = arith.constant 0 : index
    %341 = vector.load %arg10[%c0_314, %c0_315] : memref<512x128xbf16, #tpu.memory_space<vmem>>, vector<512x128xbf16>
    %cst_316 = arith.constant dense<0.000000e+00> : vector<16x128xf32>
    %342 = tpu.matmul %340, %341, %cst_316 {dimension_numbers = #tpu.dot_dimension_numbers<[1], [0], [0], [1], [0, 0, 1, 1], [], []>} : vector<16x512xbf16>, vector<512x128xbf16>, vector<16x128xf32> -> vector<16x128xf32>
    %c0_317 = arith.constant 0 : index
    %c0_318 = arith.constant 0 : index
    %343 = vector.load %arg11[%c0_317, %c0_318] : memref<1x128xf32, #tpu.memory_space<vmem>>, vector<1x128xf32>
    %344 = vector.broadcast %343 : vector<1x128xf32> to vector<16x128xf32>
    %345 = arith.addf %342, %344 : vector<16x128xf32>
    %c0_319 = arith.constant 0 : index
    %c0_320 = arith.constant 0 : index
    %346 = vector.load %arg12[%c0_319, %c0_320] : memref<16x128xf32, #tpu.memory_space<vmem>>, vector<16x128xf32>
    tpu.vector_store %arg12[%c0_319, %c0_320], %345 {strides = array<i32>} : memref<16x128xf32, #tpu.memory_space<vmem>>, vector<16x128xf32>,
    return
  }
  func.func @transform_0(%arg0: i32) -> (i32, i32) {
    %c0_i32 = arith.constant 0 : i32
    %c0_i32_0 = arith.constant 0 : i32
    return %arg0, %c0_i32 : i32, i32
  }
  func.func @transform_1(%arg0: i32) -> (i32, i32) {
    %c0_i32 = arith.constant 0 : i32
    %c0_i32_0 = arith.constant 0 : i32
    %c0_i32_1 = arith.constant 0 : i32
    return %c0_i32, %c0_i32_0 : i32, i32
  }
  func.func @transform_2(%arg0: i32) -> (i32, i32) {
    %c0_i32 = arith.constant 0 : i32
    %c0_i32_0 = arith.constant 0 : i32
    %c0_i32_1 = arith.constant 0 : i32
    return %c0_i32, %c0_i32_0 : i32, i32
  }
  func.func @transform_3(%arg0: i32) -> (i32, i32) {
    %c0_i32 = arith.constant 0 : i32
    %c0_i32_0 = arith.constant 0 : i32
    %c0_i32_1 = arith.constant 0 : i32
    return %c0_i32, %c0_i32_0 : i32, i32
  }
  func.func @transform_4(%arg0: i32) -> (i32, i32) {
    %c0_i32 = arith.constant 0 : i32
    %c0_i32_0 = arith.constant 0 : i32
    %c0_i32_1 = arith.constant 0 : i32
    return %c0_i32, %c0_i32_0 : i32, i32
  }
  func.func @transform_5(%arg0: i32) -> (i32, i32) {
    %c0_i32 = arith.constant 0 : i32
    %c0_i32_0 = arith.constant 0 : i32
    %c0_i32_1 = arith.constant 0 : i32
    return %c0_i32, %c0_i32_0 : i32, i32
  }
  func.func @transform_6(%arg0: i32) -> (i32, i32) {
    %c0_i32 = arith.constant 0 : i32
    %c0_i32_0 = arith.constant 0 : i32
    %c0_i32_1 = arith.constant 0 : i32
    return %c0_i32, %c0_i32_0 : i32, i32
  }
  func.func @transform_7(%arg0: i32) -> (i32, i32) {
    %c0_i32 = arith.constant 0 : i32
    %c0_i32_0 = arith.constant 0 : i32
    %c0_i32_1 = arith.constant 0 : i32
    return %c0_i32, %c0_i32_0 : i32, i32
  }
  func.func @transform_8(%arg0: i32) -> (i32, i32) {
    %c0_i32 = arith.constant 0 : i32
    %c0_i32_0 = arith.constant 0 : i32
    %c0_i32_1 = arith.constant 0 : i32
    return %c0_i32, %c0_i32_0 : i32, i32
  }
  func.func @transform_9(%arg0: i32) -> (i32, i32) {
    %c0_i32 = arith.constant 0 : i32
    %c0_i32_0 = arith.constant 0 : i32
    %c0_i32_1 = arith.constant 0 : i32
    return %c0_i32, %c0_i32_0 : i32, i32
  }
  func.func @transform_10(%arg0: i32) -> (i32, i32) {
    %c0_i32 = arith.constant 0 : i32
    %c0_i32_0 = arith.constant 0 : i32
    %c0_i32_1 = arith.constant 0 : i32
    return %c0_i32, %c0_i32_0 : i32, i32
  }
  func.func @transform_11(%arg0: i32) -> (i32, i32) {
    %c0_i32 = arith.constant 0 : i32
    %c0_i32_0 = arith.constant 0 : i32
    return %arg0, %c0_i32 : i32, i32
  }
}

</mosaic_0001>

<bundles_post_ra>
// kernel: forward.1
= control target key start
LH: loop header
LB: loop body
LE: loop exit
PB: predicated region body
PF: predicated region fallthrough
CT: control target
= control target key end

     0   :  { %vm1853_vm0 = vcmask 257024   ;;  %s5906_s24 = smov 32   ;;  %s5907_s21 = smov 64   ;;  %vm1864_vm1 = vcmask 519424   ;;  %vm1875_vm2 = vcmask 781824   ;;  %vm1886_vm3 = vcmask 1044224   ;;  %s8135_s1 = inlined_call_operand.vmem [shape: bf16[256,32], index: 1, kind: input, shape index: {}]   ;;  %s8136_s2 = inlined_call_operand.vmem [shape: f32[1,32], index: 2, kind: input, shape index: {}]   ;;  %s8137_s0 = inlined_call_operand.vmem [shape: bf16[1024,256], index: 0, kind: input, shape index: {}]   ;;  %s8138_s3 = inlined_call_operand.vmem [shape: bf16[512,64], index: 3, kind: input, shape index: {}]   ;;  %s8139_s4 = inlined_call_operand.vmem [shape: f32[1,64], index: 4, kind: input, shape index: {}]   ;;  %s8140_s5 = inlined_call_operand.vmem [shape: bf16[576,64], index: 5, kind: input, shape index: {}]   ;;  %s8141_s6 = inlined_call_operand.vmem [shape: f32[1,64], index: 6, kind: input, shape index: {}]   ;;  %s8142_s7 = inlined_call_operand.vmem [shape: bf16[64,512], index: 7, kind: input, shape index: {}]   ;;  %s8143_s9 = inlined_call_operand.vmem [shape: bf16[512,128], index: 9, kind: input, shape index: {}]   ;;  %s8144_s10 = inlined_call_operand.vmem [shape: f32[1,128], index: 10, kind: input, shape index: {}]   ;;  %s8145_s8 = inlined_call_operand.vmem [shape: f32[1,512], index: 8, kind: input, shape index: {}]   ;;  %s8146_s11 = inlined_call_operand.vmem [shape: f32[16,128], index: 11, kind: output, shape index: {}]  }
   0x1   :  { %v5712_v0 = vld [vmem:[%s8135_s1 + $0x38] sm:$0xff]  ;;  %v5711_v2 = vld [vmem:[%s8135_s1 + $0x30] sm:$0xff]  ;;  %v5710_v4 = vld [vmem:[%s8135_s1 + $0x28] sm:$0xff]  ;;  %s5908_s19 = smov 96   ;;  %vm3417_vm4 = vcmask 519168   ;;  %vm3428_vm5 = vcmask 1043968  }
   0x2   :  { %v5720_v1 = vld [vmem:[%s8135_s1 + $0x78] sm:$0xff]  ;;  %939 = vmatpush.bf16.msra.mxu0 %v5712_v0  ;;  %v5719_v3 = vld [vmem:[%s8135_s1 + $0x70] sm:$0xff]  ;;  %5878 = vmatpush.bf16.msra.mxu3 %v5712_v0  ;;  %v5718_v5 = vld [vmem:[%s8135_s1 + $0x68] sm:$0xff]  ;;  %vm3792_vm6 = vcmask 523264  }
   0x3   :  { %1268 = vmatpush.bf16.msra.mxu1 %v5720_v1  ;;  %5886 = vmatpush.bf16.msra.mxu2 %v5720_v1  ;;  %v5709_v6 = vld [vmem:[%s8135_s1 + $0x20] sm:$0xff]  ;;  %v5708_v8 = vld [vmem:[%s8135_s1 + $0x18] sm:$0xff]  ;;  %v5707_v10 = vld [vmem:[%s8135_s1 + $0x10] sm:$0xff] }
   0x4   :  { %v5717_v7 = vld [vmem:[%s8135_s1 + $0x60] sm:$0xff]  ;;  %v5716_v9 = vld [vmem:[%s8135_s1 + $0x58] sm:$0xff]  ;;  %v5715_v11 = vld [vmem:[%s8135_s1 + $0x50] sm:$0xff] }
   0x5   :  { %v5706_v12 = vld [vmem:[%s8135_s1 + $0x8] sm:$0xff]  ;;  %v5705_v14 = vld [vmem:[%s8135_s1] sm:$0xff]  ;;  %v4378_v25 = vld [vmem:[%s8137_s0 + $0x10] sm:$0xf] }
   0x6   :  { %940 = vmatpush.bf16.msra.mxu0 %v5711_v2  ;;  %5879 = vmatpush.bf16.msra.mxu3 %v5711_v2  ;;  %v5714_v13 = vld [vmem:[%s8135_s1 + $0x48] sm:$0xff]  ;;  %v5713_v15 = vld [vmem:[%s8135_s1 + $0x40] sm:$0xff]  ;;  %v5580_v26 = vld [vmem:[%s8137_s0 + $0x14] sm:$0xf0] }
   0x7   :  { %1269 = vmatpush.bf16.msra.mxu1 %v5719_v3  ;;  %5887 = vmatpush.bf16.msra.mxu2 %v5719_v3  ;;  %v4370_v16 = vld [vmem:[%s8137_s0] sm:$0xf]  ;;  %v5578_v17 = vld [vmem:[%s8137_s0 + $0x4] sm:$0xf0]  ;;  %v5577_v18 = vld [vmem:[%s8137_s0 + $0x4] sm:$0xf]  ;;  %v4379_v31 = vor.u32 %v5580_v26, %v4378_v25 }
   0x8   :  { %v4372_v19 = vld [vmem:[%s8137_s0 + $0x8] sm:$0xf0]  ;;  %v5669_v20 = vld [vmem:[%s8137_s0 + $0x2e4] sm:$0xf]  ;;  %v4371_v22 = vor.u32 %v5578_v17, %v4370_v16  ;;  %v5579_v27 = vld [vmem:[%s8137_s0 + $0x14] sm:$0xf] }
   0x9   :  { %v4740_v21 = vld [vmem:[%s8137_s0 + $0x2e8] sm:$0xf0]  ;;  %v4375_v23 = vor.u32 %v5577_v18, %v4372_v19  ;;  %v4380_v28 = vld [vmem:[%s8137_s0 + $0x18] sm:$0xf0]  ;;  %v5671_v29 = vld [vmem:[%s8137_s0 + $0x2f4] sm:$0xf] }
   0xa   :  { %941 = vmatpush.bf16.msra.mxu0 %v5710_v4  ;;  %5880 = vmatpush.bf16.msra.mxu3 %v5710_v4  ;;  %v4743_v24 = vor.u32 %v5669_v20, %v4740_v21  ;;  %v4748_v30 = vld [vmem:[%s8137_s0 + $0x2f8] sm:$0xf0]  ;;  %v4383_v32 = vor.u32 %v5579_v27, %v4380_v28  ;;  %v4386_v34 = vld [vmem:[%s8137_s0 + $0x20] sm:$0xf]  ;;  %v5582_v35 = vld [vmem:[%s8137_s0 + $0x24] sm:$0xf0] }
   0xb   :  { %1270 = vmatpush.bf16.msra.mxu1 %v5718_v5  ;;  %5888 = vmatpush.bf16.msra.mxu2 %v5718_v5  ;;  %v4751_v33 = vor.u32 %v5671_v29, %v4748_v30  ;;  %v5581_v36 = vld [vmem:[%s8137_s0 + $0x24] sm:$0xf]  ;;  %v4388_v37 = vld [vmem:[%s8137_s0 + $0x28] sm:$0xf0]  ;;  %v4387_v40 = vor.u32 %v5582_v35, %v4386_v34  ;;  %v4394_v43 = vld [vmem:[%s8137_s0 + $0x30] sm:$0xf] }
   0xc   :  { %v5673_v38 = vld [vmem:[%s8137_s0 + $0x304] sm:$0xf]  ;;  %v4756_v39 = vld [vmem:[%s8137_s0 + $0x308] sm:$0xf0]  ;;  %v4391_v41 = vor.u32 %v5581_v36, %v4388_v37  ;;  %v5584_v44 = vld [vmem:[%s8137_s0 + $0x34] sm:$0xf0] }
   0xd   :  { %v4759_v42 = vor.u32 %v5673_v38, %v4756_v39  ;;  %v5583_v45 = vld [vmem:[%s8137_s0 + $0x34] sm:$0xf]  ;;  %v4396_v46 = vld [vmem:[%s8137_s0 + $0x38] sm:$0xf0]  ;;  %v4395_v49 = vor.u32 %v5584_v44, %v4394_v43  ;;  %v4402_v52 = vld [vmem:[%s8137_s0 + $0x40] sm:$0xf] }
   0xe   :  { %942 = vmatpush.bf16.msra.mxu0 %v5709_v6  ;;  %5881 = vmatpush.bf16.msra.mxu3 %v5709_v6  ;;  %v5675_v47 = vld [vmem:[%s8137_s0 + $0x314] sm:$0xf]  ;;  %v4764_v48 = vld [vmem:[%s8137_s0 + $0x318] sm:$0xf0]  ;;  %v4399_v50 = vor.u32 %v5583_v45, %v4396_v46  ;;  %v5586_v53 = vld [vmem:[%s8137_s0 + $0x44] sm:$0xf0] }
   0xf   :  { %1271 = vmatpush.bf16.msra.mxu1 %v5717_v7  ;;  %5889 = vmatpush.bf16.msra.mxu2 %v5717_v7  ;;  %v4767_v51 = vor.u32 %v5675_v47, %v4764_v48  ;;  %v5585_v54 = vld [vmem:[%s8137_s0 + $0x44] sm:$0xf]  ;;  %v4404_v55 = vld [vmem:[%s8137_s0 + $0x48] sm:$0xf0]  ;;  %v4403_v58 = vor.u32 %v5586_v53, %v4402_v52  ;;  %v4410_v61 = vld [vmem:[%s8137_s0 + $0x50] sm:$0xf] }
  0x10   :  { %v5677_v56 = vld [vmem:[%s8137_s0 + $0x324] sm:$0xf]  ;;  %v4772_v57 = vld [vmem:[%s8137_s0 + $0x328] sm:$0xf0]  ;;  %v4407_v59 = vor.u32 %v5585_v54, %v4404_v55  ;;  %v5588_v62 = vld [vmem:[%s8137_s0 + $0x54] sm:$0xf0] }
  0x11   :  { %v4775_v60 = vor.u32 %v5677_v56, %v4772_v57  ;;  %v5587_v63 = vld [vmem:[%s8137_s0 + $0x54] sm:$0xf]  ;;  %v4412_v0 = vld [vmem:[%s8137_s0 + $0x58] sm:$0xf0]  ;;  %v4411_v3 = vor.u32 %v5588_v62, %v4410_v61  ;;  %v4418_v6 = vld [vmem:[%s8137_s0 + $0x60] sm:$0xf] }
  0x12   :  { %943 = vmatpush.bf16.msra.mxu0 %v5708_v8  ;;  %5882 = vmatpush.bf16.msra.mxu3 %v5708_v8  ;;  %v5679_v1 = vld [vmem:[%s8137_s0 + $0x334] sm:$0xf]  ;;  %v4780_v2 = vld [vmem:[%s8137_s0 + $0x338] sm:$0xf0]  ;;  %v4415_v4 = vor.u32 %v5587_v63, %v4412_v0  ;;  %v5590_v7 = vld [vmem:[%s8137_s0 + $0x64] sm:$0xf0] }
  0x13   :  { %1272 = vmatpush.bf16.msra.mxu1 %v5716_v9  ;;  %5890 = vmatpush.bf16.msra.mxu2 %v5716_v9  ;;  %v4783_v5 = vor.u32 %v5679_v1, %v4780_v2  ;;  %v5589_v8 = vld [vmem:[%s8137_s0 + $0x64] sm:$0xf]  ;;  %v4420_v9 = vld [vmem:[%s8137_s0 + $0x68] sm:$0xf0]  ;;  %v5592_v16 = vld [vmem:[%s8137_s0 + $0x74] sm:$0xf0] }
  0x14   :  { %v5591_v17 = vld [vmem:[%s8137_s0 + $0x74] sm:$0xf]  ;;  %v4428_v18 = vld [vmem:[%s8137_s0 + $0x78] sm:$0xf0]  ;;  %v5670_v25 = vld [vmem:[%s8137_s0 + $0x2e4] sm:$0xf0] }
  0x15   :  { %v5683_v19 = vld [vmem:[%s8137_s0 + $0x354] sm:$0xf]  ;;  %v4796_v20 = vld [vmem:[%s8137_s0 + $0x358] sm:$0xf0]  ;;  %v4434_v27 = vld [vmem:[%s8137_s0 + $0x80] sm:$0xf] }
  0x16   :  { %944 = vmatpush.bf16.msra.mxu0 %v5707_v10  ;;  %5883 = vmatpush.bf16.msra.mxu3 %v5707_v10  ;;  %v5681_v10 = vld [vmem:[%s8137_s0 + $0x344] sm:$0xf]  ;;  %v5594_v28 = vld [vmem:[%s8137_s0 + $0x84] sm:$0xf0]  ;;  %v4436_v30 = vld [vmem:[%s8137_s0 + $0x88] sm:$0xf0] }
  0x17   :  { %1273 = vmatpush.bf16.msra.mxu1 %v5715_v11  ;;  %5891 = vmatpush.bf16.msra.mxu2 %v5715_v11  ;;  %v4788_v11 = vld [vmem:[%s8137_s0 + $0x348] sm:$0xf0]  ;;  %v5593_v29 = vld [vmem:[%s8137_s0 + $0x84] sm:$0xf]  ;;  %v4435_v34 = vor.u32 %v5594_v28, %v4434_v27  ;;  %v5595_v52 = vld [vmem:[%s8137_s0 + $0x94] sm:$0xf] }
  0x18   :  { %v4439_v35 = vor.u32 %v5593_v29, %v4436_v30  ;;  %v4444_v53 = vld [vmem:[%s8137_s0 + $0x98] sm:$0xf0]  ;;  %v5687_v55 = vld [vmem:[%s8137_s0 + $0x374] sm:$0xf]  ;;  %v4754_v1 = vld [vmem:[%s8137_s0 + $0x300] sm:$0xf] }
  0x19   :  { %v4812_v56 = vld [vmem:[%s8137_s0 + $0x378] sm:$0xf0]  ;;  %v5674_v2 = vld [vmem:[%s8137_s0 + $0x304] sm:$0xf0] }
  0x1a   :  { %945 = vmatpush.bf16.msra.mxu0 %v5706_v12  ;;  %5884 = vmatpush.bf16.msra.mxu3 %v5706_v12  ;;  %v4419_v12 = vor.u32 %v5590_v7, %v4418_v6  ;;  %v4815_v62 = vor.u32 %v5687_v55, %v4812_v56 }
  0x1b   :  { %1274 = vmatpush.bf16.msra.mxu1 %v5714_v13  ;;  %5892 = vmatpush.bf16.msra.mxu2 %v5714_v13  ;;  %v4423_v13 = vor.u32 %v5589_v8, %v4420_v9 }
  0x1e   :  { %946 = vmatpush.bf16.msra.mxu0 %v5705_v14  ;;  %5885 = vmatpush.bf16.msra.mxu3 %v5705_v14  ;;  %v4791_v14 = vor.u32 %v5681_v10, %v4788_v11  ;;  %v4450_v10 = vld [vmem:[%s8137_s0 + $0xa0] sm:$0xf]  ;;  %v5598_v11 = vld [vmem:[%s8137_s0 + $0xa4] sm:$0xf0] }
  0x1f   :  { %1275 = vmatpush.bf16.msra.mxu1 %v5713_v15  ;;  %5893 = vmatpush.bf16.msra.mxu2 %v5713_v15  ;;  %v4426_v15 = vld [vmem:[%s8137_s0 + $0x70] sm:$0xf] }
  0x20   :  { %v4427_v21 = vor.u32 %v5592_v16, %v4426_v15  ;;  %v5689_v15 = vld [vmem:[%s8137_s0 + $0x384] sm:$0xf]  ;;  %v4820_v16 = vld [vmem:[%s8137_s0 + $0x388] sm:$0xf0] }
  0x21   :  { %947 = vmatmul.bf16.vlgmr.msra.gmra.mxu0 %v4371_v22  ;;  %v4431_v22 = vor.u32 %v5591_v17, %v4428_v18  ;;  %v4451_v18 = vor.u32 %v5598_v11, %v4450_v10 }
  0x22   :  { %1276 = vmatmul.bf16.vlgmr.msra.gmra.mxu1 %v4375_v23  ;;  %1506 = vmatmul.bf16.vlgmr.msra.gmra.mxu2 %v4743_v24  ;;  %v4799_v23 = vor.u32 %v5683_v19, %v4796_v20  ;;  %v4738_v24 = vld [vmem:[%s8137_s0 + $0x2e0] sm:$0xf] }
  0x23   :  { %v4739_v26 = vor.u32 %v5670_v25, %v4738_v24  ;;  %v4762_v25 = vld [vmem:[%s8137_s0 + $0x310] sm:$0xf] }
  0x25   :  { %1177 = vmatmul.bf16.vlgmr.msra.gmra.mxu3 %v4739_v26  ;;  %v5676_v26 = vld [vmem:[%s8137_s0 + $0x314] sm:$0xf0] }
  0x26   :  { %v4763_v27 = vor.u32 %v5676_v26, %v4762_v25  ;;  %v5603_v25 = vld [vmem:[%s8137_s0 + $0xd4] sm:$0xf]  ;;  %v4476_v26 = vld [vmem:[%s8137_s0 + $0xd8] sm:$0xf0] }
  0x31   :  { %952 = vmatmul.bf16.gmra.mxu0 %v4379_v31  ;;  %v6182_v31 = vld [vmem:[%s8136_s2] ss:$0 sm:$0xff] }
  0x32   :  { %1281 = vmatmul.bf16.gmra.mxu1 %v4383_v32  ;;  %1511 = vmatmul.bf16.gmra.mxu2 %v4751_v33  ;;  %v5685_v32 = vld [vmem:[%s8137_s0 + $0x364] sm:$0xf]  ;;  %v4804_v33 = vld [vmem:[%s8137_s0 + $0x368] sm:$0xf0] }
  0x33   :  { %v4807_v38 = vor.u32 %v5685_v32, %v4804_v33 }
  0x41   :  { %957 = vmatmul.bf16.gmra.mxu0 %v4387_v40 }
  0x42   :  { %1286 = vmatmul.bf16.gmra.mxu1 %v4391_v41  ;;  %1516 = vmatmul.bf16.gmra.mxu2 %v4759_v42  ;;  %v4746_v41 = vld [vmem:[%s8137_s0 + $0x2f0] sm:$0xf]  ;;  %v5672_v42 = vld [vmem:[%s8137_s0 + $0x2f4] sm:$0xf0] }
  0x43   :  { %v4747_v43 = vor.u32 %v5672_v42, %v4746_v41  ;;  %v5691_v41 = vld [vmem:[%s8137_s0 + $0x394] sm:$0xf]  ;;  %v4828_v42 = vld [vmem:[%s8137_s0 + $0x398] sm:$0xf0] }
  0x45   :  { %1182 = vmatmul.bf16.gmra.mxu3 %v4747_v43 }
  0x51   :  { %962 = vmatmul.bf16.gmra.mxu0 %v4395_v49 }
  0x52   :  { %1291 = vmatmul.bf16.gmra.mxu1 %v4399_v50  ;;  %1521 = vmatmul.bf16.gmra.mxu2 %v4767_v51  ;;  %v4442_v50 = vld [vmem:[%s8137_s0 + $0x90] sm:$0xf]  ;;  %v5596_v51 = vld [vmem:[%s8137_s0 + $0x94] sm:$0xf0] }
  0x61   :  { %967 = vmatmul.bf16.gmra.mxu0 %v4403_v58  ;;  %v4443_v58 = vor.u32 %v5596_v51, %v4442_v50 }
  0x62   :  { %1296 = vmatmul.bf16.gmra.mxu1 %v4407_v59  ;;  %1526 = vmatmul.bf16.gmra.mxu2 %v4775_v60  ;;  %v4447_v59 = vor.u32 %v5595_v52, %v4444_v53  ;;  %v4770_v52 = vld [vmem:[%s8137_s0 + $0x320] sm:$0xf]  ;;  %v5678_v53 = vld [vmem:[%s8137_s0 + $0x324] sm:$0xf0] }
  0x71   :  { %972 = vmatmul.bf16.gmra.mxu0 %v4411_v3  ;;  %v4755_v3 = vor.u32 %v5674_v2, %v4754_v1  ;;  %v4468_v1 = vld [vmem:[%s8137_s0 + $0xc8] sm:$0xf0] }
  0x72   :  { %1301 = vmatmul.bf16.gmra.mxu1 %v4415_v4  ;;  %1531 = vmatmul.bf16.gmra.mxu2 %v4783_v5 }
  0x73   :  { %1187 = vmatmul.bf16.gmra.mxu3 %v4755_v3  ;;  %v5693_v3 = vld [vmem:[%s8137_s0 + $0x3a4] sm:$0xf] }
  0x81   :  { %977 = vmatmul.bf16.gmra.mxu0 %v4419_v12  ;;  %v5597_v12 = vld [vmem:[%s8137_s0 + $0xa4] sm:$0xf] }
  0x82   :  { %1306 = vmatmul.bf16.gmra.mxu1 %v4423_v13  ;;  %1536 = vmatmul.bf16.gmra.mxu2 %v4791_v14  ;;  %v4452_v13 = vld [vmem:[%s8137_s0 + $0xa8] sm:$0xf0] }
  0x83   :  { %v4455_v19 = vor.u32 %v5597_v12, %v4452_v13  ;;  %1192 = vmatmul.bf16.gmra.mxu3 %v4763_v27 }
  0x91   :  { %982 = vmatmul.bf16.gmra.mxu0 %v4427_v21 }
  0x92   :  { %1311 = vmatmul.bf16.gmra.mxu1 %v4431_v22  ;;  %1541 = vmatmul.bf16.gmra.mxu2 %v4799_v23  ;;  %v4823_v22 = vor.u32 %v5689_v15, %v4820_v16  ;;  %v5680_v15 = vld [vmem:[%s8137_s0 + $0x334] sm:$0xf0] }
  0x9e   :  { %v948_v36 = vpop.f32.mrf.mxu0 }
  0x9f   :  { %v1277_v37 = vpop.f32.mrf.mxu1  ;;  %v949_v39 = vadd.f32 %v6182_v31, %v948_v36  ;;  %v4458_v36 = vld [vmem:[%s8137_s0 + $0xb0] sm:$0xf] }
  0xa1   :  { %v1278_v40 = vadd.f32 %v1277_v37, %v949_v39  ;;  %987 = vmatmul.bf16.gmra.mxu0 %v4435_v34  ;;  %v5600_v37 = vld [vmem:[%s8137_s0 + $0xb4] sm:$0xf0]  ;;  %v4460_v39 = vld [vmem:[%s8137_s0 + $0xb8] sm:$0xf0] }
  0xa2   :  { %1316 = vmatmul.bf16.gmra.mxu1 %v4439_v35  ;;  %1546 = vmatmul.bf16.gmra.mxu2 %v4807_v38  ;;  %v5599_v38 = vld [vmem:[%s8137_s0 + $0xb4] sm:$0xf] }
  0xa3   :  { %v1597_v44 = vmax.f32 %v1278_v40, 0.0 }
  0xa5   :  { %v1725_v45 = vpack.c.bf16 %v1597_v44, %v1597_v44  ;;  %v6253_v28 = vpop.f32.mrf.mxu2 }
  0xa6   :  { %v950_v46 = vpop.f32.mrf.mxu0 }
  0xa7   :  { %v1279_v47 = vpop.f32.mrf.mxu1  ;;  %1854 = vst.msk [vmem:[#allocation2] sm:$0xf] %vm1853_vm0, %v1725_v45  ;;  %v951_v48 = vadd.f32 %v6182_v31, %v950_v46  ;;  %v4459_v45 = vor.u32 %v5600_v37, %v4458_v36  ;;  %v4463_v46 = vor.u32 %v5599_v38, %v4460_v39 }
  0xa9   :  { %v1280_v49 = vadd.f32 %v1279_v47, %v951_v48 }
  0xab   :  { %v1598_v54 = vmax.f32 %v1280_v49, 0.0  ;;  %v4831_v49 = vor.u32 %v5691_v41, %v4828_v42  ;;  %v4786_v41 = vld [vmem:[%s8137_s0 + $0x340] sm:$0xf]  ;;  %v5682_v42 = vld [vmem:[%s8137_s0 + $0x344] sm:$0xf0] }
  0xad   :  { %v1726_v57 = vpack.c.bf16 %v1598_v54, %v1598_v54  ;;  %v6276_v43 = vpop.f32.mrf.mxu2  ;;  %v4771_v54 = vor.u32 %v5678_v53, %v4770_v52  ;;  %v4482_v52 = vld [vmem:[%s8137_s0 + $0xe0] sm:$0xf]  ;;  %v5606_v53 = vld [vmem:[%s8137_s0 + $0xe4] sm:$0xf0] }
  0xae   :  { %v953_v60 = vpop.f32.mrf.mxu0 }
  0xaf   :  { %v1282_v61 = vpop.f32.mrf.mxu1  ;;  %1855 = vst.msk [vmem:[#allocation2 + $0x10] sm:$0xf] %vm1853_vm0, %v1726_v57  ;;  %v954_v63 = vadd.f32 %v6182_v31, %v953_v60  ;;  %1197 = vmatmul.bf16.gmra.mxu3 %v4771_v54  ;;  %v5605_v54 = vld [vmem:[%s8137_s0 + $0xe4] sm:$0xf] }
  0xb1   :  { %v1283_v0 = vadd.f32 %v1282_v61, %v954_v63  ;;  %992 = vmatmul.bf16.gmra.mxu0 %v4443_v58  ;;  %v5602_v63 = vld [vmem:[%s8137_s0 + $0xc4] sm:$0xf0] }
  0xb2   :  { %1321 = vmatmul.bf16.gmra.mxu1 %v4447_v59  ;;  %1551 = vmatmul.bf16.gmra.mxu2 %v4815_v62  ;;  %v4466_v62 = vld [vmem:[%s8137_s0 + $0xc0] sm:$0xf] }
  0xb3   :  { %v1599_v4 = vmax.f32 %v1283_v0, 0.0  ;;  %v5601_v0 = vld [vmem:[%s8137_s0 + $0xc4] sm:$0xf] }
  0xb5   :  { %v1727_v5 = vpack.c.bf16 %v1599_v4, %v1599_v4  ;;  %v6287_v59 = vpop.f32.mrf.mxu2  ;;  %v4836_v4 = vld [vmem:[%s8137_s0 + $0x3a8] sm:$0xf0] }
  0xb6   :  { %v955_v6 = vpop.f32.mrf.mxu0  ;;  %v4839_v10 = vor.u32 %v5693_v3, %v4836_v4 }
  0xb7   :  { %v1284_v7 = vpop.f32.mrf.mxu1  ;;  %v956_v8 = vadd.f32 %v6182_v31, %v955_v6  ;;  %1858 = vrot.lane.b32.xlu0 %v1727_v5, %s5906_s24  ;;  %v4467_v6 = vor.u32 %v5602_v63, %v4466_v62 }
  0xb9   :  { %v1285_v9 = vadd.f32 %v1284_v7, %v956_v8  ;;  %v4471_v7 = vor.u32 %v5601_v0, %v4468_v1 }
  0xbb   :  { %v1600_v14 = vmax.f32 %v1285_v9, 0.0 }
  0xbd   :  { %v1728_v17 = vpack.c.bf16 %v1600_v14, %v1600_v14  ;;  %v6313_v12 = vpop.f32.mrf.mxu2  ;;  %v4778_v14 = vld [vmem:[%s8137_s0 + $0x330] sm:$0xf] }
  0xbe   :  { %v958_v20 = vpop.f32.mrf.mxu0  ;;  %v4779_v16 = vor.u32 %v5680_v15, %v4778_v14 }
  0xbf   :  { %v1287_v21 = vpop.f32.mrf.mxu1  ;;  %v959_v23 = vadd.f32 %v6182_v31, %v958_v20  ;;  %1860 = vrot.lane.b32.xlu0 %v1728_v17, %s5906_s24 }
  0xc0   :  { %1202 = vmatmul.bf16.gmra.mxu3 %v4779_v16  ;;  %v4490_v16 = vld [vmem:[%s8137_s0 + $0xf0] sm:$0xf] }
  0xc1   :  { %v1288_v24 = vadd.f32 %v1287_v21, %v959_v23  ;;  %997 = vmatmul.bf16.gmra.mxu0 %v4451_v18  ;;  %v4474_v23 = vld [vmem:[%s8137_s0 + $0xd0] sm:$0xf] }
  0xc2   :  { %1326 = vmatmul.bf16.gmra.mxu1 %v4455_v19  ;;  %1556 = vmatmul.bf16.gmra.mxu2 %v4823_v22 }
  0xc3   :  { %v1601_v29 = vmax.f32 %v1288_v24, 0.0  ;;  %v5604_v24 = vld [vmem:[%s8137_s0 + $0xd4] sm:$0xf0] }
  0xc5   :  { %v1729_v30 = vpack.c.bf16 %v1601_v29, %v1601_v29  ;;  %v6336_v27 = vpop.f32.mrf.mxu2 }
  0xc6   :  { %v960_v32 = vpop.f32.mrf.mxu0 }
  0xc7   :  { %v1289_v33 = vpop.f32.mrf.mxu1  ;;  %v961_v34 = vadd.f32 %v6182_v31, %v960_v32  ;;  %1869 = vrot.lane.b32.xlu1 %v1729_v30, %s5907_s21  ;;  %1985 = vst.msk [vmem:[#allocation2 + $0x20] sm:$0xf] %vm1853_vm0, %v1729_v30  ;;  %v5695_v30 = vld [vmem:[%s8137_s0 + $0x3b4] sm:$0xf]  ;;  %v4844_v32 = vld [vmem:[%s8137_s0 + $0x3b8] sm:$0xf0] }
  0xc8   :  { %v4847_v38 = vor.u32 %v5695_v30, %v4844_v32 }
  0xc9   :  { %v1290_v35 = vadd.f32 %v1289_v33, %v961_v34  ;;  %v4475_v34 = vor.u32 %v5604_v24, %v4474_v23  ;;  %v5764_v23 = vld [vmem:[%s8138_s3 + $0x38] sm:$0xff] }
  0xca   :  { %3165 = vmatpush.bf16.msrb.mxu2 %v5764_v23 }
  0xcb   :  { %v1602_v40 = vmax.f32 %v1290_v35, 0.0  ;;  %v4479_v35 = vor.u32 %v5603_v25, %v4476_v26 }
  0xcd   :  { %v1730_v44 = vpack.c.bf16 %v1602_v40, %v1602_v40 }
  0xce   :  { %v963_v47 = vpop.f32.mrf.mxu0 }
  0xcf   :  { %v1292_v48 = vpop.f32.mrf.mxu1  ;;  %1986 = vst.msk [vmem:[#allocation2 + $0x30] sm:$0xf] %vm1853_vm0, %v1730_v44  ;;  %v964_v50 = vadd.f32 %v6182_v31, %v963_v47  ;;  %1871 = vrot.lane.b32.xlu1 %v1730_v44, %s5907_s21  ;;  %v4787_v44 = vor.u32 %v5682_v42, %v4786_v41  ;;  %v5762_v41 = vld [vmem:[%s8138_s3 + $0x28] sm:$0xff] }
  0xd1   :  { %v1293_v51 = vadd.f32 %v1292_v48, %v964_v50  ;;  %1002 = vmatmul.bf16.gmra.mxu0 %v4459_v45  ;;  %1207 = vmatmul.bf16.gmra.mxu3 %v4787_v44 }
  0xd2   :  { %1331 = vmatmul.bf16.gmra.mxu1 %v4463_v46  ;;  %1561 = vmatmul.bf16.gmra.mxu2 %v4831_v49  ;;  %v6353_v46 = vpop.f32.mrf.mxu2 }
  0xd3   :  { %v1603_v55 = vmax.f32 %v1293_v51, 0.0 }
  0xd5   :  { %v1731_v56 = vpack.c.bf16 %v1603_v55, %v1603_v55  ;;  %v4484_v55 = vld [vmem:[%s8137_s0 + $0xe8] sm:$0xf0] }
  0xd6   :  { %v965_v57 = vpop.f32.mrf.mxu0  ;;  %v4487_v62 = vor.u32 %v5605_v54, %v4484_v55  ;;  %v4500_v54 = vld [vmem:[%s8137_s0 + $0x108] sm:$0xf0] }
  0xd7   :  { %v1294_v58 = vpop.f32.mrf.mxu1  ;;  %v966_v60 = vadd.f32 %v6182_v31, %v965_v57  ;;  %1880 = vrot.lane.b32.xlu2 %v1731_v56, %s5908_s19  ;;  %1987 = vrot.lane.b32.xlu0 %v1731_v56, %s5906_s24  ;;  %v5697_v57 = vld [vmem:[%s8137_s0 + $0x3c4] sm:$0xf] }
  0xd9   :  { %v1295_v61 = vadd.f32 %v1294_v58, %v966_v60  ;;  %v4852_v58 = vld [vmem:[%s8137_s0 + $0x3c8] sm:$0xf0] }
  0xda   :  { %v4855_v1 = vor.u32 %v5697_v57, %v4852_v58  ;;  %v4868_v57 = vld [vmem:[%s8137_s0 + $0x3e8] sm:$0xf0]  ;;  %v5760_v58 = vld [vmem:[%s8138_s3 + $0x18] sm:$0xff] }
  0xdb   :  { %v1604_v2 = vmax.f32 %v1295_v61, 0.0  ;;  %v4483_v61 = vor.u32 %v5606_v53, %v4482_v52  ;;  %v5610_v52 = vld [vmem:[%s8137_s0 + $0x104] sm:$0xf0]  ;;  %v5609_v53 = vld [vmem:[%s8137_s0 + $0x104] sm:$0xf] }
  0xdd   :  { %v1732_v5 = vpack.c.bf16 %v1604_v2, %v1604_v2  ;;  %v6376_v2 = vpop.f32.mrf.mxu2 }
  0xde   :  { %v968_v8 = vpop.f32.mrf.mxu0 }
  0xdf   :  { %v1297_v9 = vpop.f32.mrf.mxu1  ;;  %v969_v11 = vadd.f32 %v6182_v31, %v968_v8  ;;  %1882 = vrot.lane.b32.xlu2 %v1732_v5, %s5908_s19  ;;  %1989 = vrot.lane.b32.xlu1 %v1732_v5, %s5906_s24  ;;  %v4794_v5 = vld [vmem:[%s8137_s0 + $0x350] sm:$0xf] }
  0xe1   :  { %v1298_v13 = vadd.f32 %v1297_v9, %v969_v11  ;;  %1007 = vmatmul.bf16.gmra.mxu0 %v4467_v6  ;;  %v5684_v6 = vld [vmem:[%s8137_s0 + $0x354] sm:$0xf0] }
  0xe2   :  { %1336 = vmatmul.bf16.gmra.mxu1 %v4471_v7  ;;  %1566 = vmatmul.bf16.gmra.mxu2 %v4839_v10  ;;  %v4795_v7 = vor.u32 %v5684_v6, %v4794_v5  ;;  %v5759_v6 = vld [vmem:[%s8138_s3 + $0x10] sm:$0xff] }
  0xe3   :  { %v1605_v17 = vmax.f32 %v1298_v13, 0.0 }
  0xe4   :  { %1212 = vmatmul.bf16.gmra.mxu3 %v4795_v7 }
  0xe5   :  { %v1733_v18 = vpack.c.bf16 %v1605_v17, %v1605_v17  ;;  %v6389_v14 = vpop.f32.mrf.mxu2  ;;  %v5608_v17 = vld [vmem:[%s8137_s0 + $0xf4] sm:$0xf0] }
  0xe6   :  { %v970_v19 = vpop.f32.mrf.mxu0  ;;  %v4491_v25 = vor.u32 %v5608_v17, %v4490_v16 }
  0xe7   :  { %v1299_v20 = vpop.f32.mrf.mxu1  ;;  %2105 = vst.msk [vmem:[#allocation2 + $0x40] sm:$0xf] %vm1853_vm0, %v1733_v18  ;;  %v971_v21 = vadd.f32 %v6182_v31, %v970_v19  ;;  %1997 = vrot.lane.b32.xlu2 %v1733_v18, %s5907_s21  ;;  %v5607_v18 = vld [vmem:[%s8137_s0 + $0xf4] sm:$0xf]  ;;  %v4492_v19 = vld [vmem:[%s8137_s0 + $0xf8] sm:$0xf0] }
  0xe8   :  { %v4495_v26 = vor.u32 %v5607_v18, %v4492_v19 }
  0xe9   :  { %v1300_v22 = vadd.f32 %v1299_v20, %v971_v21  ;;  %v5699_v21 = vld [vmem:[%s8137_s0 + $0x3d4] sm:$0xf] }
  0xeb   :  { %v1606_v29 = vmax.f32 %v1300_v22, 0.0  ;;  %v4860_v22 = vld [vmem:[%s8137_s0 + $0x3d8] sm:$0xf0] }
  0xec   :  { %v4863_v32 = vor.u32 %v5699_v21, %v4860_v22  ;;  %v5757_v21 = vld [vmem:[%s8138_s3] sm:$0xff] }
  0xed   :  { %v1734_v33 = vpack.c.bf16 %v1606_v29, %v1606_v29 }
  0xee   :  { %v973_v36 = vpop.f32.mrf.mxu0 }
  0xef   :  { %v1302_v37 = vpop.f32.mrf.mxu1  ;;  %2106 = vst.msk [vmem:[#allocation2 + $0x50] sm:$0xf] %vm1853_vm0, %v1734_v33  ;;  %v974_v39 = vadd.f32 %v6182_v31, %v973_v36  ;;  %1999 = vrot.lane.b32.xlu0 %v1734_v33, %s5907_s21  ;;  %v4802_v36 = vld [vmem:[%s8137_s0 + $0x360] sm:$0xf] }
  0xf1   :  { %v1303_v40 = vadd.f32 %v1302_v37, %v974_v39  ;;  %1012 = vmatmul.bf16.gmra.mxu0 %v4475_v34  ;;  %v5763_v34 = vld [vmem:[%s8138_s3 + $0x30] sm:$0xff]  ;;  %v5686_v37 = vld [vmem:[%s8137_s0 + $0x364] sm:$0xf0]  ;;  %v6423_v39 = vpop.f32.mrf.mxu2 }
  0xf2   :  { %1341 = vmatmul.bf16.gmra.mxu1 %v4479_v35  ;;  %1571 = vmatmul.bf16.gmra.mxu2 %v4847_v38  ;;  %v4803_v38 = vor.u32 %v5686_v37, %v4802_v36 }
  0xf3   :  { %v1607_v45 = vmax.f32 %v1303_v40, 0.0  ;;  %3166 = vmatpush.bf16.msrb.mxu2 %v5763_v34 }
  0xf4   :  { %1217 = vmatmul.bf16.gmra.mxu3 %v4803_v38 }
  0xf5   :  { %v1735_v47 = vpack.c.bf16 %v1607_v45, %v1607_v45 }
  0xf6   :  { %v975_v48 = vpop.f32.mrf.mxu0 }
  0xf7   :  { %v1304_v49 = vpop.f32.mrf.mxu1  ;;  %v976_v50 = vadd.f32 %v6182_v31, %v975_v48  ;;  %2007 = vrot.lane.b32.xlu1 %v1735_v47, %s5908_s19  ;;  %2107 = vrot.lane.b32.xlu0 %v1735_v47, %s5906_s24  ;;  %v6430_v48 = vpop.f32.mrf.mxu3 }
  0xf8   :  { %3167 = vmatpush.bf16.msrb.mxu2 %v5762_v41 }
  0xf9   :  { %v1305_v51 = vadd.f32 %v1304_v49, %v976_v50  ;;  %v5761_v49 = vld [vmem:[%s8138_s3 + $0x20] sm:$0xff] }
  0xfb   :  { %v1608_v56 = vmax.f32 %v1305_v51, 0.0  ;;  %v4498_v51 = vld [vmem:[%s8137_s0 + $0x100] sm:$0xf] }
  0xfc   :  { %3168 = vmatpush.bf16.msrb.mxu2 %v5761_v49  ;;  %v5690_v49 = vld [vmem:[%s8137_s0 + $0x384] sm:$0xf0] }
  0xfd   :  { %v1736_v60 = vpack.c.bf16 %v1608_v56, %v1608_v56  ;;  %v5701_v56 = vld [vmem:[%s8137_s0 + $0x3e4] sm:$0xf] }
  0xfe   :  { %v978_v63 = vpop.f32.mrf.mxu0 }
  0xff   :  { %v1307_v0 = vpop.f32.mrf.mxu1  ;;  %v979_v3 = vadd.f32 %v6182_v31, %v978_v63  ;;  %2009 = vrot.lane.b32.xlu2 %v1736_v60, %s5908_s19  ;;  %2109 = vrot.lane.b32.xlu1 %v1736_v60, %s5906_s24  ;;  %v6456_v60 = vpop.f32.mrf.mxu2  ;;  %v4503_v63 = vor.u32 %v5609_v53, %v4500_v54 }
 0x100   :  { %3169 = vmatpush.bf16.msrb.mxu2 %v5760_v58  ;;  %v6460_v5 = vpop.f32.mrf.mxu3 }
 0x101   :  { %v1308_v4 = vadd.f32 %v1307_v0, %v979_v3  ;;  %1017 = vmatmul.bf16.gmra.mxu0 %v4483_v61  ;;  %v4871_v3 = vor.u32 %v5701_v56, %v4868_v57 }
 0x102   :  { %1346 = vmatmul.bf16.gmra.mxu1 %v4487_v62  ;;  %1576 = vmatmul.bf16.gmra.mxu2 %v4855_v1  ;;  %v4499_v62 = vor.u32 %v5610_v52, %v4498_v51 }
 0x103   :  { %v1609_v8 = vmax.f32 %v1308_v4, 0.0 }
 0x104   :  { %3170 = vmatpush.bf16.msrb.mxu2 %v5759_v6 }
 0x105   :  { %v1737_v9 = vpack.c.bf16 %v1609_v8, %v1609_v8  ;;  %v4810_v8 = vld [vmem:[%s8137_s0 + $0x370] sm:$0xf] }
 0x106   :  { %v980_v10 = vpop.f32.mrf.mxu0 }
 0x107   :  { %v1309_v11 = vpop.f32.mrf.mxu1  ;;  %v981_v13 = vadd.f32 %v6182_v31, %v980_v10  ;;  %2117 = vrot.lane.b32.xlu2 %v1737_v9, %s5907_s21  ;;  %v5688_v9 = vld [vmem:[%s8137_s0 + $0x374] sm:$0xf0] }
 0x108   :  { %v4811_v10 = vor.u32 %v5688_v9, %v4810_v8  ;;  %v6476_v19 = vpop.f32.mrf.mxu3 }
 0x109   :  { %v1310_v15 = vadd.f32 %v1309_v11, %v981_v13  ;;  %v5758_v13 = vld [vmem:[%s8138_s3 + $0x8] sm:$0xff] }
 0x10a   :  { %1222 = vmatmul.bf16.gmra.mxu3 %v4811_v10  ;;  %3171 = vmatpush.bf16.msrb.mxu2 %v5758_v13 }
 0x10b   :  { %v1610_v20 = vmax.f32 %v1310_v15, 0.0 }
 0x10d   :  { %v1738_v24 = vpack.c.bf16 %v1610_v20, %v1610_v20  ;;  %v6478_v20 = vpop.f32.mrf.mxu2 }
 0x10e   :  { %v983_v29 = vpop.f32.mrf.mxu0  ;;  %3172 = vmatpush.bf16.msrb.mxu2 %v5757_v21 }
 0x10f   :  { %v1312_v30 = vpop.f32.mrf.mxu1  ;;  %v984_v33 = vadd.f32 %v6182_v31, %v983_v29  ;;  %2119 = vrot.lane.b32.xlu0 %v1738_v24, %s5907_s21  ;;  %v4506_v24 = vld [vmem:[%s8137_s0 + $0x110] sm:$0xf]  ;;  %v4508_v29 = vld [vmem:[%s8137_s0 + $0x118] sm:$0xf0] }
 0x111   :  { %v1313_v35 = vadd.f32 %v1312_v30, %v984_v33  ;;  %1022 = vmatmul.bf16.gmra.mxu0 %v4491_v25  ;;  %v5612_v25 = vld [vmem:[%s8137_s0 + $0x114] sm:$0xf0]  ;;  %v4876_v33 = vld [vmem:[%s8137_s0 + $0x3f8] sm:$0xf0] }
 0x112   :  { %1351 = vmatmul.bf16.gmra.mxu1 %v4495_v26  ;;  %1581 = vmatmul.bf16.gmra.mxu2 %v4863_v32  ;;  %v5611_v26 = vld [vmem:[%s8137_s0 + $0x114] sm:$0xf] }
 0x113   :  { %v1611_v40 = vmax.f32 %v1313_v35, 0.0  ;;  %v5703_v32 = vld [vmem:[%s8137_s0 + $0x3f4] sm:$0xf]  ;;  %v4507_v35 = vor.u32 %v5612_v25, %v4506_v24  ;;  %v4511_v36 = vor.u32 %v5611_v26, %v4508_v29  ;;  %v5692_v24 = vld [vmem:[%s8137_s0 + $0x394] sm:$0xf0] }
 0x115   :  { %v1739_v42 = vpack.c.bf16 %v1611_v40, %v1611_v40  ;;  %v4879_v40 = vor.u32 %v5703_v32, %v4876_v33 }
 0x116   :  { %v985_v44 = vpop.f32.mrf.mxu0 }
 0x117   :  { %v1314_v45 = vpop.f32.mrf.mxu1  ;;  %v986_v47 = vadd.f32 %v6182_v31, %v985_v44  ;;  %2127 = vrot.lane.b32.xlu1 %v1739_v42, %s5908_s19  ;;  %v6504_v42 = vpop.f32.mrf.mxu3 }
 0x119   :  { %v1315_v50 = vadd.f32 %v1314_v45, %v986_v47  ;;  %v4818_v47 = vld [vmem:[%s8137_s0 + $0x380] sm:$0xf] }
 0x11a   :  { %v4819_v51 = vor.u32 %v5690_v49, %v4818_v47 }
 0x11b   :  { %v1612_v55 = vmax.f32 %v1315_v50, 0.0  ;;  %v6512_v50 = vpop.f32.mrf.mxu2 }
 0x11c   :  { %1227 = vmatmul.bf16.gmra.mxu3 %v4819_v51 }
 0x11d   :  { %v1740_v61 = vpack.c.bf16 %v1612_v55, %v1612_v55 }
 0x11e   :  { %v988_v0 = vpop.f32.mrf.mxu0 }
 0x11f   :  { %v1317_v1 = vpop.f32.mrf.mxu1  ;;  %v989_v4 = vadd.f32 %v6182_v31, %v988_v0  ;;  %2129 = vrot.lane.b32.xlu2 %v1740_v61, %s5908_s19  ;;  %v1188_v58 = vpop.f32.mrf.mxu3  ;;  %v5614_v0 = vld [vmem:[%s8137_s0 + $0x124] sm:$0xf0] }
 0x120   :  { %v1189_v9 = vadd.f32 %v6182_v31, %v1188_v58 }
 0x121   :  { %v1318_v7 = vadd.f32 %v1317_v1, %v989_v4  ;;  %1027 = vmatmul.bf16.gmra.mxu0 %v4499_v62  ;;  %v5613_v1 = vld [vmem:[%s8137_s0 + $0x124] sm:$0xf] }
 0x122   :  { %1356 = vmatmul.bf16.gmra.mxu1 %v4503_v63  ;;  %1586 = vmatmul.bf16.gmra.mxu2 %v4871_v3  ;;  %v4514_v63 = vld [vmem:[%s8137_s0 + $0x120] sm:$0xf]  ;;  %v4516_v3 = vld [vmem:[%s8137_s0 + $0x128] sm:$0xf0] }
 0x123   :  { %v1613_v11 = vmax.f32 %v1318_v7, 0.0  ;;  %v4515_v7 = vor.u32 %v5614_v0, %v4514_v63  ;;  %v4519_v8 = vor.u32 %v5613_v1, %v4516_v3  ;;  %v6542_v26 = vpop.f32.mrf.mxu2 }
 0x125   :  { %v1741_v15 = vpack.c.bf16 %v1613_v11, %v1613_v11 }
 0x126   :  { %v990_v16 = vpop.f32.mrf.mxu0 }
 0x127   :  { %v1319_v17 = vpop.f32.mrf.mxu1  ;;  %1889 = vst.msk [vmem:[#allocation2 + $0x4] sm:$0xf] %vm1853_vm0, %v1741_v15  ;;  %v991_v18 = vadd.f32 %v6182_v31, %v990_v16  ;;  %v1518_v15 = vadd.f32 %v6336_v27, %v1189_v9  ;;  %v1190_v16 = vpop.f32.mrf.mxu3 }
 0x129   :  { %v1320_v22 = vadd.f32 %v1319_v17, %v991_v18  ;;  %v1859_v23 = vpop.permute.xlu0 %1858 }
 0x12a   :  { %1865 = vst.msk [vmem:[#allocation2] sm:$0xf] %vm1864_vm1, %v1859_v23  ;;  %v4826_v23 = vld [vmem:[%s8137_s0 + $0x390] sm:$0xf] }
 0x12b   :  { %v1614_v30 = vmax.f32 %v1320_v22, 0.0  ;;  %v1693_v22 = vmax.f32 %v1518_v15, 0.0  ;;  %v4827_v25 = vor.u32 %v5692_v24, %v4826_v23  ;;  %v4532_v23 = vld [vmem:[%s8137_s0 + $0x148] sm:$0xf0] }
 0x12d   :  { %v1742_v34 = vpack.c.bf16 %v1614_v30, %v1614_v30  ;;  %v1821_v29 = vpack.c.bf16 %v1693_v22, %v1693_v22  ;;  %1232 = vmatmul.bf16.gmra.mxu3 %v4827_v25  ;;  %v5617_v22 = vld [vmem:[%s8137_s0 + $0x144] sm:$0xf] }
 0x12e   :  { %v993_v37 = vpop.f32.mrf.mxu0 }
 0x12f   :  { %v1322_v38 = vpop.f32.mrf.mxu1  ;;  %1890 = vst.msk [vmem:[#allocation2 + $0x14] sm:$0xf] %vm1853_vm0, %v1742_v34  ;;  %v994_v41 = vadd.f32 %v6182_v31, %v993_v37  ;;  %v4522_v37 = vld [vmem:[%s8137_s0 + $0x130] sm:$0xf] }
 0x130   :  { %2473 = vst.msk [vmem:[#allocation2 + $0xc8] sm:$0xf] %vm1853_vm0, %v1821_v29  ;;  %v4535_v29 = vor.u32 %v5617_v22, %v4532_v23 }
 0x131   :  { %v1323_v44 = vadd.f32 %v1322_v38, %v994_v41  ;;  %1032 = vmatmul.bf16.gmra.mxu0 %v4507_v35  ;;  %v1861_v45 = vpop.permute.xlu0 %1860  ;;  %v1881_v54 = vpop.permute.xlu2 %1880  ;;  %v1191_v35 = vadd.f32 %v6182_v31, %v1190_v16  ;;  %v5616_v41 = vld [vmem:[%s8137_s0 + $0x134] sm:$0xf0] }
 0x132   :  { %1361 = vmatmul.bf16.gmra.mxu1 %v4511_v36  ;;  %1866 = vst.msk [vmem:[#allocation2 + $0x10] sm:$0xf] %vm1864_vm1, %v1861_v45  ;;  %1591 = vmatmul.bf16.gmra.mxu2 %v4879_v40  ;;  %v6550_v36 = vpop.f32.mrf.mxu3  ;;  %v4524_v45 = vld [vmem:[%s8137_s0 + $0x138] sm:$0xf0]  ;;  %v4523_v58 = vor.u32 %v5616_v41, %v4522_v37 }
 0x133   :  { %v1615_v52 = vmax.f32 %v1323_v44, 0.0  ;;  %v5615_v44 = vld [vmem:[%s8137_s0 + $0x134] sm:$0xf]  ;;  %v1520_v47 = vadd.f32 %v6353_v46, %v1191_v35 }
 0x135   :  { %v1743_v53 = vpack.c.bf16 %v1615_v52, %v1615_v52 }
 0x136   :  { %v995_v55 = vpop.f32.mrf.mxu0 }
 0x137   :  { %v1324_v56 = vpop.f32.mrf.mxu1  ;;  %v996_v57 = vadd.f32 %v6182_v31, %v995_v55  ;;  %1893 = vrot.lane.b32.xlu0 %v1743_v53, %s5906_s24  ;;  %v1694_v55 = vmax.f32 %v1520_v47, 0.0  ;;  %v5696_v47 = vld [vmem:[%s8137_s0 + $0x3b4] sm:$0xf0] }
 0x139   :  { %v1325_v61 = vadd.f32 %v1324_v56, %v996_v57  ;;  %v1870_v62 = vpop.permute.xlu1 %1869  ;;  %v1883_v17 = vpop.permute.xlu2 %1882 }
 0x13a   :  { %1876 = vst.msk [vmem:[#allocation2] sm:$0xf] %vm1875_vm2, %v1870_v62  ;;  %v6567_v56 = vpop.f32.mrf.mxu2  ;;  %v1822_v62 = vpack.c.bf16 %v1694_v55, %v1694_v55  ;;  %v6573_v1 = vpop.f32.mrf.mxu3 }
 0x13b   :  { %v1616_v4 = vmax.f32 %v1325_v61, 0.0  ;;  %1887 = vst.msk [vmem:[#allocation2] sm:$0xf] %vm1886_vm3, %v1881_v54  ;;  %v4527_v61 = vor.u32 %v5615_v44, %v4524_v45  ;;  %v4842_v45 = vld [vmem:[%s8137_s0 + $0x3b0] sm:$0xf] }
 0x13c   :  { %2474 = vst.msk [vmem:[#allocation2 + $0xd8] sm:$0xf] %vm1853_vm0, %v1822_v62 }
 0x13d   :  { %v1744_v6 = vpack.c.bf16 %v1616_v4, %v1616_v4 }
 0x13e   :  { %v998_v10 = vpop.f32.mrf.mxu0 }
 0x13f   :  { %v1327_v11 = vpop.f32.mrf.mxu1  ;;  %v999_v13 = vadd.f32 %v6182_v31, %v998_v10  ;;  %1895 = vrot.lane.b32.xlu1 %v1744_v6, %s5906_s24  ;;  %v4834_v6 = vld [vmem:[%s8137_s0 + $0x3a0] sm:$0xf] }
 0x141   :  { %v1328_v18 = vadd.f32 %v1327_v11, %v999_v13  ;;  %1037 = vmatmul.bf16.gmra.mxu0 %v4515_v7  ;;  %v1872_v21 = vpop.permute.xlu1 %1871  ;;  %v1998_v49 = vpop.permute.xlu2 %1997  ;;  %v5694_v7 = vld [vmem:[%s8137_s0 + $0x3a4] sm:$0xf0] }
 0x142   :  { %1366 = vmatmul.bf16.gmra.mxu1 %v4519_v8  ;;  %1877 = vst.msk [vmem:[#allocation2 + $0x10] sm:$0xf] %vm1875_vm2, %v1872_v21  ;;  %v4946_v51 = vld [vmem:[#allocation2] sm:$0xf]  ;;  %v4835_v9 = vor.u32 %v5694_v7, %v4834_v6  ;;  %v1198_v16 = vpop.f32.mrf.mxu3  ;;  %v5618_v21 = vld [vmem:[%s8137_s0 + $0x144] sm:$0xf0] }
 0x143   :  { %v1617_v27 = vmax.f32 %v1328_v18, 0.0  ;;  %1888 = vst.msk [vmem:[#allocation2 + $0x10] sm:$0xf] %vm1886_vm3, %v1883_v17  ;;  %v4530_v18 = vld [vmem:[%s8137_s0 + $0x140] sm:$0xf] }
 0x144   :  { %1237 = vmatmul.bf16.gmra.mxu3 %v4835_v9 }
 0x145   :  { %v1745_v30 = vpack.c.bf16 %v1617_v27, %v1617_v27  ;;  %v4531_v27 = vor.u32 %v5618_v21, %v4530_v18 }
 0x146   :  { %v1000_v32 = vpop.f32.mrf.mxu0 }
 0x147   :  { %v1329_v33 = vpop.f32.mrf.mxu1  ;;  %2015 = vst.msk [vmem:[#allocation2 + $0x24] sm:$0xf] %vm1853_vm0, %v1745_v30  ;;  %v1001_v34 = vadd.f32 %v6182_v31, %v1000_v32  ;;  %1903 = vrot.lane.b32.xlu2 %v1745_v30, %s5907_s21  ;;  %v1199_v30 = vadd.f32 %v6182_v31, %v1198_v16 }
 0x149   :  { %v1330_v38 = vadd.f32 %v1329_v33, %v1001_v34  ;;  %v1988_v40 = vpop.permute.xlu0 %1987  ;;  %v1528_v35 = vadd.f32 %v6423_v39, %v1199_v30 }
 0x14a   :  { %1993 = vst.msk [vmem:[#allocation2 + $0x20] sm:$0xf] %vm1864_vm1, %v1988_v40  ;;  %v5723_v52 = vld [vmem:[#allocation2 + $0xc] sm:$0xf0]  ;;  %v6602_v37 = vpop.f32.mrf.mxu3 }
 0x14b   :  { %v1618_v53 = vmax.f32 %v1330_v38, 0.0  ;;  %2003 = vst.msk [vmem:[#allocation2 + $0x20] sm:$0xf] %vm1875_vm2, %v1998_v49  ;;  %v4947_v54 = vor.u32 %v5723_v52, %v4946_v51  ;;  %v1697_v44 = vmax.f32 %v1528_v35, 0.0  ;;  %v4843_v51 = vor.u32 %v5696_v47, %v4842_v45  ;;  %v5621_v45 = vld [vmem:[%s8137_s0 + $0x164] sm:$0xf] }
 0x14c   :  { %v4548_v47 = vld [vmem:[%s8137_s0 + $0x168] sm:$0xf0] }
 0x14d   :  { %v1746_v57 = vpack.c.bf16 %v1618_v53, %v1618_v53  ;;  %3173 = vmatmul.bf16.vlgmr.msrb.gmra.mxu2 %v4947_v54  ;;  %v6612_v39 = vpack.c.bf16 %v1697_v44, %v1697_v44  ;;  %v5622_v44 = vld [vmem:[%s8137_s0 + $0x164] sm:$0xf0] }
 0x14e   :  { %v1003_v63 = vpop.f32.mrf.mxu0 }
 0x14f   :  { %v1332_v0 = vpop.f32.mrf.mxu1  ;;  %2016 = vst.msk [vmem:[#allocation2 + $0x34] sm:$0xf] %vm1853_vm0, %v1746_v57  ;;  %v1004_v46 = vadd.f32 %v6182_v31, %v1003_v63  ;;  %1905 = vrot.lane.b32.xlu0 %v1746_v57, %s5907_s21  ;;  %v4538_v63 = vld [vmem:[%s8137_s0 + $0x150] sm:$0xf] }
 0x150   :  { %2553 = vst.msk [vmem:[#allocation2 + $0xe8] sm:$0xf] %vm1853_vm0, %v6612_v39 }
 0x151   :  { %v1333_v3 = vadd.f32 %v1332_v0, %v1004_v46  ;;  %1042 = vmatmul.bf16.gmra.mxu0 %v4523_v58  ;;  %v1990_v4 = vpop.permute.xlu1 %1989  ;;  %v5620_v0 = vld [vmem:[%s8137_s0 + $0x154] sm:$0xf0]  ;;  %v6627_v46 = vpop.f32.mrf.mxu2 }
 0x152   :  { %1371 = vmatmul.bf16.gmra.mxu1 %v4527_v61  ;;  %1994 = vst.msk [vmem:[#allocation2 + $0x30] sm:$0xf] %vm1864_vm1, %v1990_v4  ;;  %v6619_v57 = vpop.f32.mrf.mxu3  ;;  %v4540_v4 = vld [vmem:[%s8137_s0 + $0x158] sm:$0xf0]  ;;  %v4539_v9 = vor.u32 %v5620_v0, %v4538_v63 }
 0x153   :  { %v1619_v8 = vmax.f32 %v1333_v3, 0.0  ;;  %v5619_v3 = vld [vmem:[%s8137_s0 + $0x154] sm:$0xf] }
 0x154   :  { %1242 = vmatmul.bf16.gmra.mxu3 %v4843_v51 }
 0x155   :  { %v1747_v10 = vpack.c.bf16 %v1619_v8, %v1619_v8 }
 0x156   :  { %v1005_v11 = vpop.f32.mrf.mxu0 }
 0x157   :  { %v1334_v13 = vpop.f32.mrf.mxu1  ;;  %v1006_v15 = vadd.f32 %v6182_v31, %v1005_v11  ;;  %1913 = vrot.lane.b32.xlu1 %v1747_v10, %s5908_s19  ;;  %2017 = vrot.lane.b32.xlu0 %v1747_v10, %s5906_s24  ;;  %v4543_v10 = vor.u32 %v5619_v3, %v4540_v4 }
 0x159   :  { %v1335_v17 = vadd.f32 %v1334_v13, %v1006_v15  ;;  %v2010_v38 = vpop.permute.xlu2 %2009 }
 0x15a   :  { %v6641_v16 = vpop.f32.mrf.mxu3 }
 0x15b   :  { %v1620_v24 = vmax.f32 %v1335_v17, 0.0 }
 0x15d   :  { %v1748_v25 = vpack.c.bf16 %v1620_v24, %v1620_v24  ;;  %v4850_v24 = vld [vmem:[%s8137_s0 + $0x3c0] sm:$0xf] }
 0x15e   :  { %v1008_v32 = vpop.f32.mrf.mxu0 }
 0x15f   :  { %v1337_v33 = vpop.f32.mrf.mxu1  ;;  %v1009_v34 = vadd.f32 %v6182_v31, %v1008_v32  ;;  %1915 = vrot.lane.b32.xlu2 %v1748_v25, %s5908_s19  ;;  %2019 = vrot.lane.b32.xlu1 %v1748_v25, %s5906_s24 }
 0x161   :  { %v1338_v40 = vadd.f32 %v1337_v33, %v1009_v34  ;;  %1047 = vmatmul.bf16.gmra.mxu0 %v4531_v27  ;;  %v2000_v41 = vpop.permute.xlu0 %1999  ;;  %v2118_v6 = vpop.permute.xlu2 %2117  ;;  %v6655_v34 = vld [vmem:[%s8136_s2] ss:$0 sm:$0xff] }
 0x162   :  { %1376 = vmatmul.bf16.gmra.mxu1 %v4535_v29  ;;  %2004 = vst.msk [vmem:[#allocation2 + $0x30] sm:$0xf] %vm1875_vm2, %v2000_v41  ;;  %v6650_v29 = vpop.f32.mrf.mxu2  ;;  %v4546_v41 = vld [vmem:[%s8137_s0 + $0x160] sm:$0xf] }
 0x163   :  { %v1621_v49 = vmax.f32 %v1338_v40, 0.0  ;;  %2014 = vst.msk [vmem:[#allocation2 + $0x30] sm:$0xf] %vm1886_vm3, %v2010_v38  ;;  %v1208_v38 = vpop.f32.mrf.mxu3 }
 0x165   :  { %v1749_v52 = vpack.c.bf16 %v1621_v49, %v1621_v49 }
 0x166   :  { %v1010_v53 = vpop.f32.mrf.mxu0 }
 0x167   :  { %v1339_v54 = vpop.f32.mrf.mxu1  ;;  %2135 = vst.msk [vmem:[#allocation2 + $0x44] sm:$0xf] %vm1853_vm0, %v1749_v52  ;;  %v1011_v55 = vadd.f32 %v6182_v31, %v1010_v53  ;;  %2027 = vrot.lane.b32.xlu2 %v1749_v52, %s5907_s21  ;;  %v4547_v52 = vor.u32 %v5622_v44, %v4546_v41  ;;  %v4551_v53 = vor.u32 %v5621_v45, %v4548_v47 }
 0x169   :  { %v1340_v58 = vadd.f32 %v1339_v54, %v1011_v55  ;;  %v2008_v61 = vpop.permute.xlu1 %2007  ;;  %v2108_v62 = vpop.permute.xlu0 %2107  ;;  %v1209_v54 = vadd.f32 %v6655_v34, %v1208_v38 }
 0x16a   :  { %2013 = vst.msk [vmem:[#allocation2 + $0x20] sm:$0xf] %vm1886_vm3, %v2008_v61  ;;  %v5727_v22 = vld [vmem:[#allocation2 + $0x2c] sm:$0xf0]  ;;  %v6679_v0 = vpop.f32.mrf.mxu2 }
 0x16b   :  { %v1622_v7 = vmax.f32 %v1340_v58, 0.0  ;;  %2113 = vst.msk [vmem:[#allocation2 + $0x40] sm:$0xf] %vm1864_vm1, %v2108_v62  ;;  %v1538_v62 = vadd.f32 %v6542_v26, %v1209_v54  ;;  %v6677_v63 = vpop.f32.mrf.mxu3  ;;  %v5700_v26 = vld [vmem:[%s8137_s0 + $0x3d4] sm:$0xf0] }
 0x16c   :  { %2123 = vst.msk [vmem:[#allocation2 + $0x40] sm:$0xf] %vm1875_vm2, %v2118_v6  ;;  %v5702_v54 = vld [vmem:[%s8137_s0 + $0x3e4] sm:$0xf0] }
 0x16d   :  { %v1750_v8 = vpack.c.bf16 %v1622_v7, %v1622_v7  ;;  %8148 = vst [vmem:[#allocation4_spill] sm:$0xff] %v6679_v0  ;;  %v1701_v6 = vmax.f32 %v1538_v62, 0.0 }
 0x16e   :  { %v1013_v11 = vpop.f32.mrf.mxu0 }
 0x16f   :  { %v1342_v13 = vpop.f32.mrf.mxu1  ;;  %2136 = vst.msk [vmem:[#allocation2 + $0x54] sm:$0xf] %vm1853_vm0, %v1750_v8  ;;  %v1014_v15 = vadd.f32 %v6182_v31, %v1013_v11  ;;  %2029 = vrot.lane.b32.xlu0 %v1750_v8, %s5907_s21  ;;  %v5698_v31 = vld [vmem:[%s8137_s0 + $0x3c4] sm:$0xf0]  ;;  %v4858_v8 = vld [vmem:[%s8137_s0 + $0x3d0] sm:$0xf] }
 0x170   :  { %v4851_v27 = vor.u32 %v5698_v31, %v4850_v24  ;;  %v4859_v11 = vor.u32 %v5700_v26, %v4858_v8  ;;  %v4554_v24 = vld [vmem:[%s8137_s0 + $0x170] sm:$0xf]  ;;  %v5624_v31 = vld [vmem:[%s8137_s0 + $0x174] sm:$0xf0] }
 0x171   :  { %v1343_v17 = vadd.f32 %v1342_v13, %v1014_v15  ;;  %1052 = vmatmul.bf16.gmra.mxu0 %v4539_v9  ;;  %v2110_v18 = vpop.permute.xlu1 %2109  ;;  %v4962_v21 = vld [vmem:[#allocation2 + $0x20] sm:$0xf]  ;;  %v5771_v26 = vld [vmem:[%s8138_s3 + $0x70] sm:$0xff] }
 0x172   :  { %1381 = vmatmul.bf16.gmra.mxu1 %v4543_v10  ;;  %2114 = vst.msk [vmem:[#allocation2 + $0x50] sm:$0xf] %vm1864_vm1, %v2110_v18  ;;  %v4963_v23 = vor.u32 %v5727_v22, %v4962_v21  ;;  %1247 = vmatmul.bf16.gmra.mxu3 %v4851_v27  ;;  %v6689_v10 = vpack.c.bf16 %v1701_v6, %v1701_v6  ;;  %v4556_v27 = vld [vmem:[%s8137_s0 + $0x178] sm:$0xf0] }
 0x173   :  { %v1623_v25 = vmax.f32 %v1343_v17, 0.0  ;;  %v6695_v21 = vpop.f32.mrf.mxu3 }
 0x174   :  { %3178 = vmatmul.bf16.gmra.mxu2 %v4963_v23  ;;  %2629 = vst.msk [vmem:[#allocation2 + $0x108] sm:$0xf] %vm1853_vm0, %v6689_v10 }
 0x175   :  { %v1751_v30 = vpack.c.bf16 %v1623_v25, %v1623_v25  ;;  %v5623_v25 = vld [vmem:[%s8137_s0 + $0x174] sm:$0xf] }
 0x176   :  { %v1015_v32 = vpop.f32.mrf.mxu0  ;;  %v4559_v38 = vor.u32 %v5623_v25, %v4556_v27 }
 0x177   :  { %v1344_v33 = vpop.f32.mrf.mxu1  ;;  %v1016_v35 = vadd.f32 %v6655_v34, %v1015_v32  ;;  %2037 = vrot.lane.b32.xlu1 %v1751_v30, %s5908_s19  ;;  %2137 = vrot.lane.b32.xlu0 %v1751_v30, %s5906_s24  ;;  %v6710_v30 = vpop.f32.mrf.mxu2 }
 0x178   :  { %8149 = vst [vmem:[#allocation5_spill] sm:$0xff] %v6710_v30 }
 0x179   :  { %v1345_v40 = vadd.f32 %v1344_v33, %v1016_v35  ;;  %v2130_v7 = vpop.permute.xlu2 %2129  ;;  %v4555_v35 = vor.u32 %v5624_v31, %v4554_v24 }
 0x17b   :  { %v1624_v49 = vmax.f32 %v1345_v40, 0.0  ;;  %v6714_v45 = vpop.f32.mrf.mxu3 }
 0x17d   :  { %v1752_v51 = vpack.c.bf16 %v1624_v49, %v1624_v49 }
 0x17e   :  { %v1018_v55 = vpop.f32.mrf.mxu0 }
 0x17f   :  { %v1347_v58 = vpop.f32.mrf.mxu1  ;;  %v1019_v61 = vadd.f32 %v6655_v34, %v1018_v55  ;;  %2039 = vrot.lane.b32.xlu2 %v1752_v51, %s5908_s19  ;;  %2139 = vrot.lane.b32.xlu1 %v1752_v51, %s5906_s24  ;;  %v6725_v62 = vpop.f32.mrf.mxu2 }
 0x180   :  { %8150 = vst [vmem:[#allocation6_spill] sm:$0xff] %v6725_v62 }
 0x181   :  { %v1348_v3 = vadd.f32 %v1347_v58, %v1019_v61  ;;  %1057 = vmatmul.bf16.gmra.mxu0 %v4547_v52  ;;  %v2120_v4 = vpop.permute.xlu0 %2119  ;;  %v5772_v61 = vld [vmem:[%s8138_s3 + $0x78] sm:$0xff] }
 0x182   :  { %1386 = vmatmul.bf16.gmra.mxu1 %v4551_v53  ;;  %2124 = vst.msk [vmem:[#allocation2 + $0x50] sm:$0xf] %vm1875_vm2, %v2120_v4  ;;  %1252 = vmatmul.bf16.gmra.mxu3 %v4859_v11  ;;  %v4866_v53 = vld [vmem:[%s8137_s0 + $0x3e0] sm:$0xf] }
 0x183   :  { %v1625_v9 = vmax.f32 %v1348_v3, 0.0  ;;  %2134 = vst.msk [vmem:[#allocation2 + $0x50] sm:$0xf] %vm1886_vm3, %v2130_v7  ;;  %v4867_v58 = vor.u32 %v5702_v54, %v4866_v53  ;;  %3219 = vmatpush.bf16.msrb.mxu3 %v5772_v61  ;;  %v6729_v8 = vpop.f32.mrf.mxu3  ;;  %v4562_v11 = vld [vmem:[%s8137_s0 + $0x180] sm:$0xf]  ;;  %v5767_v61 = vld [vmem:[%s8138_s3 + $0x50] sm:$0xff] }
 0x184   :  { %8151 = vst [vmem:[#allocation7_spill] sm:$0xff] %v6729_v8 }
 0x185   :  { %v1753_v13 = vpack.c.bf16 %v1625_v9, %v1625_v9 }
 0x186   :  { %v1020_v15 = vpop.f32.mrf.mxu0 }
 0x187   :  { %v1349_v17 = vpop.f32.mrf.mxu1  ;;  %v1021_v18 = vadd.f32 %v6655_v34, %v1020_v15  ;;  %2147 = vrot.lane.b32.xlu2 %v1753_v13, %s5907_s21  ;;  %v5626_v13 = vld [vmem:[%s8137_s0 + $0x184] sm:$0xf0]  ;;  %v5625_v15 = vld [vmem:[%s8137_s0 + $0x184] sm:$0xf]  ;;  %3220 = vmatpush.bf16.msrb.mxu3 %v5771_v26  ;;  %v5628_v26 = vld [vmem:[%s8137_s0 + $0x194] sm:$0xf0] }
 0x188   :  { %v4563_v24 = vor.u32 %v5626_v13, %v4562_v11  ;;  %v5627_v11 = vld [vmem:[%s8137_s0 + $0x194] sm:$0xf]  ;;  %v4572_v13 = vld [vmem:[%s8137_s0 + $0x198] sm:$0xf0] }
 0x189   :  { %v1350_v22 = vadd.f32 %v1349_v17, %v1021_v18  ;;  %v2128_v23 = vpop.permute.xlu1 %2127  ;;  %v4564_v17 = vld [vmem:[%s8137_s0 + $0x188] sm:$0xf0] }
 0x18a   :  { %2133 = vst.msk [vmem:[#allocation2 + $0x40] sm:$0xf] %vm1886_vm3, %v2128_v23  ;;  %v5731_v51 = vld [vmem:[#allocation2 + $0x4c] sm:$0xf0]  ;;  %v4567_v31 = vor.u32 %v5625_v15, %v4564_v17  ;;  %v5766_v17 = vld [vmem:[%s8138_s3 + $0x48] sm:$0xff] }
 0x18b   :  { %v1626_v32 = vmax.f32 %v1350_v22, 0.0  ;;  %v5770_v22 = vld [vmem:[%s8138_s3 + $0x68] sm:$0xff] }
 0x18c   :  { %3221 = vmatpush.bf16.msrb.mxu3 %v5770_v22 }
 0x18d   :  { %v1754_v33 = vpack.c.bf16 %v1626_v32, %v1626_v32  ;;  %v6749_v32 = vpop.f32.mrf.mxu2 }
 0x18e   :  { %v1023_v40 = vpop.f32.mrf.mxu0  ;;  %8152 = vst [vmem:[#allocation8_spill] sm:$0xff] %v6749_v32 }
 0x18f   :  { %v1352_v41 = vpop.f32.mrf.mxu1  ;;  %v1024_v44 = vadd.f32 %v6655_v34, %v1023_v40  ;;  %2149 = vrot.lane.b32.xlu0 %v1754_v33, %s5907_s21 }
 0x191   :  { %v1353_v47 = vadd.f32 %v1352_v41, %v1024_v44  ;;  %1062 = vmatmul.bf16.gmra.mxu0 %v4555_v35  ;;  %v4978_v49 = vld [vmem:[#allocation2 + $0x40] sm:$0xf]  ;;  %v6753_v35 = vpop.f32.mrf.mxu3  ;;  %v4874_v41 = vld [vmem:[%s8137_s0 + $0x3f0] sm:$0xf]  ;;  %v5704_v44 = vld [vmem:[%s8137_s0 + $0x3f4] sm:$0xf0] }
 0x192   :  { %1391 = vmatmul.bf16.gmra.mxu1 %v4559_v38  ;;  %v4979_v52 = vor.u32 %v5731_v51, %v4978_v49  ;;  %1257 = vmatmul.bf16.gmra.mxu3 %v4867_v58  ;;  %v5769_v38 = vld [vmem:[%s8138_s3 + $0x60] sm:$0xff]  ;;  %v4875_v49 = vor.u32 %v5704_v44, %v4874_v41  ;;  %v5768_v51 = vld [vmem:[%s8138_s3 + $0x58] sm:$0xff] }
 0x193   :  { %v1627_v55 = vmax.f32 %v1353_v47, 0.0  ;;  %3222 = vmatpush.bf16.msrb.mxu3 %v5769_v38 }
 0x194   :  { %3183 = vmatmul.bf16.gmra.mxu2 %v4979_v52 }
 0x195   :  { %v1755_v3 = vpack.c.bf16 %v1627_v55, %v1627_v55 }
 0x196   :  { %v1025_v4 = vpop.f32.mrf.mxu0 }
 0x197   :  { %v1354_v6 = vpop.f32.mrf.mxu1  ;;  %v1026_v7 = vadd.f32 %v6655_v34, %v1025_v4  ;;  %2157 = vrot.lane.b32.xlu1 %v1755_v3, %s5908_s19  ;;  %3223 = vmatpush.bf16.msrb.mxu3 %v5768_v51  ;;  %v1557_v3 = vpop.f32.mrf.mxu2 }
 0x199   :  { %v1355_v9 = vadd.f32 %v1354_v6, %v1026_v7  ;;  %v6770_v58 = vpop.f32.mrf.mxu3  ;;  %v4570_v7 = vld [vmem:[%s8137_s0 + $0x190] sm:$0xf] }
 0x19a   :  { %8153 = vst [vmem:[#allocation9_spill] sm:$0xff] %v6770_v58  ;;  %v4571_v22 = vor.u32 %v5628_v26, %v4570_v7 }
 0x19b   :  { %v1628_v18 = vmax.f32 %v1355_v9, 0.0  ;;  %3224 = vmatpush.bf16.msrb.mxu3 %v5767_v61  ;;  %v5630_v61 = vld [vmem:[%s8137_s0 + $0x1a4] sm:$0xf0] }
 0x19d   :  { %v1756_v23 = vpack.c.bf16 %v1628_v18, %v1628_v18 }
 0x19e   :  { %v1028_v25 = vpop.f32.mrf.mxu0 }
 0x19f   :  { %v1357_v27 = vpop.f32.mrf.mxu1  ;;  %v1029_v33 = vadd.f32 %v6655_v34, %v1028_v25  ;;  %2159 = vrot.lane.b32.xlu2 %v1756_v23, %s5908_s19  ;;  %v4575_v23 = vor.u32 %v5627_v11, %v4572_v13  ;;  %3225 = vmatpush.bf16.msrb.mxu3 %v5766_v17  ;;  %v1559_v41 = vpop.f32.mrf.mxu2 }
 0x1a1   :  { %v1358_v40 = vadd.f32 %v1357_v27, %v1029_v33  ;;  %1067 = vmatmul.bf16.gmra.mxu0 %v4563_v24  ;;  %v1904_v9 = vpop.permute.xlu2 %1903  ;;  %v6795_v27 = vpop.f32.mrf.mxu3 }
 0x1a2   :  { %1396 = vmatmul.bf16.gmra.mxu1 %v4567_v31  ;;  %1262 = vmatmul.bf16.gmra.mxu3 %v4875_v49  ;;  %8154 = vst [vmem:[#allocation10_spill] sm:$0xff] %v6795_v27 }
 0x1a3   :  { %v1629_v47 = vmax.f32 %v1358_v40, 0.0  ;;  %v5765_v40 = vld [vmem:[%s8138_s3 + $0x40] sm:$0xff] }
 0x1a4   :  { %3226 = vmatpush.bf16.msrb.mxu3 %v5765_v40 }
 0x1a5   :  { %v1757_v52 = vpack.c.bf16 %v1629_v47, %v1629_v47 }
 0x1a6   :  { %v1030_v53 = vpop.f32.mrf.mxu0 }
 0x1a7   :  { %v1359_v54 = vpop.f32.mrf.mxu1  ;;  %1921 = vst.msk [vmem:[#allocation2 + $0x8] sm:$0xf] %vm1853_vm0, %v1757_v52  ;;  %v1031_v55 = vadd.f32 %v6655_v34, %v1030_v53  ;;  %v6815_v26 = vpop.f32.mrf.mxu2 }
 0x1a8   :  { %2225 = vst.msk [vmem:[#allocation2 + $0x60] sm:$0xf] %vm1853_vm0, %v1757_v52 }
 0x1a9   :  { %v1360_v4 = vadd.f32 %v1359_v54, %v1031_v55  ;;  %v1894_v6 = vpop.permute.xlu0 %1893  ;;  %v1228_v53 = vpop.f32.mrf.mxu3  ;;  %v4578_v55 = vld [vmem:[%s8137_s0 + $0x1a0] sm:$0xf] }
 0x1aa   :  { %1899 = vst.msk [vmem:[#allocation2 + $0x4] sm:$0xf] %vm1864_vm1, %v1894_v6  ;;  %v4580_v6 = vld [vmem:[%s8137_s0 + $0x1a8] sm:$0xf0]  ;;  %v4579_v11 = vor.u32 %v5630_v61, %v4578_v55 }
 0x1ab   :  { %v1630_v15 = vmax.f32 %v1360_v4, 0.0  ;;  %1909 = vst.msk [vmem:[#allocation2 + $0x4] sm:$0xf] %vm1875_vm2, %v1904_v9  ;;  %v5629_v4 = vld [vmem:[%s8137_s0 + $0x1a4] sm:$0xf] }
 0x1ac   :  { %v4583_v13 = vor.u32 %v5629_v4, %v4580_v6  ;;  %v4586_v6 = vld [vmem:[%s8137_s0 + $0x1b0] sm:$0xf] }
 0x1ad   :  { %v1758_v18 = vpack.c.bf16 %v1630_v15, %v1630_v15  ;;  %v1229_v15 = vadd.f32 %v6655_v34, %v1228_v53 }
 0x1ae   :  { %v1033_v24 = vpop.f32.mrf.mxu0 }
 0x1af   :  { %v1362_v31 = vpop.f32.mrf.mxu1  ;;  %1922 = vst.msk [vmem:[#allocation2 + $0x18] sm:$0xf] %vm1853_vm0, %v1758_v18  ;;  %v1034_v25 = vadd.f32 %v6655_v34, %v1033_v24 }
 0x1b0   :  { %2226 = vst.msk [vmem:[#allocation2 + $0x70] sm:$0xf] %vm1853_vm0, %v1758_v18 }
 0x1b1   :  { %v1363_v33 = vadd.f32 %v1362_v31, %v1034_v25  ;;  %1072 = vmatmul.bf16.gmra.mxu0 %v4571_v22  ;;  %v1896_v38 = vpop.permute.xlu1 %1895  ;;  %v1230_v24 = vpop.f32.mrf.mxu3 }
 0x1b2   :  { %1401 = vmatmul.bf16.gmra.mxu1 %v4575_v23  ;;  %1900 = vst.msk [vmem:[#allocation2 + $0x14] sm:$0xf] %vm1864_vm1, %v1896_v38  ;;  %v1558_v23 = vadd.f32 %v1557_v3, %v1229_v15  ;;  %v1231_v53 = vadd.f32 %v6655_v34, %v1230_v24 }
 0x1b3   :  { %v1631_v44 = vmax.f32 %v1363_v33, 0.0 }
 0x1b4   :  { %v1709_v38 = vmax.f32 %v1558_v23, 0.0 }
 0x1b5   :  { %v1759_v47 = vpack.c.bf16 %v1631_v44, %v1631_v44 }
 0x1b6   :  { %v1035_v49 = vpop.f32.mrf.mxu0  ;;  %v1837_v44 = vpack.c.bf16 %v1709_v38, %v1709_v38 }
 0x1b7   :  { %v1364_v51 = vpop.f32.mrf.mxu1  ;;  %v1036_v52 = vadd.f32 %v6655_v34, %v1035_v49  ;;  %1925 = vrot.lane.b32.xlu0 %v1759_v47, %s5906_s24 }
 0x1b8   :  { %2505 = vst.msk [vmem:[#allocation2 + $0xcc] sm:$0xf] %vm1853_vm0, %v1837_v44 }
 0x1b9   :  { %v1365_v54 = vadd.f32 %v1364_v51, %v1036_v52  ;;  %v1916_v31 = vpop.permute.xlu2 %1915  ;;  %v6826_v52 = vpop.f32.mrf.mxu2 }
 0x1bb   :  { %v1632_v7 = vmax.f32 %v1365_v54, 0.0  ;;  %v6830_v54 = vpop.f32.mrf.mxu3 }
 0x1bd   :  { %v1760_v9 = vpack.c.bf16 %v1632_v7, %v1632_v7  ;;  %v5632_v7 = vld [vmem:[%s8137_s0 + $0x1b4] sm:$0xf0] }
 0x1be   :  { %v1038_v17 = vpop.f32.mrf.mxu0  ;;  %v4587_v23 = vor.u32 %v5632_v7, %v4586_v6 }
 0x1bf   :  { %v1367_v18 = vpop.f32.mrf.mxu1  ;;  %v1039_v22 = vadd.f32 %v6655_v34, %v1038_v17  ;;  %1927 = vrot.lane.b32.xlu1 %v1760_v9, %s5906_s24  ;;  %v5631_v9 = vld [vmem:[%s8137_s0 + $0x1b4] sm:$0xf] }
 0x1c1   :  { %v1368_v25 = vadd.f32 %v1367_v18, %v1039_v22  ;;  %1077 = vmatmul.bf16.gmra.mxu0 %v4579_v11  ;;  %v1906_v33 = vpop.permute.xlu0 %1905  ;;  %v4588_v11 = vld [vmem:[%s8137_s0 + $0x1b8] sm:$0xf0]  ;;  %v2028_v15 = vpop.permute.xlu2 %2027 }
 0x1c2   :  { %1406 = vmatmul.bf16.gmra.mxu1 %v4583_v13  ;;  %1910 = vst.msk [vmem:[#allocation2 + $0x14] sm:$0xf] %vm1875_vm2, %v1906_v33  ;;  %v1560_v13 = vadd.f32 %v1559_v41, %v1231_v53  ;;  %v4591_v24 = vor.u32 %v5631_v9, %v4588_v11  ;;  %v4594_v11 = vld [vmem:[%s8137_s0 + $0x1c0] sm:$0xf] }
 0x1c3   :  { %v1633_v40 = vmax.f32 %v1368_v25, 0.0  ;;  %1920 = vst.msk [vmem:[#allocation2 + $0x14] sm:$0xf] %vm1886_vm3, %v1916_v31  ;;  %v6851_v41 = vpop.f32.mrf.mxu3 }
 0x1c4   :  { %v1710_v18 = vmax.f32 %v1560_v13, 0.0  ;;  %v5634_v13 = vld [vmem:[%s8137_s0 + $0x1c4] sm:$0xf0] }
 0x1c5   :  { %v1761_v47 = vpack.c.bf16 %v1633_v40, %v1633_v40 }
 0x1c6   :  { %v1040_v49 = vpop.f32.mrf.mxu0  ;;  %v1838_v33 = vpack.c.bf16 %v1710_v18, %v1710_v18 }
 0x1c7   :  { %v1369_v51 = vpop.f32.mrf.mxu1  ;;  %2045 = vst.msk [vmem:[#allocation2 + $0x28] sm:$0xf] %vm1853_vm0, %v1761_v47  ;;  %v1041_v3 = vadd.f32 %v6655_v34, %v1040_v49  ;;  %1935 = vrot.lane.b32.xlu2 %v1761_v47, %s5907_s21 }
 0x1c8   :  { %2305 = vst.msk [vmem:[#allocation2 + $0x80] sm:$0xf] %vm1853_vm0, %v1761_v47 }
 0x1c9   :  { %v1370_v55 = vadd.f32 %v1369_v51, %v1041_v3  ;;  %v1914_v61 = vpop.permute.xlu1 %1913  ;;  %v2018_v4 = vpop.permute.xlu0 %2017  ;;  %2506 = vst.msk [vmem:[#allocation2 + $0xdc] sm:$0xf] %vm1853_vm0, %v1838_v33 }
 0x1ca   :  { %1919 = vst.msk [vmem:[#allocation2 + $0x4] sm:$0xf] %vm1886_vm3, %v1914_v61  ;;  %v4948_v49 = vld [vmem:[#allocation2 + $0x10] sm:$0xf0]  ;;  %v1567_v3 = vpop.f32.mrf.mxu2 }
 0x1cb   :  { %v1634_v17 = vmax.f32 %v1370_v55, 0.0  ;;  %2023 = vst.msk [vmem:[#allocation2 + $0x24] sm:$0xf] %vm1864_vm1, %v2018_v4  ;;  %v1238_v7 = vpop.f32.mrf.mxu3 }
 0x1cc   :  { %2033 = vst.msk [vmem:[#allocation2 + $0x24] sm:$0xf] %vm1875_vm2, %v2028_v15  ;;  %v5633_v15 = vld [vmem:[%s8137_s0 + $0x1c4] sm:$0xf] }
 0x1cd   :  { %v1762_v22 = vpack.c.bf16 %v1634_v17, %v1634_v17  ;;  %v4596_v17 = vld [vmem:[%s8137_s0 + $0x1c8] sm:$0xf0] }
 0x1ce   :  { %v1043_v31 = vpop.f32.mrf.mxu0 }
 0x1cf   :  { %v1372_v25 = vpop.f32.mrf.mxu1  ;;  %2046 = vst.msk [vmem:[#allocation2 + $0x38] sm:$0xf] %vm1853_vm0, %v1762_v22  ;;  %v1044_v38 = vadd.f32 %v6655_v34, %v1043_v31  ;;  %1937 = vrot.lane.b32.xlu0 %v1762_v22, %s5907_s21  ;;  %v4599_v31 = vor.u32 %v5633_v15, %v4596_v17 }
 0x1d0   :  { %2306 = vst.msk [vmem:[#allocation2 + $0x90] sm:$0xf] %vm1853_vm0, %v1762_v22 }
 0x1d1   :  { %v1373_v40 = vadd.f32 %v1372_v25, %v1044_v38  ;;  %1082 = vmatmul.bf16.gmra.mxu0 %v4587_v23  ;;  %v2020_v44 = vpop.permute.xlu1 %2019  ;;  %v5721_v47 = vld [vmem:[#allocation2 + $0x4] sm:$0xf]  ;;  %v1239_v25 = vadd.f32 %v6655_v34, %v1238_v7 }
 0x1d2   :  { %1411 = vmatmul.bf16.gmra.mxu1 %v4591_v24  ;;  %2024 = vst.msk [vmem:[#allocation2 + $0x34] sm:$0xf] %vm1864_vm1, %v2020_v44  ;;  %v4951_v51 = vor.u32 %v5721_v47, %v4948_v49  ;;  %v6870_v22 = vpop.f32.mrf.mxu2  ;;  %v4595_v24 = vor.u32 %v5634_v13, %v4594_v11 }
 0x1d3   :  { %v1635_v53 = vmax.f32 %v1373_v40, 0.0  ;;  %v1568_v44 = vadd.f32 %v1567_v3, %v1239_v25  ;;  %v6876_v47 = vpop.f32.mrf.mxu3  ;;  %v4604_v25 = vld [vmem:[%s8137_s0 + $0x1d8] sm:$0xf0] }
 0x1d4   :  { %3227 = vmatmul.bf16.vlgmr.msrb.gmra.mxu3 %v4951_v51 }
 0x1d5   :  { %v1763_v55 = vpack.c.bf16 %v1635_v53, %v1635_v53 }
 0x1d6   :  { %v1045_v61 = vpop.f32.mrf.mxu0 }
 0x1d7   :  { %v1374_v4 = vpop.f32.mrf.mxu1  ;;  %v1046_v6 = vadd.f32 %v6655_v34, %v1045_v61  ;;  %1945 = vrot.lane.b32.xlu1 %v1763_v55, %s5908_s19  ;;  %2047 = vrot.lane.b32.xlu0 %v1763_v55, %s5906_s24  ;;  %v1713_v55 = vmax.f32 %v1568_v44, 0.0 }
 0x1d9   :  { %v1375_v9 = vadd.f32 %v1374_v4, %v1046_v6  ;;  %v2040_v49 = vpop.permute.xlu2 %2039  ;;  %v6880_v4 = vpack.c.bf16 %v1713_v55, %v1713_v55 }
 0x1da   :  { %v6887_v11 = vpop.f32.mrf.mxu2 }
 0x1db   :  { %v1636_v18 = vmax.f32 %v1375_v9, 0.0  ;;  %2583 = vst.msk [vmem:[#allocation2 + $0xec] sm:$0xf] %vm1853_vm0, %v6880_v4  ;;  %v6890_v13 = vpop.f32.mrf.mxu3 }
 0x1dd   :  { %v1764_v23 = vpack.c.bf16 %v1636_v18, %v1636_v18 }
 0x1de   :  { %v1048_v33 = vpop.f32.mrf.mxu0 }
 0x1df   :  { %v1377_v38 = vpop.f32.mrf.mxu1  ;;  %v1049_v40 = vadd.f32 %v6655_v34, %v1048_v33  ;;  %1947 = vrot.lane.b32.xlu2 %v1764_v23, %s5908_s19  ;;  %2049 = vrot.lane.b32.xlu1 %v1764_v23, %s5906_s24  ;;  %v4602_v23 = vld [vmem:[%s8137_s0 + $0x1d0] sm:$0xf] }
 0x1e1   :  { %v1378_v51 = vadd.f32 %v1377_v38, %v1049_v40  ;;  %1087 = vmatmul.bf16.gmra.mxu0 %v4595_v24  ;;  %v2030_v53 = vpop.permute.xlu0 %2029  ;;  %v5636_v24 = vld [vmem:[%s8137_s0 + $0x1d4] sm:$0xf0]  ;;  %v2148_v33 = vpop.permute.xlu2 %2147 }
 0x1e2   :  { %1416 = vmatmul.bf16.gmra.mxu1 %v4599_v31  ;;  %2034 = vst.msk [vmem:[#allocation2 + $0x34] sm:$0xf] %vm1875_vm2, %v2030_v53  ;;  %v5635_v31 = vld [vmem:[%s8137_s0 + $0x1d4] sm:$0xf]  ;;  %v4603_v44 = vor.u32 %v5636_v24, %v4602_v23 }
 0x1e3   :  { %v1637_v61 = vmax.f32 %v1378_v51, 0.0  ;;  %2044 = vst.msk [vmem:[#allocation2 + $0x34] sm:$0xf] %vm1886_vm3, %v2040_v49  ;;  %v4607_v49 = vor.u32 %v5635_v31, %v4604_v25 }
 0x1e5   :  { %v1765_v6 = vpack.c.bf16 %v1637_v61, %v1637_v61 }
 0x1e6   :  { %v1050_v3 = vpop.f32.mrf.mxu0 }
 0x1e7   :  { %v1379_v7 = vpop.f32.mrf.mxu1  ;;  %2165 = vst.msk [vmem:[#allocation2 + $0x48] sm:$0xf] %vm1853_vm0, %v1765_v6  ;;  %v1051_v9 = vadd.f32 %v6655_v34, %v1050_v3  ;;  %2057 = vrot.lane.b32.xlu2 %v1765_v6, %s5907_s21 }
 0x1e8   :  { %2381 = vst.msk [vmem:[#allocation2 + $0xa0] sm:$0xf] %vm1853_vm0, %v1765_v6 }
 0x1e9   :  { %v1380_v15 = vadd.f32 %v1379_v7, %v1051_v9  ;;  %v2038_v17 = vpop.permute.xlu1 %2037  ;;  %v2138_v18 = vpop.permute.xlu0 %2137 }
 0x1ea   :  { %2043 = vst.msk [vmem:[#allocation2 + $0x24] sm:$0xf] %vm1886_vm3, %v2038_v17  ;;  %v4964_v7 = vld [vmem:[#allocation2 + $0x30] sm:$0xf0]  ;;  %v6914_v17 = vpop.f32.mrf.mxu2 }
 0x1eb   :  { %v1638_v38 = vmax.f32 %v1380_v15, 0.0  ;;  %2143 = vst.msk [vmem:[#allocation2 + $0x44] sm:$0xf] %vm1864_vm1, %v2138_v18  ;;  %v6912_v15 = vpop.f32.mrf.mxu3 }
 0x1ec   :  { %2153 = vst.msk [vmem:[#allocation2 + $0x44] sm:$0xf] %vm1875_vm2, %v2148_v33 }
 0x1ed   :  { %v1766_v40 = vpack.c.bf16 %v1638_v38, %v1638_v38  ;;  %v4610_v38 = vld [vmem:[%s8137_s0 + $0x1e0] sm:$0xf] }
 0x1ee   :  { %v1053_v51 = vpop.f32.mrf.mxu0 }
 0x1ef   :  { %v1382_v53 = vpop.f32.mrf.mxu1  ;;  %2166 = vst.msk [vmem:[#allocation2 + $0x58] sm:$0xf] %vm1853_vm0, %v1766_v40  ;;  %v1054_v55 = vadd.f32 %v6655_v34, %v1053_v51  ;;  %2059 = vrot.lane.b32.xlu0 %v1766_v40, %s5907_s21 }
 0x1f0   :  { %2382 = vst.msk [vmem:[#allocation2 + $0xb0] sm:$0xf] %vm1853_vm0, %v1766_v40  ;;  %v5638_v40 = vld [vmem:[%s8137_s0 + $0x1e4] sm:$0xf0] }
 0x1f1   :  { %v1383_v61 = vadd.f32 %v1382_v53, %v1054_v55  ;;  %1092 = vmatmul.bf16.gmra.mxu0 %v4603_v44  ;;  %v2140_v6 = vpop.permute.xlu1 %2139  ;;  %v5725_v3 = vld [vmem:[#allocation2 + $0x24] sm:$0xf] }
 0x1f2   :  { %1421 = vmatmul.bf16.gmra.mxu1 %v4607_v49  ;;  %2144 = vst.msk [vmem:[#allocation2 + $0x54] sm:$0xf] %vm1864_vm1, %v2140_v6  ;;  %v4967_v9 = vor.u32 %v5725_v3, %v4964_v7  ;;  %v5637_v44 = vld [vmem:[%s8137_s0 + $0x1e4] sm:$0xf]  ;;  %v4612_v49 = vld [vmem:[%s8137_s0 + $0x1e8] sm:$0xf0]  ;;  %v1577_v55 = vpop.f32.mrf.mxu2  ;;  %v4611_v6 = vor.u32 %v5638_v40, %v4610_v38 }
 0x1f3   :  { %v1639_v18 = vmax.f32 %v1383_v61, 0.0  ;;  %v4615_v3 = vor.u32 %v5637_v44, %v4612_v49 }
 0x1f4   :  { %3232 = vmatmul.bf16.gmra.mxu3 %v4967_v9 }
 0x1f5   :  { %v1767_v23 = vpack.c.bf16 %v1639_v18, %v1639_v18  ;;  %v1248_v53 = vpop.f32.mrf.mxu3 }
 0x1f6   :  { %v1055_v24 = vpop.f32.mrf.mxu0  ;;  %v1249_v7 = vadd.f32 %v6655_v34, %v1248_v53 }
 0x1f7   :  { %v1384_v31 = vpop.f32.mrf.mxu1  ;;  %v1056_v25 = vadd.f32 %v6655_v34, %v1055_v24  ;;  %2067 = vrot.lane.b32.xlu1 %v1767_v23, %s5908_s19  ;;  %2167 = vrot.lane.b32.xlu0 %v1767_v23, %s5906_s24 }
 0x1f8   :  { %v1578_v24 = vadd.f32 %v1577_v55, %v1249_v7  ;;  %v4620_v7 = vld [vmem:[%s8137_s0 + $0x1f8] sm:$0xf0] }
 0x1f9   :  { %v1385_v33 = vadd.f32 %v1384_v31, %v1056_v25  ;;  %v2160_v32 = vpop.permute.xlu2 %2159 }
 0x1fb   :  { %v1640_v51 = vmax.f32 %v1385_v33, 0.0  ;;  %v1717_v33 = vmax.f32 %v1578_v24, 0.0 }
 0x1fd   :  { %v1768_v61 = vpack.c.bf16 %v1640_v51, %v1640_v51  ;;  %v6937_v40 = vpack.c.bf16 %v1717_v33, %v1717_v33 }
 0x1fe   :  { %v1058_v9 = vpop.f32.mrf.mxu0 }
 0x1ff   :  { %v1387_v18 = vpop.f32.mrf.mxu1  ;;  %v1059_v23 = vadd.f32 %v6655_v34, %v1058_v9  ;;  %2069 = vrot.lane.b32.xlu2 %v1768_v61, %s5908_s19  ;;  %2169 = vrot.lane.b32.xlu1 %v1768_v61, %s5906_s24  ;;  %8155 = vst [vmem:[#allocation11_spill] sm:$0xff] %v6937_v40  ;;  %v6956_v9 = vpop.f32.mrf.mxu2 }
 0x200   :  { %2659 = vst.msk [vmem:[#allocation2 + $0x10c] sm:$0xf] %vm1853_vm0, %v6937_v40 }
 0x201   :  { %v1388_v31 = vadd.f32 %v1387_v18, %v1059_v23  ;;  %1097 = vmatmul.bf16.gmra.mxu0 %v4611_v6  ;;  %v2150_v25 = vpop.permute.xlu0 %2149  ;;  %v4618_v6 = vld [vmem:[%s8137_s0 + $0x1f0] sm:$0xf] }
 0x202   :  { %1426 = vmatmul.bf16.gmra.mxu1 %v4615_v3  ;;  %2154 = vst.msk [vmem:[#allocation2 + $0x54] sm:$0xf] %vm1875_vm2, %v2150_v25  ;;  %v5639_v3 = vld [vmem:[%s8137_s0 + $0x1f4] sm:$0xf] }
 0x203   :  { %v1641_v38 = vmax.f32 %v1388_v31, 0.0  ;;  %2164 = vst.msk [vmem:[#allocation2 + $0x54] sm:$0xf] %vm1886_vm3, %v2160_v32  ;;  %v5640_v32 = vld [vmem:[%s8137_s0 + $0x1f4] sm:$0xf0]  ;;  %v4623_v31 = vor.u32 %v5639_v3, %v4620_v7 }
 0x204   :  { %v4619_v24 = vor.u32 %v5640_v32, %v4618_v6 }
 0x205   :  { %v1769_v44 = vpack.c.bf16 %v1641_v38, %v1641_v38 }
 0x206   :  { %v1060_v49 = vpop.f32.mrf.mxu0 }
 0x207   :  { %v1389_v51 = vpop.f32.mrf.mxu1  ;;  %v1061_v53 = vadd.f32 %v6655_v34, %v1060_v49  ;;  %2177 = vrot.lane.b32.xlu2 %v1769_v44, %s5907_s21 }
 0x209   :  { %v1390_v55 = vadd.f32 %v1389_v51, %v1061_v53  ;;  %v2158_v61 = vpop.permute.xlu1 %2157  ;;  %v6960_v53 = vpop.f32.mrf.mxu3 }
 0x20a   :  { %2163 = vst.msk [vmem:[#allocation2 + $0x44] sm:$0xf] %vm1886_vm3, %v2158_v61  ;;  %v4980_v51 = vld [vmem:[#allocation2 + $0x50] sm:$0xf0] }
 0x20b   :  { %v1642_v18 = vmax.f32 %v1390_v55, 0.0  ;;  %v6962_v55 = vpop.f32.mrf.mxu2 }
 0x20d   :  { %v1770_v23 = vpack.c.bf16 %v1642_v18, %v1642_v18 }
 0x20e   :  { %v1063_v25 = vpop.f32.mrf.mxu0 }
 0x20f   :  { %v1392_v33 = vpop.f32.mrf.mxu1  ;;  %v1064_v38 = vadd.f32 %v6655_v34, %v1063_v25  ;;  %2179 = vrot.lane.b32.xlu0 %v1770_v23, %s5907_s21  ;;  %v4626_v23 = vld [vmem:[%s8137_s0 + $0x200] sm:$0xf] }
 0x211   :  { %v1393_v44 = vadd.f32 %v1392_v33, %v1064_v38  ;;  %1102 = vmatmul.bf16.gmra.mxu0 %v4619_v24  ;;  %v5729_v49 = vld [vmem:[#allocation2 + $0x44] sm:$0xf]  ;;  %v5642_v24 = vld [vmem:[%s8137_s0 + $0x204] sm:$0xf0]  ;;  %v6978_v33 = vpop.f32.mrf.mxu3 }
 0x212   :  { %1431 = vmatmul.bf16.gmra.mxu1 %v4623_v31  ;;  %v4983_v61 = vor.u32 %v5729_v49, %v4980_v51  ;;  %v5641_v31 = vld [vmem:[%s8137_s0 + $0x204] sm:$0xf] }
 0x213   :  { %v1643_v27 = vmax.f32 %v1393_v44, 0.0  ;;  %v4627_v44 = vor.u32 %v5642_v24, %v4626_v23 }
 0x214   :  { %3237 = vmatmul.bf16.gmra.mxu3 %v4983_v61 }
 0x215   :  { %v1771_v6 = vpack.c.bf16 %v1643_v27, %v1643_v27  ;;  %v4628_v27 = vld [vmem:[%s8137_s0 + $0x208] sm:$0xf0] }
 0x216   :  { %v1065_v32 = vpop.f32.mrf.mxu0  ;;  %v4631_v49 = vor.u32 %v5641_v31, %v4628_v27 }
 0x217   :  { %v1394_v3 = vpop.f32.mrf.mxu1  ;;  %v1066_v7 = vadd.f32 %v6655_v34, %v1065_v32  ;;  %2187 = vrot.lane.b32.xlu1 %v1771_v6, %s5908_s19  ;;  %v6980_v6 = vpop.f32.mrf.mxu2 }
 0x218   :  { %8156 = vst [vmem:[#allocation12_spill] sm:$0xff] %v6980_v6 }
 0x219   :  { %v1395_v18 = vadd.f32 %v1394_v3, %v1066_v7  ;;  %v6984_v0 = vpop.f32.mrf.mxu3 }
 0x21b   :  { %v1644_v25 = vmax.f32 %v1395_v18, 0.0 }
 0x21d   :  { %v1772_v38 = vpack.c.bf16 %v1644_v25, %v1644_v25  ;;  %v4634_v25 = vld [vmem:[%s8137_s0 + $0x210] sm:$0xf] }
 0x21e   :  { %v1068_v51 = vpop.f32.mrf.mxu0 }
 0x21f   :  { %v1397_v61 = vpop.f32.mrf.mxu1  ;;  %v1069_v32 = vadd.f32 %v6655_v34, %v1068_v51  ;;  %2189 = vrot.lane.b32.xlu2 %v1772_v38, %s5908_s19  ;;  %v6989_v24 = vpop.f32.mrf.mxu2  ;;  %v5644_v38 = vld [vmem:[%s8137_s0 + $0x214] sm:$0xf0] }
 0x220   :  { %8157 = vst [vmem:[#allocation13_spill] sm:$0xff] %v6989_v24 }
 0x221   :  { %v1398_v3 = vadd.f32 %v1397_v61, %v1069_v32  ;;  %1107 = vmatmul.bf16.gmra.mxu0 %v4627_v44  ;;  %v5643_v44 = vld [vmem:[%s8137_s0 + $0x214] sm:$0xf]  ;;  %v4635_v61 = vor.u32 %v5644_v38, %v4634_v25 }
 0x222   :  { %1436 = vmatmul.bf16.gmra.mxu1 %v4631_v49 }
 0x223   :  { %v1645_v7 = vmax.f32 %v1398_v3, 0.0 }
 0x225   :  { %v1773_v62 = vpack.c.bf16 %v1645_v7, %v1645_v7 }
 0x226   :  { %v1070_v18 = vpop.f32.mrf.mxu0 }
 0x227   :  { %v1399_v58 = vpop.f32.mrf.mxu1  ;;  %1953 = vst.msk [vmem:[#allocation2 + $0xc] sm:$0xf] %vm1853_vm0, %v1773_v62  ;;  %v1071_v23 = vadd.f32 %v6655_v34, %v1070_v18 }
 0x228   :  { %2233 = vst.msk [vmem:[#allocation2 + $0x64] sm:$0xf] %vm1853_vm0, %v1773_v62  ;;  %v4636_v62 = vld [vmem:[%s8137_s0 + $0x218] sm:$0xf0] }
 0x229   :  { %v1400_v31 = vadd.f32 %v1399_v58, %v1071_v23  ;;  %v1926_v27 = vpop.permute.xlu0 %1925  ;;  %v1936_v58 = vpop.permute.xlu2 %1935  ;;  %v4639_v32 = vor.u32 %v5643_v44, %v4636_v62 }
 0x22a   :  { %1931 = vst.msk [vmem:[#allocation2 + $0x8] sm:$0xf] %vm1864_vm1, %v1926_v27  ;;  %v7009_v23 = vpop.f32.mrf.mxu3 }
 0x22b   :  { %v1646_v49 = vmax.f32 %v1400_v31, 0.0  ;;  %2227 = vst.msk [vmem:[#allocation2 + $0x60] sm:$0xf] %vm1864_vm1, %v1926_v27 }
 0x22c   :  { %1941 = vst.msk [vmem:[#allocation2 + $0x8] sm:$0xf] %vm1875_vm2, %v1936_v58 }
 0x22d   :  { %v1774_v51 = vpack.c.bf16 %v1646_v49, %v1646_v49  ;;  %2229 = vst.msk [vmem:[#allocation2 + $0x60] sm:$0xf] %vm1875_vm2, %v1936_v58  ;;  %v7013_v49 = vpop.f32.mrf.mxu2 }
 0x22e   :  { %v1073_v3 = vpop.f32.mrf.mxu0  ;;  %8158 = vst [vmem:[#allocation14_spill] sm:$0xff] %v7009_v23 }
 0x22f   :  { %v1402_v7 = vpop.f32.mrf.mxu1  ;;  %1954 = vst.msk [vmem:[#allocation2 + $0x1c] sm:$0xf] %vm1853_vm0, %v1774_v51  ;;  %v1074_v18 = vadd.f32 %v6655_v34, %v1073_v3 }
 0x230   :  { %2234 = vst.msk [vmem:[#allocation2 + $0x74] sm:$0xf] %vm1853_vm0, %v1774_v51 }
 0x231   :  { %v1403_v31 = vadd.f32 %v1402_v7, %v1074_v18  ;;  %1112 = vmatmul.bf16.gmra.mxu0 %v4635_v61  ;;  %v1928_v27 = vpop.permute.xlu1 %1927  ;;  %8159 = vst [vmem:[#allocation15_spill] sm:$0xff] %v7013_v49  ;;  %v4642_v61 = vld [vmem:[%s8137_s0 + $0x220] sm:$0xf]  ;;  %v5645_v7 = vld [vmem:[%s8137_s0 + $0x224] sm:$0xf] }
 0x232   :  { %1441 = vmatmul.bf16.gmra.mxu1 %v4639_v32  ;;  %1932 = vst.msk [vmem:[#allocation2 + $0x18] sm:$0xf] %vm1864_vm1, %v1928_v27  ;;  %v7018_v51 = vpop.f32.mrf.mxu3  ;;  %v5646_v32 = vld [vmem:[%s8137_s0 + $0x224] sm:$0xf0]  ;;  %v4644_v18 = vld [vmem:[%s8137_s0 + $0x228] sm:$0xf0] }
 0x233   :  { %v1647_v25 = vmax.f32 %v1403_v31, 0.0  ;;  %2228 = vst.msk [vmem:[#allocation2 + $0x70] sm:$0xf] %vm1864_vm1, %v1928_v27 }
 0x234   :  { %8160 = vst [vmem:[#allocation16_spill] sm:$0xff] %v7018_v51 }
 0x235   :  { %v1775_v38 = vpack.c.bf16 %v1647_v25, %v1647_v25  ;;  %v7032_v27 = vpop.f32.mrf.mxu2 }
 0x236   :  { %v1075_v44 = vpop.f32.mrf.mxu0  ;;  %8161 = vst [vmem:[#allocation17_spill] sm:$0xff] %v7032_v27 }
 0x237   :  { %v1404_v62 = vpop.f32.mrf.mxu1  ;;  %v1076_v58 = vadd.f32 %v6655_v34, %v1075_v44  ;;  %1957 = vrot.lane.b32.xlu0 %v1775_v38, %s5906_s24  ;;  %v4643_v38 = vor.u32 %v5646_v32, %v4642_v61  ;;  %v4647_v44 = vor.u32 %v5645_v7, %v4644_v18 }
 0x239   :  { %v1405_v3 = vadd.f32 %v1404_v62, %v1076_v58  ;;  %v1948_v51 = vpop.permute.xlu2 %1947 }
 0x23b   :  { %v1648_v31 = vmax.f32 %v1405_v3, 0.0  ;;  %v7038_v3 = vpop.f32.mrf.mxu3 }
 0x23c   :  { %8162 = vst [vmem:[#allocation18_spill] sm:$0xff] %v7038_v3 }
 0x23d   :  { %v1776_v25 = vpack.c.bf16 %v1648_v31, %v1648_v31  ;;  %v7045_v18 = vpop.f32.mrf.mxu2 }
 0x23e   :  { %v1078_v62 = vpop.f32.mrf.mxu0  ;;  %8163 = vst [vmem:[#allocation19_spill] sm:$0xff] %v7045_v18 }
 0x23f   :  { %v1407_v58 = vpop.f32.mrf.mxu1  ;;  %v1079_v24 = vadd.f32 %v6655_v34, %v1078_v62  ;;  %1959 = vrot.lane.b32.xlu1 %v1776_v25, %s5906_s24 }
 0x241   :  { %v1408_v23 = vadd.f32 %v1407_v58, %v1079_v24  ;;  %1117 = vmatmul.bf16.gmra.mxu0 %v4643_v38  ;;  %v1938_v49 = vpop.permute.xlu0 %1937  ;;  %v4652_v38 = vld [vmem:[%s8137_s0 + $0x238] sm:$0xf0]  ;;  %v2058_v62 = vpop.permute.xlu2 %2057 }
 0x242   :  { %1446 = vmatmul.bf16.gmra.mxu1 %v4647_v44  ;;  %1942 = vst.msk [vmem:[#allocation2 + $0x18] sm:$0xf] %vm1875_vm2, %v1938_v49 }
 0x243   :  { %v1649_v8 = vmax.f32 %v1408_v23, 0.0  ;;  %1952 = vst.msk [vmem:[#allocation2 + $0x18] sm:$0xf] %vm1886_vm3, %v1948_v51 }
 0x244   :  { %2230 = vst.msk [vmem:[#allocation2 + $0x70] sm:$0xf] %vm1875_vm2, %v1938_v49  ;;  %v5648_v49 = vld [vmem:[%s8137_s0 + $0x234] sm:$0xf0] }
 0x245   :  { %v1777_v61 = vpack.c.bf16 %v1649_v8, %v1649_v8  ;;  %2232 = vst.msk [vmem:[#allocation2 + $0x70] sm:$0xf] %vm1886_vm3, %v1948_v51  ;;  %v4650_v8 = vld [vmem:[%s8137_s0 + $0x230] sm:$0xf]  ;;  %v5647_v51 = vld [vmem:[%s8137_s0 + $0x234] sm:$0xf] }
 0x246   :  { %v1080_v32 = vpop.f32.mrf.mxu0 }
 0x247   :  { %v1409_v7 = vpop.f32.mrf.mxu1  ;;  %2075 = vst.msk [vmem:[#allocation2 + $0x2c] sm:$0xf] %vm1853_vm0, %v1777_v61  ;;  %v1081_v24 = vadd.f32 %v6655_v34, %v1080_v32  ;;  %1967 = vrot.lane.b32.xlu2 %v1777_v61, %s5907_s21  ;;  %v4651_v32 = vor.u32 %v5648_v49, %v4650_v8 }
 0x248   :  { %2313 = vst.msk [vmem:[#allocation2 + $0x84] sm:$0xf] %vm1853_vm0, %v1777_v61  ;;  %v7064_v61 = vpop.f32.mrf.mxu3 }
 0x249   :  { %v1410_v23 = vadd.f32 %v1409_v7, %v1081_v24  ;;  %v1946_v31 = vpop.permute.xlu1 %1945  ;;  %v2048_v25 = vpop.permute.xlu0 %2047  ;;  %8164 = vst [vmem:[#allocation20_spill] sm:$0xff] %v7064_v61  ;;  %v4655_v7 = vor.u32 %v5647_v51, %v4652_v38 }
 0x24a   :  { %1951 = vst.msk [vmem:[#allocation2 + $0x8] sm:$0xf] %vm1886_vm3, %v1946_v31 }
 0x24b   :  { %v1650_v44 = vmax.f32 %v1410_v23, 0.0  ;;  %2231 = vst.msk [vmem:[#allocation2 + $0x60] sm:$0xf] %vm1886_vm3, %v1946_v31  ;;  %v7074_v31 = vld [vmem:[%s8139_s4] ss:$0 sm:$0xff] }
 0x24c   :  { %2053 = vst.msk [vmem:[#allocation2 + $0x28] sm:$0xf] %vm1864_vm1, %v2048_v25  ;;  %v5735_v51 = vld [vmem:[#allocation2 + $0x6c] sm:$0xf0] }
 0x24d   :  { %v1778_v58 = vpack.c.bf16 %v1650_v44, %v1650_v44  ;;  %2307 = vst.msk [vmem:[#allocation2 + $0x80] sm:$0xf] %vm1864_vm1, %v2048_v25 }
 0x24e   :  { %2063 = vst.msk [vmem:[#allocation2 + $0x28] sm:$0xf] %vm1875_vm2, %v2058_v62  ;;  %v1083_v24 = vpop.f32.mrf.mxu0 }
 0x24f   :  { %v1412_v18 = vpop.f32.mrf.mxu1  ;;  %2076 = vst.msk [vmem:[#allocation2 + $0x3c] sm:$0xf] %vm1853_vm0, %v1778_v58  ;;  %v1084_v23 = vadd.f32 %v6655_v34, %v1083_v24  ;;  %1969 = vrot.lane.b32.xlu0 %v1778_v58, %s5907_s21  ;;  %v3174_v34 = vpop.f32.mrf.mxu2 }
 0x250   :  { %2314 = vst.msk [vmem:[#allocation2 + $0x94] sm:$0xf] %vm1853_vm0, %v1778_v58  ;;  %v3175_v24 = vadd.f32 %v7074_v31, %v3174_v34 }
 0x251   :  { %2309 = vst.msk [vmem:[#allocation2 + $0x80] sm:$0xf] %vm1875_vm2, %v2058_v62  ;;  %v1413_v25 = vadd.f32 %v1412_v18, %v1084_v23  ;;  %1122 = vmatmul.bf16.gmra.mxu0 %v4651_v32  ;;  %v2050_v8 = vpop.permute.xlu1 %2049  ;;  %v7083_v18 = vld [vmem:[%s8136_s2] ss:$0 sm:$0xff] }
 0x252   :  { %1451 = vmatmul.bf16.gmra.mxu1 %v4655_v7  ;;  %2054 = vst.msk [vmem:[#allocation2 + $0x38] sm:$0xf] %vm1864_vm1, %v2050_v8  ;;  %v4994_v49 = vld [vmem:[#allocation2 + $0x60] sm:$0xf] }
 0x253   :  { %v1651_v38 = vmax.f32 %v1413_v25, 0.0  ;;  %2308 = vst.msk [vmem:[#allocation2 + $0x90] sm:$0xf] %vm1864_vm1, %v2050_v8  ;;  %v4995_v44 = vor.u32 %v5735_v51, %v4994_v49  ;;  %v4658_v25 = vld [vmem:[%s8137_s0 + $0x240] sm:$0xf] }
 0x254   :  { %v5650_v8 = vld [vmem:[%s8137_s0 + $0x244] sm:$0xf0]  ;;  %v4660_v49 = vld [vmem:[%s8137_s0 + $0x248] sm:$0xf0] }
 0x255   :  { %v1779_v58 = vpack.c.bf16 %v1651_v38, %v1651_v38  ;;  %3188 = vmatmul.bf16.gmra.mxu2 %v4995_v44  ;;  %v4659_v38 = vor.u32 %v5650_v8, %v4658_v25 }
 0x256   :  { %v1085_v61 = vpop.f32.mrf.mxu0 }
 0x257   :  { %v1414_v27 = vpop.f32.mrf.mxu1  ;;  %v1086_v62 = vadd.f32 %v7083_v18, %v1085_v61  ;;  %1977 = vrot.lane.b32.xlu1 %v1779_v58, %s5908_s19  ;;  %2077 = vrot.lane.b32.xlu0 %v1779_v58, %s5906_s24  ;;  %v3228_v32 = vpop.f32.mrf.mxu3  ;;  %v5649_v61 = vld [vmem:[%s8137_s0 + $0x244] sm:$0xf] }
 0x258   :  { %v7088_v7 = vadd.f32 %v3228_v32, %v3175_v24 }
 0x259   :  { %v1415_v23 = vadd.f32 %v1414_v27, %v1086_v62  ;;  %v4663_v27 = vor.u32 %v5649_v61, %v4660_v49 }
 0x25a   :  { %8165 = vst [vmem:[#allocation21_spill] sm:$0xff] %v7088_v7  ;;  %v2070_v7 = vpop.permute.xlu2 %2069 }
 0x25b   :  { %v1652_v51 = vmax.f32 %v1415_v23, 0.0 }
 0x25d   :  { %v1780_v34 = vpack.c.bf16 %v1652_v51, %v1652_v51 }
 0x25e   :  { %v1088_v44 = vpop.f32.mrf.mxu0 }
 0x25f   :  { %v1417_v58 = vpop.f32.mrf.mxu1  ;;  %v1089_v24 = vadd.f32 %v7083_v18, %v1088_v44  ;;  %1979 = vrot.lane.b32.xlu2 %v1780_v34, %s5908_s19  ;;  %2079 = vrot.lane.b32.xlu1 %v1780_v34, %s5906_s24  ;;  %v7126_v44 = vpop.f32.mrf.mxu2 }
 0x260   :  { %8166 = vst [vmem:[#allocation22_spill] sm:$0xff] %v7126_v44 }
 0x261   :  { %v1418_v62 = vadd.f32 %v1417_v58, %v1089_v24  ;;  %1127 = vmatmul.bf16.gmra.mxu0 %v4659_v38  ;;  %v2060_v32 = vpop.permute.xlu0 %2059  ;;  %v4666_v38 = vld [vmem:[%s8137_s0 + $0x250] sm:$0xf] }
 0x262   :  { %1456 = vmatmul.bf16.gmra.mxu1 %v4663_v27  ;;  %2064 = vst.msk [vmem:[#allocation2 + $0x38] sm:$0xf] %vm1875_vm2, %v2060_v32  ;;  %v4668_v27 = vld [vmem:[%s8137_s0 + $0x258] sm:$0xf0]  ;;  %v2178_v24 = vpop.permute.xlu2 %2177 }
 0x263   :  { %v1653_v3 = vmax.f32 %v1418_v62, 0.0  ;;  %2074 = vst.msk [vmem:[#allocation2 + $0x38] sm:$0xf] %vm1886_vm3, %v2070_v7 }
 0x264   :  { %2310 = vst.msk [vmem:[#allocation2 + $0x90] sm:$0xf] %vm1875_vm2, %v2060_v32 }
 0x265   :  { %v1781_v23 = vpack.c.bf16 %v1653_v3, %v1653_v3  ;;  %2312 = vst.msk [vmem:[#allocation2 + $0x90] sm:$0xf] %vm1886_vm3, %v2070_v7  ;;  %v5652_v3 = vld [vmem:[%s8137_s0 + $0x254] sm:$0xf0]  ;;  %v5651_v7 = vld [vmem:[%s8137_s0 + $0x254] sm:$0xf] }
 0x266   :  { %v1090_v25 = vpop.f32.mrf.mxu0  ;;  %v4667_v32 = vor.u32 %v5652_v3, %v4666_v38 }
 0x267   :  { %v1419_v8 = vpop.f32.mrf.mxu1  ;;  %2195 = vst.msk [vmem:[#allocation2 + $0x4c] sm:$0xf] %vm1853_vm0, %v1781_v23  ;;  %v1091_v61 = vadd.f32 %v7083_v18, %v1090_v25  ;;  %2087 = vrot.lane.b32.xlu2 %v1781_v23, %s5907_s21 }
 0x268   :  { %2389 = vst.msk [vmem:[#allocation2 + $0xa4] sm:$0xf] %vm1853_vm0, %v1781_v23  ;;  %v4671_v23 = vor.u32 %v5651_v7, %v4668_v27  ;;  %v3179_v7 = vpop.f32.mrf.mxu2 }
 0x269   :  { %v1420_v49 = vadd.f32 %v1419_v8, %v1091_v61  ;;  %v2068_v51 = vpop.permute.xlu1 %2067  ;;  %v2168_v34 = vpop.permute.xlu0 %2167 }
 0x26a   :  { %2073 = vst.msk [vmem:[#allocation2 + $0x28] sm:$0xf] %vm1886_vm3, %v2068_v51  ;;  %v7132_v61 = vpop.f32.mrf.mxu3 }
 0x26b   :  { %v1654_v58 = vmax.f32 %v1420_v49, 0.0  ;;  %2311 = vst.msk [vmem:[#allocation2 + $0x80] sm:$0xf] %vm1886_vm3, %v2068_v51 }
 0x26c   :  { %2173 = vst.msk [vmem:[#allocation2 + $0x48] sm:$0xf] %vm1864_vm1, %v2168_v34  ;;  %v5739_v3 = vld [vmem:[#allocation2 + $0x8c] sm:$0xf0] }
 0x26d   :  { %v1782_v62 = vpack.c.bf16 %v1654_v58, %v1654_v58  ;;  %2383 = vst.msk [vmem:[#allocation2 + $0xa0] sm:$0xf] %vm1864_vm1, %v2168_v34 }
 0x26e   :  { %2183 = vst.msk [vmem:[#allocation2 + $0x48] sm:$0xf] %vm1875_vm2, %v2178_v24  ;;  %v1093_v25 = vpop.f32.mrf.mxu0 }
 0x26f   :  { %v1422_v8 = vpop.f32.mrf.mxu1  ;;  %8167 = vst [vmem:[#allocation23_spill] sm:$0xff] %v7132_v61  ;;  %v1094_v49 = vadd.f32 %v7083_v18, %v1093_v25  ;;  %2089 = vrot.lane.b32.xlu0 %v1782_v62, %s5907_s21  ;;  %v3180_v61 = vadd.f32 %v7074_v31, %v3179_v7 }
 0x270   :  { %2196 = vst.msk [vmem:[#allocation2 + $0x5c] sm:$0xf] %vm1853_vm0, %v1782_v62 }
 0x271   :  { %2390 = vst.msk [vmem:[#allocation2 + $0xb4] sm:$0xf] %vm1853_vm0, %v1782_v62  ;;  %v1423_v51 = vadd.f32 %v1422_v8, %v1094_v49  ;;  %1132 = vmatmul.bf16.gmra.mxu0 %v4667_v32  ;;  %v2170_v34 = vpop.permute.xlu1 %2169  ;;  %v4674_v49 = vld [vmem:[%s8137_s0 + $0x260] sm:$0xf] }
 0x272   :  { %2385 = vst.msk [vmem:[#allocation2 + $0xa0] sm:$0xf] %vm1875_vm2, %v2178_v24  ;;  %1461 = vmatmul.bf16.gmra.mxu1 %v4671_v23  ;;  %v5010_v38 = vld [vmem:[#allocation2 + $0x80] sm:$0xf] }
 0x273   :  { %2174 = vst.msk [vmem:[#allocation2 + $0x58] sm:$0xf] %vm1864_vm1, %v2170_v34  ;;  %v1655_v27 = vmax.f32 %v1423_v51, 0.0  ;;  %v5011_v58 = vor.u32 %v5739_v3, %v5010_v38  ;;  %v5654_v51 = vld [vmem:[%s8137_s0 + $0x264] sm:$0xf0] }
 0x274   :  { %2384 = vst.msk [vmem:[#allocation2 + $0xb0] sm:$0xf] %vm1864_vm1, %v2170_v34  ;;  %v5653_v34 = vld [vmem:[%s8137_s0 + $0x264] sm:$0xf]  ;;  %v4676_v38 = vld [vmem:[%s8137_s0 + $0x268] sm:$0xf0]  ;;  %v4675_v7 = vor.u32 %v5654_v51, %v4674_v49 }
 0x275   :  { %v1783_v25 = vpack.c.bf16 %v1655_v27, %v1655_v27  ;;  %3193 = vmatmul.bf16.gmra.mxu2 %v5011_v58 }
 0x276   :  { %v1095_v62 = vpop.f32.mrf.mxu0 }
 0x277   :  { %v1424_v44 = vpop.f32.mrf.mxu1  ;;  %v1096_v24 = vadd.f32 %v7083_v18, %v1095_v62  ;;  %2097 = vrot.lane.b32.xlu1 %v1783_v25, %s5908_s19  ;;  %2197 = vrot.lane.b32.xlu0 %v1783_v25, %s5906_s24  ;;  %v3233_v32 = vpop.f32.mrf.mxu3 }
 0x278   :  { %v7145_v23 = vadd.f32 %v3233_v32, %v3180_v61 }
 0x279   :  { %v1425_v8 = vadd.f32 %v1424_v44, %v1096_v24  ;;  %v4679_v44 = vor.u32 %v5653_v34, %v4676_v38  ;;  %v2190_v32 = vpop.permute.xlu2 %2189 }
 0x27a   :  { %8168 = vst [vmem:[#allocation24_spill] sm:$0xff] %v7145_v23 }
 0x27b   :  { %v1656_v3 = vmax.f32 %v1425_v8, 0.0 }
 0x27d   :  { %v1784_v61 = vpack.c.bf16 %v1656_v3, %v1656_v3 }
 0x27e   :  { %v1098_v27 = vpop.f32.mrf.mxu0 }
 0x27f   :  { %v1427_v58 = vpop.f32.mrf.mxu1  ;;  %v1099_v25 = vadd.f32 %v7083_v18, %v1098_v27  ;;  %2099 = vrot.lane.b32.xlu2 %v1784_v61, %s5908_s19  ;;  %2199 = vrot.lane.b32.xlu1 %v1784_v61, %s5906_s24  ;;  %v4682_v61 = vld [vmem:[%s8137_s0 + $0x270] sm:$0xf]  ;;  %v7181_v27 = vpop.f32.mrf.mxu2 }
 0x280   :  { %8169 = vst [vmem:[#allocation25_spill] sm:$0xff] %v7181_v27 }
 0x281   :  { %v1428_v62 = vadd.f32 %v1427_v58, %v1099_v25  ;;  %1137 = vmatmul.bf16.gmra.mxu0 %v4675_v7  ;;  %v2180_v24 = vpop.permute.xlu0 %2179  ;;  %v5656_v7 = vld [vmem:[%s8137_s0 + $0x274] sm:$0xf0] }
 0x282   :  { %1466 = vmatmul.bf16.gmra.mxu1 %v4679_v44  ;;  %2184 = vst.msk [vmem:[#allocation2 + $0x58] sm:$0xf] %vm1875_vm2, %v2180_v24  ;;  %v4684_v44 = vld [vmem:[%s8137_s0 + $0x278] sm:$0xf0] }
 0x283   :  { %v1657_v23 = vmax.f32 %v1428_v62, 0.0  ;;  %2194 = vst.msk [vmem:[#allocation2 + $0x58] sm:$0xf] %vm1886_vm3, %v2190_v32  ;;  %v4683_v62 = vor.u32 %v5656_v7, %v4682_v61 }
 0x284   :  { %2386 = vst.msk [vmem:[#allocation2 + $0xb0] sm:$0xf] %vm1875_vm2, %v2180_v24 }
 0x285   :  { %v1785_v8 = vpack.c.bf16 %v1657_v23, %v1657_v23  ;;  %2388 = vst.msk [vmem:[#allocation2 + $0xb0] sm:$0xf] %vm1886_vm3, %v2190_v32  ;;  %v5655_v23 = vld [vmem:[%s8137_s0 + $0x274] sm:$0xf] }
 0x286   :  { %v1100_v49 = vpop.f32.mrf.mxu0  ;;  %v4687_v24 = vor.u32 %v5655_v23, %v4684_v44 }
 0x287   :  { %v1429_v51 = vpop.f32.mrf.mxu1  ;;  %v1101_v34 = vadd.f32 %v7083_v18, %v1100_v49  ;;  %2207 = vrot.lane.b32.xlu2 %v1785_v8, %s5907_s21  ;;  %v7184_v49 = vpop.f32.mrf.mxu3 }
 0x288   :  { %v3184_v27 = vpop.f32.mrf.mxu2 }
 0x289   :  { %v1430_v38 = vadd.f32 %v1429_v51, %v1101_v34  ;;  %v2188_v3 = vpop.permute.xlu1 %2187  ;;  %v3185_v61 = vadd.f32 %v7074_v31, %v3184_v27 }
 0x28a   :  { %2193 = vst.msk [vmem:[#allocation2 + $0x48] sm:$0xf] %vm1886_vm3, %v2188_v3 }
 0x28b   :  { %v1658_v58 = vmax.f32 %v1430_v38, 0.0  ;;  %2387 = vst.msk [vmem:[#allocation2 + $0xa0] sm:$0xf] %vm1886_vm3, %v2188_v3 }
 0x28c   :  { %v5743_v30 = vld [vmem:[#allocation2 + $0xac] sm:$0xf0] }
 0x28d   :  { %v1786_v25 = vpack.c.bf16 %v1658_v58, %v1658_v58 }
 0x28e   :  { %v1103_v32 = vpop.f32.mrf.mxu0 }
 0x28f   :  { %v1432_v8 = vpop.f32.mrf.mxu1  ;;  %v1104_v51 = vadd.f32 %v7083_v18, %v1103_v32  ;;  %2209 = vrot.lane.b32.xlu0 %v1786_v25, %s5907_s21 }
 0x291   :  { %v1433_v34 = vadd.f32 %v1432_v8, %v1104_v51  ;;  %1142 = vmatmul.bf16.gmra.mxu0 %v4683_v62 }
 0x292   :  { %1471 = vmatmul.bf16.gmra.mxu1 %v4687_v24  ;;  %v5026_v40 = vld [vmem:[#allocation2 + $0xa0] sm:$0xf] }
 0x293   :  { %v1659_v38 = vmax.f32 %v1433_v34, 0.0  ;;  %v5027_v6 = vor.u32 %v5743_v30, %v5026_v40  ;;  %v4690_v24 = vld [vmem:[%s8137_s0 + $0x280] sm:$0xf]  ;;  %v5658_v30 = vld [vmem:[%s8137_s0 + $0x284] sm:$0xf0] }
 0x294   :  { %v5657_v40 = vld [vmem:[%s8137_s0 + $0x284] sm:$0xf]  ;;  %v4691_v8 = vor.u32 %v5658_v30, %v4690_v24 }
 0x295   :  { %v1787_v3 = vpack.c.bf16 %v1659_v38, %v1659_v38  ;;  %3198 = vmatmul.bf16.gmra.mxu2 %v5027_v6  ;;  %v4692_v6 = vld [vmem:[%s8137_s0 + $0x288] sm:$0xf0] }
 0x296   :  { %v1105_v7 = vpop.f32.mrf.mxu0  ;;  %v4695_v51 = vor.u32 %v5657_v40, %v4692_v6  ;;  %v4698_v40 = vld [vmem:[%s8137_s0 + $0x290] sm:$0xf]  ;;  %v5660_v6 = vld [vmem:[%s8137_s0 + $0x294] sm:$0xf0] }
 0x297   :  { %v1434_v23 = vpop.f32.mrf.mxu1  ;;  %v1106_v44 = vadd.f32 %v7083_v18, %v1105_v7  ;;  %2217 = vrot.lane.b32.xlu1 %v1787_v3, %s5908_s19  ;;  %v3238_v58 = vpop.f32.mrf.mxu3 }
 0x298   :  { %v7191_v25 = vadd.f32 %v3238_v58, %v3185_v61 }
 0x299   :  { %v1435_v62 = vadd.f32 %v1434_v23, %v1106_v44 }
 0x29b   :  { %v1660_v27 = vmax.f32 %v1435_v62, 0.0 }
 0x29d   :  { %v1788_v32 = vpack.c.bf16 %v1660_v27, %v1660_v27  ;;  %v5659_v27 = vld [vmem:[%s8137_s0 + $0x294] sm:$0xf] }
 0x29e   :  { %v1108_v34 = vpop.f32.mrf.mxu0 }
 0x29f   :  { %v1437_v38 = vpop.f32.mrf.mxu1  ;;  %v1109_v3 = vadd.f32 %v7083_v18, %v1108_v34  ;;  %2219 = vrot.lane.b32.xlu2 %v1788_v32, %s5908_s19  ;;  %v4700_v32 = vld [vmem:[%s8137_s0 + $0x298] sm:$0xf0] }
 0x2a1   :  { %v1438_v61 = vadd.f32 %v1437_v38, %v1109_v3  ;;  %1147 = vmatmul.bf16.gmra.mxu0 %v4691_v8  ;;  %v1968_v8 = vpop.permute.xlu2 %1967  ;;  %v4699_v38 = vor.u32 %v5660_v6, %v4698_v40  ;;  %v4703_v3 = vor.u32 %v5659_v27, %v4700_v32  ;;  %v4706_v32 = vld [vmem:[%s8137_s0 + $0x2a0] sm:$0xf] }
 0x2a2   :  { %1476 = vmatmul.bf16.gmra.mxu1 %v4695_v51 }
 0x2a3   :  { %v1661_v7 = vmax.f32 %v1438_v61, 0.0 }
 0x2a5   :  { %v1789_v23 = vpack.c.bf16 %v1661_v7, %v1661_v7 }
 0x2a6   :  { %v1110_v44 = vpop.f32.mrf.mxu0 }
 0x2a7   :  { %v1439_v58 = vpop.f32.mrf.mxu1  ;;  %2241 = vst.msk [vmem:[#allocation2 + $0x68] sm:$0xf] %vm1853_vm0, %v1789_v23  ;;  %v1111_v62 = vadd.f32 %v7083_v18, %v1110_v44 }
 0x2a8   :  { %2457 = vst.msk [vmem:[#allocation2 + $0xc0] sm:$0xf] %vm1853_vm0, %v1789_v23 }
 0x2a9   :  { %v1440_v24 = vadd.f32 %v1439_v58, %v1111_v62  ;;  %v1958_v30 = vpop.permute.xlu0 %1957 }
 0x2aa   :  { %1963 = vst.msk [vmem:[#allocation2 + $0xc] sm:$0xf] %vm1864_vm1, %v1958_v30 }
 0x2ab   :  { %v1662_v51 = vmax.f32 %v1440_v24, 0.0  ;;  %2235 = vst.msk [vmem:[#allocation2 + $0x64] sm:$0xf] %vm1864_vm1, %v1958_v30 }
 0x2ac   :  { %1973 = vst.msk [vmem:[#allocation2 + $0xc] sm:$0xf] %vm1875_vm2, %v1968_v8 }
 0x2ad   :  { %v1790_v34 = vpack.c.bf16 %v1662_v51, %v1662_v51  ;;  %2237 = vst.msk [vmem:[#allocation2 + $0x64] sm:$0xf] %vm1875_vm2, %v1968_v8  ;;  %v5662_v8 = vld [vmem:[%s8137_s0 + $0x2a4] sm:$0xf0]  ;;  %v5661_v51 = vld [vmem:[%s8137_s0 + $0x2a4] sm:$0xf] }
 0x2ae   :  { %v1113_v61 = vpop.f32.mrf.mxu0 }
 0x2af   :  { %v1442_v7 = vpop.f32.mrf.mxu1  ;;  %2242 = vst.msk [vmem:[#allocation2 + $0x78] sm:$0xf] %vm1853_vm0, %v1790_v34  ;;  %v1114_v23 = vadd.f32 %v7083_v18, %v1113_v61  ;;  %v4707_v61 = vor.u32 %v5662_v8, %v4706_v32 }
 0x2b0   :  { %2458 = vst.msk [vmem:[#allocation2 + $0xd0] sm:$0xf] %vm1853_vm0, %v1790_v34  ;;  %v4708_v34 = vld [vmem:[%s8137_s0 + $0x2a8] sm:$0xf0] }
 0x2b1   :  { %v1443_v44 = vadd.f32 %v1442_v7, %v1114_v23  ;;  %1152 = vmatmul.bf16.gmra.mxu0 %v4699_v38  ;;  %v1960_v58 = vpop.permute.xlu1 %1959  ;;  %v4711_v7 = vor.u32 %v5661_v51, %v4708_v34 }
 0x2b2   :  { %1481 = vmatmul.bf16.gmra.mxu1 %v4703_v3  ;;  %1964 = vst.msk [vmem:[#allocation2 + $0x1c] sm:$0xf] %vm1864_vm1, %v1960_v58 }
 0x2b3   :  { %v1663_v62 = vmax.f32 %v1443_v44, 0.0  ;;  %2236 = vst.msk [vmem:[#allocation2 + $0x74] sm:$0xf] %vm1864_vm1, %v1960_v58 }
 0x2b5   :  { %v1791_v24 = vpack.c.bf16 %v1663_v62, %v1663_v62 }
 0x2b6   :  { %v1115_v30 = vpop.f32.mrf.mxu0 }
 0x2b7   :  { %v1444_v40 = vpop.f32.mrf.mxu1  ;;  %v1116_v6 = vadd.f32 %v7083_v18, %v1115_v30  ;;  %2245 = vrot.lane.b32.xlu0 %v1791_v24, %s5906_s24 }
 0x2b9   :  { %v1445_v27 = vadd.f32 %v1444_v40, %v1116_v6  ;;  %v1980_v30 = vpop.permute.xlu2 %1979 }
 0x2bb   :  { %v1664_v38 = vmax.f32 %v1445_v27, 0.0 }
 0x2bd   :  { %v1792_v3 = vpack.c.bf16 %v1664_v38, %v1664_v38 }
 0x2be   :  { %v1118_v23 = vpop.f32.mrf.mxu0 }
 0x2bf   :  { %v1447_v44 = vpop.f32.mrf.mxu1  ;;  %v1119_v58 = vadd.f32 %v7083_v18, %v1118_v23  ;;  %2247 = vrot.lane.b32.xlu1 %v1792_v3, %s5906_s24  ;;  %v4714_v3 = vld [vmem:[%s8137_s0 + $0x2b0] sm:$0xf]  ;;  %v4716_v23 = vld [vmem:[%s8137_s0 + $0x2b8] sm:$0xf0] }
 0x2c1   :  { %v1448_v62 = vadd.f32 %v1447_v44, %v1119_v58  ;;  %1157 = vmatmul.bf16.gmra.mxu0 %v4707_v61  ;;  %v1970_v24 = vpop.permute.xlu0 %1969  ;;  %v5664_v61 = vld [vmem:[%s8137_s0 + $0x2b4] sm:$0xf0]  ;;  %v2088_v58 = vpop.permute.xlu2 %2087 }
 0x2c2   :  { %1486 = vmatmul.bf16.gmra.mxu1 %v4711_v7  ;;  %1974 = vst.msk [vmem:[#allocation2 + $0x1c] sm:$0xf] %vm1875_vm2, %v1970_v24  ;;  %v5663_v7 = vld [vmem:[%s8137_s0 + $0x2b4] sm:$0xf] }
 0x2c3   :  { %v1665_v40 = vmax.f32 %v1448_v62, 0.0  ;;  %1984 = vst.msk [vmem:[#allocation2 + $0x1c] sm:$0xf] %vm1886_vm3, %v1980_v30 }
 0x2c4   :  { %2238 = vst.msk [vmem:[#allocation2 + $0x74] sm:$0xf] %vm1875_vm2, %v1970_v24  ;;  %v4715_v24 = vor.u32 %v5664_v61, %v4714_v3 }
 0x2c5   :  { %v1793_v6 = vpack.c.bf16 %v1665_v40, %v1665_v40  ;;  %2240 = vst.msk [vmem:[#allocation2 + $0x74] sm:$0xf] %vm1886_vm3, %v1980_v30  ;;  %v4719_v30 = vor.u32 %v5663_v7, %v4716_v23 }
 0x2c6   :  { %v1120_v27 = vpop.f32.mrf.mxu0 }
 0x2c7   :  { %v1449_v32 = vpop.f32.mrf.mxu1  ;;  %2321 = vst.msk [vmem:[#allocation2 + $0x88] sm:$0xf] %vm1853_vm0, %v1793_v6  ;;  %v1121_v8 = vadd.f32 %v7083_v18, %v1120_v27  ;;  %2255 = vrot.lane.b32.xlu2 %v1793_v6, %s5907_s21 }
 0x2c8   :  { %2537 = vst.msk [vmem:[#allocation2 + $0xe0] sm:$0xf] %vm1853_vm0, %v1793_v6 }
 0x2c9   :  { %v1450_v51 = vadd.f32 %v1449_v32, %v1121_v8  ;;  %v1978_v34 = vpop.permute.xlu1 %1977  ;;  %v2078_v38 = vpop.permute.xlu0 %2077 }
 0x2ca   :  { %1983 = vst.msk [vmem:[#allocation2 + $0xc] sm:$0xf] %vm1886_vm3, %v1978_v34 }
 0x2cb   :  { %v1666_v44 = vmax.f32 %v1450_v51, 0.0  ;;  %2239 = vst.msk [vmem:[#allocation2 + $0x64] sm:$0xf] %vm1886_vm3, %v1978_v34 }
 0x2cc   :  { %2083 = vst.msk [vmem:[#allocation2 + $0x2c] sm:$0xf] %vm1864_vm1, %v2078_v38  ;;  %v4996_v34 = vld [vmem:[#allocation2 + $0x70] sm:$0xf0] }
 0x2cd   :  { %v1794_v62 = vpack.c.bf16 %v1666_v44, %v1666_v44  ;;  %2315 = vst.msk [vmem:[#allocation2 + $0x84] sm:$0xf] %vm1864_vm1, %v2078_v38 }
 0x2ce   :  { %2093 = vst.msk [vmem:[#allocation2 + $0x2c] sm:$0xf] %vm1875_vm2, %v2088_v58  ;;  %v1123_v40 = vpop.f32.mrf.mxu0 }
 0x2cf   :  { %v1452_v6 = vpop.f32.mrf.mxu1  ;;  %2322 = vst.msk [vmem:[#allocation2 + $0x98] sm:$0xf] %vm1853_vm0, %v1794_v62  ;;  %v1124_v27 = vadd.f32 %v7083_v18, %v1123_v40  ;;  %2257 = vrot.lane.b32.xlu0 %v1794_v62, %s5907_s21  ;;  %v4724_v40 = vld [vmem:[%s8137_s0 + $0x2c8] sm:$0xf0] }
 0x2d0   :  { %2538 = vst.msk [vmem:[#allocation2 + $0xf0] sm:$0xf] %vm1853_vm0, %v1794_v62  ;;  %v4722_v62 = vld [vmem:[%s8137_s0 + $0x2c0] sm:$0xf] }
 0x2d1   :  { %2317 = vst.msk [vmem:[#allocation2 + $0x84] sm:$0xf] %vm1875_vm2, %v2088_v58  ;;  %v1453_v32 = vadd.f32 %v1452_v6, %v1124_v27  ;;  %1162 = vmatmul.bf16.gmra.mxu0 %v4715_v24  ;;  %v2080_v8 = vpop.permute.xlu1 %2079  ;;  %v5666_v24 = vld [vmem:[%s8137_s0 + $0x2c4] sm:$0xf0] }
 0x2d2   :  { %1491 = vmatmul.bf16.gmra.mxu1 %v4719_v30  ;;  %2084 = vst.msk [vmem:[#allocation2 + $0x3c] sm:$0xf] %vm1864_vm1, %v2080_v8  ;;  %v5733_v51 = vld [vmem:[#allocation2 + $0x64] sm:$0xf] }
 0x2d3   :  { %v1667_v38 = vmax.f32 %v1453_v32, 0.0  ;;  %2316 = vst.msk [vmem:[#allocation2 + $0x94] sm:$0xf] %vm1864_vm1, %v2080_v8  ;;  %v4999_v3 = vor.u32 %v5733_v51, %v4996_v34  ;;  %v5665_v30 = vld [vmem:[%s8137_s0 + $0x2c4] sm:$0xf]  ;;  %v4723_v32 = vor.u32 %v5666_v24, %v4722_v62 }
 0x2d4   :  { %v4727_v8 = vor.u32 %v5665_v30, %v4724_v40 }
 0x2d5   :  { %v1795_v61 = vpack.c.bf16 %v1667_v38, %v1667_v38  ;;  %3242 = vmatmul.bf16.gmra.mxu3 %v4999_v3 }
 0x2d6   :  { %v1125_v7 = vpop.f32.mrf.mxu0 }
 0x2d7   :  { %v1454_v23 = vpop.f32.mrf.mxu1  ;;  %v1126_v44 = vadd.f32 %v7083_v18, %v1125_v7  ;;  %2265 = vrot.lane.b32.xlu1 %v1795_v61, %s5908_s19  ;;  %2323 = vrot.lane.b32.xlu0 %v1795_v61, %s5906_s24 }
 0x2d9   :  { %v1455_v58 = vadd.f32 %v1454_v23, %v1126_v44  ;;  %v2100_v7 = vpop.permute.xlu2 %2099 }
 0x2db   :  { %v1668_v6 = vmax.f32 %v1455_v58, 0.0 }
 0x2dd   :  { %v1796_v27 = vpack.c.bf16 %v1668_v6, %v1668_v6 }
 0x2de   :  { %v1128_v51 = vpop.f32.mrf.mxu0 }
 0x2df   :  { %v1457_v34 = vpop.f32.mrf.mxu1  ;;  %v1129_v38 = vadd.f32 %v7083_v18, %v1128_v51  ;;  %2267 = vrot.lane.b32.xlu2 %v1796_v27, %s5908_s19  ;;  %2325 = vrot.lane.b32.xlu1 %v1796_v27, %s5906_s24  ;;  %v4730_v27 = vld [vmem:[%s8137_s0 + $0x2d0] sm:$0xf]  ;;  %v4732_v51 = vld [vmem:[%s8137_s0 + $0x2d8] sm:$0xf0] }
 0x2e1   :  { %v1458_v3 = vadd.f32 %v1457_v34, %v1129_v38  ;;  %1167 = vmatmul.bf16.gmra.mxu0 %v4723_v32  ;;  %v2090_v61 = vpop.permute.xlu0 %2089  ;;  %v5668_v32 = vld [vmem:[%s8137_s0 + $0x2d4] sm:$0xf0]  ;;  %v2208_v38 = vpop.permute.xlu2 %2207 }
 0x2e2   :  { %1496 = vmatmul.bf16.gmra.mxu1 %v4727_v8  ;;  %2094 = vst.msk [vmem:[#allocation2 + $0x3c] sm:$0xf] %vm1875_vm2, %v2090_v61  ;;  %v5667_v8 = vld [vmem:[%s8137_s0 + $0x2d4] sm:$0xf] }
 0x2e3   :  { %v1669_v23 = vmax.f32 %v1458_v3, 0.0  ;;  %2104 = vst.msk [vmem:[#allocation2 + $0x3c] sm:$0xf] %vm1886_vm3, %v2100_v7 }
 0x2e4   :  { %2318 = vst.msk [vmem:[#allocation2 + $0x94] sm:$0xf] %vm1875_vm2, %v2090_v61  ;;  %v4731_v61 = vor.u32 %v5668_v32, %v4730_v27 }
 0x2e5   :  { %v1797_v44 = vpack.c.bf16 %v1669_v23, %v1669_v23  ;;  %2320 = vst.msk [vmem:[#allocation2 + $0x94] sm:$0xf] %vm1886_vm3, %v2100_v7  ;;  %v4735_v7 = vor.u32 %v5667_v8, %v4732_v51 }
 0x2e6   :  { %v1130_v58 = vpop.f32.mrf.mxu0 }
 0x2e7   :  { %v1459_v62 = vpop.f32.mrf.mxu1  ;;  %2397 = vst.msk [vmem:[#allocation2 + $0xa8] sm:$0xf] %vm1853_vm0, %v1797_v44  ;;  %v1131_v24 = vadd.f32 %v7083_v18, %v1130_v58  ;;  %2333 = vrot.lane.b32.xlu2 %v1797_v44, %s5907_s21 }
 0x2e8   :  { %2613 = vst.msk [vmem:[#allocation2 + $0x100] sm:$0xf] %vm1853_vm0, %v1797_v44 }
 0x2e9   :  { %v1460_v30 = vadd.f32 %v1459_v62, %v1131_v24  ;;  %v2098_v40 = vpop.permute.xlu1 %2097  ;;  %v2198_v6 = vpop.permute.xlu0 %2197 }
 0x2ea   :  { %2103 = vst.msk [vmem:[#allocation2 + $0x2c] sm:$0xf] %vm1886_vm3, %v2098_v40 }
 0x2eb   :  { %v1670_v34 = vmax.f32 %v1460_v30, 0.0  ;;  %2319 = vst.msk [vmem:[#allocation2 + $0x84] sm:$0xf] %vm1886_vm3, %v2098_v40 }
 0x2ec   :  { %2203 = vst.msk [vmem:[#allocation2 + $0x4c] sm:$0xf] %vm1864_vm1, %v2198_v6  ;;  %v5012_v40 = vld [vmem:[#allocation2 + $0x90] sm:$0xf0] }
 0x2ed   :  { %v1798_v3 = vpack.c.bf16 %v1670_v34, %v1670_v34  ;;  %2391 = vst.msk [vmem:[#allocation2 + $0xa4] sm:$0xf] %vm1864_vm1, %v2198_v6 }
 0x2ee   :  { %2213 = vst.msk [vmem:[#allocation2 + $0x4c] sm:$0xf] %vm1875_vm2, %v2208_v38  ;;  %v1133_v23 = vpop.f32.mrf.mxu0 }
 0x2ef   :  { %v1462_v44 = vpop.f32.mrf.mxu1  ;;  %2398 = vst.msk [vmem:[#allocation2 + $0xb8] sm:$0xf] %vm1853_vm0, %v1798_v3  ;;  %v1134_v58 = vadd.f32 %v7083_v18, %v1133_v23  ;;  %2335 = vrot.lane.b32.xlu0 %v1798_v3, %s5907_s21 }
 0x2f0   :  { %2614 = vst.msk [vmem:[#allocation2 + $0x110] sm:$0xf] %vm1853_vm0, %v1798_v3 }
 0x2f1   :  { %2393 = vst.msk [vmem:[#allocation2 + $0xa4] sm:$0xf] %vm1875_vm2, %v2208_v38  ;;  %v1463_v62 = vadd.f32 %v1462_v44, %v1134_v58  ;;  %1172 = vmatmul.bf16.gmra.mxu0 %v4731_v61  ;;  %v2200_v24 = vpop.permute.xlu1 %2199 }
 0x2f2   :  { %1501 = vmatmul.bf16.gmra.mxu1 %v4735_v7  ;;  %2204 = vst.msk [vmem:[#allocation2 + $0x5c] sm:$0xf] %vm1864_vm1, %v2200_v24  ;;  %v5737_v30 = vld [vmem:[#allocation2 + $0x84] sm:$0xf] }
 0x2f3   :  { %v1671_v6 = vmax.f32 %v1463_v62, 0.0  ;;  %2392 = vst.msk [vmem:[#allocation2 + $0xb4] sm:$0xf] %vm1864_vm1, %v2200_v24  ;;  %v5015_v27 = vor.u32 %v5737_v30, %v5012_v40  ;;  %v1201_v40 = vadd.f32 %v7083_v18, %v6602_v37 }
 0x2f5   :  { %v1799_v32 = vpack.c.bf16 %v1671_v6, %v1671_v6  ;;  %3247 = vmatmul.bf16.gmra.mxu3 %v5015_v27 }
 0x2f6   :  { %v1135_v8 = vpop.f32.mrf.mxu0 }
 0x2f7   :  { %v1464_v51 = vpop.f32.mrf.mxu1  ;;  %v1136_v34 = vadd.f32 %v7083_v18, %v1135_v8  ;;  %2343 = vrot.lane.b32.xlu1 %v1799_v32, %s5908_s19  ;;  %2399 = vrot.lane.b32.xlu0 %v1799_v32, %s5906_s24 }
 0x2f9   :  { %v1465_v38 = vadd.f32 %v1464_v51, %v1136_v34  ;;  %v2220_v24 = vpop.permute.xlu2 %2219  ;;  %v1530_v51 = vadd.f32 %v6456_v60, %v1201_v40 }
 0x2fb   :  { %v1672_v3 = vmax.f32 %v1465_v38, 0.0  ;;  %v1698_v37 = vmax.f32 %v1530_v51, 0.0 }
 0x2fd   :  { %v1800_v61 = vpack.c.bf16 %v1672_v3, %v1672_v3 }
 0x2fe   :  { %v1138_v7 = vpop.f32.mrf.mxu0 }
 0x2ff   :  { %v1467_v23 = vpop.f32.mrf.mxu1  ;;  %v1139_v44 = vadd.f32 %v7083_v18, %v1138_v7  ;;  %2345 = vrot.lane.b32.xlu2 %v1800_v61, %s5908_s19  ;;  %2401 = vrot.lane.b32.xlu1 %v1800_v61, %s5906_s24 }
 0x301   :  { %v1468_v58 = vadd.f32 %v1467_v23, %v1139_v44  ;;  %v2210_v62 = vpop.permute.xlu0 %2209 }
 0x302   :  { %2214 = vst.msk [vmem:[#allocation2 + $0x5c] sm:$0xf] %vm1875_vm2, %v2210_v62 }
 0x303   :  { %v1673_v30 = vmax.f32 %v1468_v58, 0.0  ;;  %2224 = vst.msk [vmem:[#allocation2 + $0x5c] sm:$0xf] %vm1886_vm3, %v2220_v24  ;;  %v7348_v58 = vpack.c.bf16 %v1698_v37, %v1698_v37 }
 0x304   :  { %2394 = vst.msk [vmem:[#allocation2 + $0xb4] sm:$0xf] %vm1875_vm2, %v2210_v62 }
 0x305   :  { %v1801_v6 = vpack.c.bf16 %v1673_v30, %v1673_v30  ;;  %2396 = vst.msk [vmem:[#allocation2 + $0xb4] sm:$0xf] %vm1886_vm3, %v2220_v24 }
 0x306   :  { %v1140_v27 = vpop.f32.mrf.mxu0  ;;  %2554 = vst.msk [vmem:[#allocation2 + $0xf8] sm:$0xf] %vm1853_vm0, %v7348_v58 }
 0x307   :  { %v1469_v32 = vpop.f32.mrf.mxu1  ;;  %v1141_v8 = vadd.f32 %v7083_v18, %v1140_v27  ;;  %2409 = vrot.lane.b32.xlu2 %v1801_v6, %s5907_s21 }
 0x309   :  { %v1470_v34 = vadd.f32 %v1469_v32, %v1141_v8  ;;  %v2218_v38 = vpop.permute.xlu1 %2217 }
 0x30a   :  { %2223 = vst.msk [vmem:[#allocation2 + $0x4c] sm:$0xf] %vm1886_vm3, %v2218_v38 }
 0x30b   :  { %v1674_v3 = vmax.f32 %v1470_v34, 0.0  ;;  %2395 = vst.msk [vmem:[#allocation2 + $0xa4] sm:$0xf] %vm1886_vm3, %v2218_v38 }
 0x30c   :  { %v5028_v60 = vld [vmem:[#allocation2 + $0xb0] sm:$0xf0] }
 0x30d   :  { %v1802_v61 = vpack.c.bf16 %v1674_v3, %v1674_v3 }
 0x30e   :  { %v1143_v7 = vpop.f32.mrf.mxu0 }
 0x30f   :  { %v1472_v23 = vpop.f32.mrf.mxu1  ;;  %v1144_v44 = vadd.f32 %v7083_v18, %v1143_v7  ;;  %2411 = vrot.lane.b32.xlu0 %v1802_v61, %s5907_s21 }
 0x311   :  { %v1473_v62 = vadd.f32 %v1472_v23, %v1144_v44  ;;  %v1211_v44 = vadd.f32 %v7083_v18, %v6677_v63 }
 0x312   :  { %v5741_v24 = vld [vmem:[#allocation2 + $0xa4] sm:$0xf] }
 0x313   :  { %v1675_v30 = vmax.f32 %v1473_v62, 0.0  ;;  %v5031_v40 = vor.u32 %v5741_v24, %v5028_v60 }
 0x315   :  { %v1803_v6 = vpack.c.bf16 %v1675_v30, %v1675_v30  ;;  %3252 = vmatmul.bf16.gmra.mxu3 %v5031_v40  ;;  %v1540_v40 = vadd.f32 %v6567_v56, %v1211_v44 }
 0x316   :  { %v1145_v27 = vpop.f32.mrf.mxu0 }
 0x317   :  { %v1474_v32 = vpop.f32.mrf.mxu1  ;;  %v1146_v8 = vadd.f32 %v7083_v18, %v1145_v27  ;;  %2419 = vrot.lane.b32.xlu1 %v1803_v6, %s5908_s19  ;;  %v1702_v63 = vmax.f32 %v1540_v40, 0.0 }
 0x319   :  { %v1475_v51 = vadd.f32 %v1474_v32, %v1146_v8 }
 0x31b   :  { %v1676_v34 = vmax.f32 %v1475_v51, 0.0 }
 0x31d   :  { %v1804_v38 = vpack.c.bf16 %v1676_v34, %v1676_v34 }
 0x31e   :  { %v1148_v3 = vpop.f32.mrf.mxu0 }
 0x31f   :  { %v1477_v37 = vpop.f32.mrf.mxu1  ;;  %v1149_v61 = vadd.f32 %v7083_v18, %v1148_v3  ;;  %2421 = vrot.lane.b32.xlu2 %v1804_v38, %s5908_s19  ;;  %v7369_v3 = vpack.c.bf16 %v1702_v63, %v1702_v63 }
 0x321   :  { %v1478_v7 = vadd.f32 %v1477_v37, %v1149_v61  ;;  %v2256_v32 = vpop.permute.xlu2 %2255  ;;  %2630 = vst.msk [vmem:[#allocation2 + $0x118] sm:$0xf] %vm1853_vm0, %v7369_v3 }
 0x323   :  { %v1677_v23 = vmax.f32 %v1478_v7, 0.0 }
 0x325   :  { %v1805_v62 = vpack.c.bf16 %v1677_v23, %v1677_v23 }
 0x326   :  { %v1150_v24 = vpop.f32.mrf.mxu0 }
 0x327   :  { %v1479_v60 = vpop.f32.mrf.mxu1  ;;  %2273 = vst.msk [vmem:[#allocation2 + $0x6c] sm:$0xf] %vm1853_vm0, %v1805_v62  ;;  %v1151_v30 = vadd.f32 %v7083_v18, %v1150_v24 }
 0x328   :  { %2465 = vst.msk [vmem:[#allocation2 + $0xc4] sm:$0xf] %vm1853_vm0, %v1805_v62 }
 0x329   :  { %v1480_v6 = vadd.f32 %v1479_v60, %v1151_v30  ;;  %v2246_v27 = vpop.permute.xlu0 %2245 }
 0x32a   :  { %2251 = vst.msk [vmem:[#allocation2 + $0x68] sm:$0xf] %vm1864_vm1, %v2246_v27 }
 0x32b   :  { %v1678_v8 = vmax.f32 %v1480_v6, 0.0  ;;  %2459 = vst.msk [vmem:[#allocation2 + $0xc0] sm:$0xf] %vm1864_vm1, %v2246_v27 }
 0x32c   :  { %2261 = vst.msk [vmem:[#allocation2 + $0x68] sm:$0xf] %vm1875_vm2, %v2256_v32 }
 0x32d   :  { %v1806_v51 = vpack.c.bf16 %v1678_v8, %v1678_v8  ;;  %2461 = vst.msk [vmem:[#allocation2 + $0xc0] sm:$0xf] %vm1875_vm2, %v2256_v32 }
 0x32e   :  { %v1153_v34 = vpop.f32.mrf.mxu0 }
 0x32f   :  { %v1482_v38 = vpop.f32.mrf.mxu1  ;;  %2274 = vst.msk [vmem:[#allocation2 + $0x7c] sm:$0xf] %vm1853_vm0, %v1806_v51  ;;  %v1154_v56 = vadd.f32 %v7083_v18, %v1153_v34 }
 0x330   :  { %2466 = vst.msk [vmem:[#allocation2 + $0xd4] sm:$0xf] %vm1853_vm0, %v1806_v51 }
 0x331   :  { %v1483_v37 = vadd.f32 %v1482_v38, %v1154_v56  ;;  %v2248_v61 = vpop.permute.xlu1 %2247 }
 0x332   :  { %2252 = vst.msk [vmem:[#allocation2 + $0x78] sm:$0xf] %vm1864_vm1, %v2248_v61 }
 0x333   :  { %v1679_v7 = vmax.f32 %v1483_v37, 0.0  ;;  %2460 = vst.msk [vmem:[#allocation2 + $0xd0] sm:$0xf] %vm1864_vm1, %v2248_v61 }
 0x335   :  { %v1807_v23 = vpack.c.bf16 %v1679_v7, %v1679_v7 }
 0x336   :  { %v1155_v44 = vpop.f32.mrf.mxu0 }
 0x337   :  { %v1484_v62 = vpop.f32.mrf.mxu1  ;;  %v1156_v24 = vadd.f32 %v7083_v18, %v1155_v44  ;;  %2277 = vrot.lane.b32.xlu0 %v1807_v23, %s5906_s24 }
 0x339   :  { %v1485_v60 = vadd.f32 %v1484_v62, %v1156_v24  ;;  %v2268_v51 = vpop.permute.xlu2 %2267  ;;  %v7389_v24 = vpop.f32.mrf.mxu2 }
 0x33b   :  { %v1680_v30 = vmax.f32 %v1485_v60, 0.0 }
 0x33d   :  { %v1808_v40 = vpack.c.bf16 %v1680_v30, %v1680_v30 }
 0x33e   :  { %v1158_v6 = vpop.f32.mrf.mxu0 }
 0x33f   :  { %v1487_v27 = vpop.f32.mrf.mxu1  ;;  %v1159_v32 = vadd.f32 %v7083_v18, %v1158_v6  ;;  %2279 = vrot.lane.b32.xlu1 %v1808_v40, %s5906_s24 }
 0x341   :  { %v1488_v8 = vadd.f32 %v1487_v27, %v1159_v32  ;;  %v2258_v63 = vpop.permute.xlu0 %2257  ;;  %v2334_v60 = vpop.permute.xlu2 %2333 }
 0x342   :  { %2262 = vst.msk [vmem:[#allocation2 + $0x78] sm:$0xf] %vm1875_vm2, %v2258_v63  ;;  %v7397_v32 = vpop.f32.mrf.mxu3 }
 0x343   :  { %v1681_v34 = vmax.f32 %v1488_v8, 0.0  ;;  %2272 = vst.msk [vmem:[#allocation2 + $0x78] sm:$0xf] %vm1886_vm3, %v2268_v51 }
 0x344   :  { %2462 = vst.msk [vmem:[#allocation2 + $0xd0] sm:$0xf] %vm1875_vm2, %v2258_v63 }
 0x345   :  { %v1809_v38 = vpack.c.bf16 %v1681_v34, %v1681_v34  ;;  %2464 = vst.msk [vmem:[#allocation2 + $0xd0] sm:$0xf] %vm1886_vm3, %v2268_v51 }
 0x346   :  { %v1160_v56 = vpop.f32.mrf.mxu0 }
 0x347   :  { %v1489_v37 = vpop.f32.mrf.mxu1  ;;  %2351 = vst.msk [vmem:[#allocation2 + $0x8c] sm:$0xf] %vm1853_vm0, %v1809_v38  ;;  %v1161_v61 = vadd.f32 %v7083_v18, %v1160_v56  ;;  %2287 = vrot.lane.b32.xlu2 %v1809_v38, %s5907_s21 }
 0x348   :  { %2545 = vst.msk [vmem:[#allocation2 + $0xe4] sm:$0xf] %vm1853_vm0, %v1809_v38 }
 0x349   :  { %v1490_v7 = vadd.f32 %v1489_v37, %v1161_v61  ;;  %v2266_v23 = vpop.permute.xlu1 %2265  ;;  %v2324_v44 = vpop.permute.xlu0 %2323 }
 0x34a   :  { %2271 = vst.msk [vmem:[#allocation2 + $0x68] sm:$0xf] %vm1886_vm3, %v2266_v23  ;;  %v3189_v37 = vpop.f32.mrf.mxu2 }
 0x34b   :  { %v1682_v62 = vmax.f32 %v1490_v7, 0.0  ;;  %2463 = vst.msk [vmem:[#allocation2 + $0xc0] sm:$0xf] %vm1886_vm3, %v2266_v23 }
 0x34c   :  { %2329 = vst.msk [vmem:[#allocation2 + $0x88] sm:$0xf] %vm1864_vm1, %v2324_v44  ;;  %v5747_v34 = vld [vmem:[#allocation2 + $0xcc] sm:$0xf0] }
 0x34d   :  { %v1810_v30 = vpack.c.bf16 %v1682_v62, %v1682_v62  ;;  %2539 = vst.msk [vmem:[#allocation2 + $0xe0] sm:$0xf] %vm1864_vm1, %v2324_v44  ;;  %v3190_v44 = vadd.f32 %v7074_v31, %v3189_v37 }
 0x34e   :  { %2339 = vst.msk [vmem:[#allocation2 + $0x88] sm:$0xf] %vm1875_vm2, %v2334_v60  ;;  %v1163_v40 = vpop.f32.mrf.mxu0 }
 0x34f   :  { %v1492_v6 = vpop.f32.mrf.mxu1  ;;  %2352 = vst.msk [vmem:[#allocation2 + $0x9c] sm:$0xf] %vm1853_vm0, %v1810_v30  ;;  %v1164_v27 = vadd.f32 %v7083_v18, %v1163_v40  ;;  %2289 = vrot.lane.b32.xlu0 %v1810_v30, %s5907_s21 }
 0x350   :  { %2546 = vst.msk [vmem:[#allocation2 + $0xf4] sm:$0xf] %vm1853_vm0, %v1810_v30 }
 0x351   :  { %2541 = vst.msk [vmem:[#allocation2 + $0xe0] sm:$0xf] %vm1875_vm2, %v2334_v60  ;;  %v1493_v8 = vadd.f32 %v1492_v6, %v1164_v27  ;;  %v2326_v63 = vpop.permute.xlu1 %2325 }
 0x352   :  { %2330 = vst.msk [vmem:[#allocation2 + $0x98] sm:$0xf] %vm1864_vm1, %v2326_v63  ;;  %v5042_v51 = vld [vmem:[#allocation2 + $0xc0] sm:$0xf] }
 0x353   :  { %v1683_v38 = vmax.f32 %v1493_v8, 0.0  ;;  %2540 = vst.msk [vmem:[#allocation2 + $0xf0] sm:$0xf] %vm1864_vm1, %v2326_v63  ;;  %v5043_v56 = vor.u32 %v5747_v34, %v5042_v51 }
 0x355   :  { %v1811_v61 = vpack.c.bf16 %v1683_v38, %v1683_v38  ;;  %3203 = vmatmul.bf16.gmra.mxu2 %v5043_v56 }
 0x356   :  { %v1165_v7 = vpop.f32.mrf.mxu0 }
 0x357   :  { %v1494_v23 = vpop.f32.mrf.mxu1  ;;  %v1166_v62 = vadd.f32 %v7083_v18, %v1165_v7  ;;  %2297 = vrot.lane.b32.xlu1 %v1811_v61, %s5908_s19  ;;  %2353 = vrot.lane.b32.xlu0 %v1811_v61, %s5906_s24  ;;  %v5788_v61 = vld [vmem:[%s8138_s3 + $0xf8] sm:$0xff] }
 0x358   :  { %v3243_v60 = vpop.f32.mrf.mxu3  ;;  %3327 = vmatpush.bf16.msra.mxu3 %v5788_v61  ;;  %v5777_v61 = vld [vmem:[%s8138_s3 + $0xa0] sm:$0xff] }
 0x359   :  { %v1495_v30 = vadd.f32 %v1494_v23, %v1166_v62  ;;  %v7407_v40 = vadd.f32 %v3243_v60, %v3190_v44  ;;  %v2346_v38 = vpop.permute.xlu2 %2345  ;;  %v7426_v44 = vld [vmem:[%s8136_s2] ss:$0 sm:$0xff]  ;;  %v5779_v60 = vld [vmem:[%s8138_s3 + $0xb0] sm:$0xff] }
 0x35b   :  { %v1684_v6 = vmax.f32 %v1495_v30, 0.0 }
 0x35d   :  { %v1812_v27 = vpack.c.bf16 %v1684_v6, %v1684_v6 }
 0x35e   :  { %v1168_v8 = vpop.f32.mrf.mxu0 }
 0x35f   :  { %v1497_v63 = vpop.f32.mrf.mxu1  ;;  %v1169_v51 = vadd.f32 %v7083_v18, %v1168_v8  ;;  %2299 = vrot.lane.b32.xlu2 %v1812_v27, %s5908_s19  ;;  %2355 = vrot.lane.b32.xlu1 %v1812_v27, %s5906_s24  ;;  %v5780_v18 = vld [vmem:[%s8138_s3 + $0xb8] sm:$0xff] }
 0x360   :  { %3273 = vmatpush.bf16.msra.mxu2 %v5780_v18  ;;  %v7447_v18 = vpop.f32.mrf.mxu3 }
 0x361   :  { %v1498_v31 = vadd.f32 %v1497_v63, %v1169_v51  ;;  %v2336_v34 = vpop.permute.xlu0 %2335  ;;  %v5778_v63 = vld [vmem:[%s8138_s3 + $0xa8] sm:$0xff]  ;;  %v7439_v51 = vpop.f32.mrf.mxu2 }
 0x362   :  { %2340 = vst.msk [vmem:[#allocation2 + $0x98] sm:$0xf] %vm1875_vm2, %v2336_v34 }
 0x363   :  { %v1685_v56 = vmax.f32 %v1498_v31, 0.0  ;;  %2350 = vst.msk [vmem:[#allocation2 + $0x98] sm:$0xf] %vm1886_vm3, %v2346_v38  ;;  %v2410_v31 = vpop.permute.xlu2 %2409 }
 0x364   :  { %2542 = vst.msk [vmem:[#allocation2 + $0xf0] sm:$0xf] %vm1875_vm2, %v2336_v34  ;;  %3274 = vmatpush.bf16.msra.mxu2 %v5779_v60 }
 0x365   :  { %v1813_v37 = vpack.c.bf16 %v1685_v56, %v1685_v56  ;;  %2544 = vst.msk [vmem:[#allocation2 + $0xf0] sm:$0xf] %vm1886_vm3, %v2346_v38 }
 0x366   :  { %v1170_v7 = vpop.f32.mrf.mxu0 }
 0x367   :  { %v1499_v23 = vpop.f32.mrf.mxu1  ;;  %2427 = vst.msk [vmem:[#allocation2 + $0xac] sm:$0xf] %vm1853_vm0, %v1813_v37  ;;  %v1171_v62 = vadd.f32 %v7426_v44, %v1170_v7  ;;  %2363 = vrot.lane.b32.xlu2 %v1813_v37, %s5907_s21 }
 0x368   :  { %2621 = vst.msk [vmem:[#allocation2 + $0x104] sm:$0xf] %vm1853_vm0, %v1813_v37  ;;  %3275 = vmatpush.bf16.msra.mxu2 %v5778_v63 }
 0x369   :  { %v1500_v30 = vadd.f32 %v1499_v23, %v1171_v62  ;;  %v2344_v6 = vpop.permute.xlu1 %2343  ;;  %v2400_v27 = vpop.permute.xlu0 %2399  ;;  %v1181_v62 = vadd.f32 %v7426_v44, %v6460_v5  ;;  %v5787_v5 = vld [vmem:[%s8138_s3 + $0xf0] sm:$0xff] }
 0x36a   :  { %2349 = vst.msk [vmem:[#allocation2 + $0x88] sm:$0xf] %vm1886_vm3, %v2344_v6  ;;  %v3194_v63 = vpop.f32.mrf.mxu2  ;;  %3328 = vmatpush.bf16.msra.mxu3 %v5787_v5 }
 0x36b   :  { %v1686_v8 = vmax.f32 %v1500_v30, 0.0  ;;  %2543 = vst.msk [vmem:[#allocation2 + $0xe0] sm:$0xf] %vm1886_vm3, %v2344_v6  ;;  %v1241_v6 = vadd.f32 %v7426_v44, %v6876_v47 }
 0x36c   :  { %2405 = vst.msk [vmem:[#allocation2 + $0xa8] sm:$0xf] %vm1864_vm1, %v2400_v27  ;;  %v5751_v30 = vld [vmem:[#allocation2 + $0xec] sm:$0xf0]  ;;  %3276 = vmatpush.bf16.msra.mxu2 %v5777_v61 }
 0x36d   :  { %v1814_v34 = vpack.c.bf16 %v1686_v8, %v1686_v8  ;;  %2615 = vst.msk [vmem:[#allocation2 + $0x100] sm:$0xf] %vm1864_vm1, %v2400_v27  ;;  %v1570_v47 = vadd.f32 %v6870_v22, %v1241_v6  ;;  %v1184_v22 = vadd.f32 %v7426_v44, %v6476_v19  ;;  %v5775_v6 = vld [vmem:[%s8138_s3 + $0x90] sm:$0xff] }
 0x36e   :  { %2415 = vst.msk [vmem:[#allocation2 + $0xa8] sm:$0xf] %vm1875_vm2, %v2410_v31  ;;  %v1173_v38 = vpop.f32.mrf.mxu0 }
 0x36f   :  { %v1502_v56 = vpop.f32.mrf.mxu1  ;;  %2428 = vst.msk [vmem:[#allocation2 + $0xbc] sm:$0xf] %vm1853_vm0, %v1814_v34  ;;  %v1174_v37 = vadd.f32 %v7426_v44, %v1173_v38  ;;  %2365 = vrot.lane.b32.xlu0 %v1814_v34, %s5907_s21  ;;  %v1510_v38 = vadd.f32 %v6276_v43, %v1181_v62  ;;  %v1179_v43 = vadd.f32 %v7426_v44, %v6430_v48  ;;  %v5774_v48 = vld [vmem:[%s8138_s3 + $0x88] sm:$0xff] }
 0x370   :  { %2622 = vst.msk [vmem:[#allocation2 + $0x114] sm:$0xf] %vm1853_vm0, %v1814_v34 }
 0x371   :  { %2617 = vst.msk [vmem:[#allocation2 + $0x100] sm:$0xf] %vm1875_vm2, %v2410_v31  ;;  %v1503_v7 = vadd.f32 %v1502_v56, %v1174_v37  ;;  %v2402_v23 = vpop.permute.xlu1 %2401  ;;  %v5776_v31 = vld [vmem:[%s8138_s3 + $0x98] sm:$0xff]  ;;  %v7471_v37 = vld [vmem:[%s8139_s4] ss:$0 sm:$0xff]  ;;  %v1508_v19 = vadd.f32 %v6253_v28, %v1179_v43  ;;  %v1186_v28 = vadd.f32 %v7426_v44, %v6504_v42 }
 0x372   :  { %2406 = vst.msk [vmem:[#allocation2 + $0xb8] sm:$0xf] %vm1864_vm1, %v2402_v23  ;;  %v5058_v60 = vld [vmem:[#allocation2 + $0xe0] sm:$0xf]  ;;  %v3195_v61 = vadd.f32 %v7471_v37, %v3194_v63  ;;  %3277 = vmatpush.bf16.msra.mxu2 %v5776_v31  ;;  %v1714_v63 = vmax.f32 %v1570_v47, 0.0  ;;  %v1513_v31 = vadd.f32 %v6287_v59, %v1184_v22  ;;  %v1196_v59 = vadd.f32 %v7426_v44, %v6573_v1 }
 0x373   :  { %v1687_v27 = vmax.f32 %v1503_v7, 0.0  ;;  %2616 = vst.msk [vmem:[#allocation2 + $0x110] sm:$0xf] %vm1864_vm1, %v2402_v23  ;;  %v5059_v8 = vor.u32 %v5751_v30, %v5058_v60  ;;  %v1515_v1 = vadd.f32 %v6313_v12, %v1186_v28 }
 0x374   :  { %v1691_v47 = vmax.f32 %v1513_v31, 0.0  ;;  %v1525_v22 = vadd.f32 %v6389_v14, %v1196_v59  ;;  %v1204_v14 = vadd.f32 %v7426_v44, %v6619_v57 }
 0x375   :  { %v1815_v34 = vpack.c.bf16 %v1687_v27, %v1687_v27  ;;  %3208 = vmatmul.bf16.gmra.mxu2 %v5059_v8  ;;  %v1690_v27 = vmax.f32 %v1510_v38, 0.0  ;;  %v1194_v8 = vadd.f32 %v7426_v44, %v6550_v36  ;;  %v7496_v36 = vpack.c.bf16 %v1714_v63, %v1714_v63 }
 0x376   :  { %v1175_v56 = vpop.f32.mrf.mxu0  ;;  %3278 = vmatpush.bf16.msra.mxu2 %v5775_v6  ;;  %v1689_v38 = vmax.f32 %v1508_v19, 0.0  ;;  %v1819_v43 = vpack.c.bf16 %v1691_v47, %v1691_v47  ;;  %v1234_v6 = vadd.f32 %v7426_v44, %v6830_v54  ;;  %v1696_v12 = vmax.f32 %v1525_v22, 0.0  ;;  %v7527_v54 = vpop.f32.mrf.mxu2 }
 0x377   :  { %v1176_v7 = vadd.f32 %v7426_v44, %v1175_v56  ;;  %2373 = vrot.lane.b32.xlu1 %v1815_v34, %s5908_s19  ;;  %2429 = vrot.lane.b32.xlu0 %v1815_v34, %s5906_s24  ;;  %v1504_v23 = vpop.f32.mrf.mxu1  ;;  %v1523_v56 = vadd.f32 %v6376_v2, %v1194_v8  ;;  %2584 = vst.msk [vmem:[#allocation2 + $0xfc] sm:$0xf] %vm1853_vm0, %v7496_v36  ;;  %v5773_v2 = vld [vmem:[%s8138_s3 + $0x80] sm:$0xff]  ;;  %v1692_v8 = vmax.f32 %v1515_v1, 0.0 }
 0x378   :  { %v3248_v60 = vpop.f32.mrf.mxu3  ;;  %v1817_v42 = vpack.c.bf16 %v1689_v38, %v1689_v38  ;;  %v1824_v31 = vpack.c.bf16 %v1696_v12, %v1696_v12  ;;  %v1251_v47 = vadd.f32 %v7426_v44, %v6960_v53 }
 0x379   :  { %v1505_v62 = vadd.f32 %v1504_v23, %v1176_v7  ;;  %v7481_v30 = vadd.f32 %v3248_v60, %v3195_v61  ;;  %v1818_v61 = vpack.c.bf16 %v1690_v27, %v1690_v27  ;;  %v1695_v23 = vmax.f32 %v1523_v56, 0.0  ;;  %v2422_v60 = vpop.permute.xlu2 %2421  ;;  %v5786_v27 = vld [vmem:[%s8138_s3 + $0xe8] sm:$0xff] }
 0x37a   :  { %3279 = vmatpush.bf16.msra.mxu2 %v5774_v48  ;;  %3329 = vmatpush.bf16.msra.mxu3 %v5786_v27  ;;  %v1533_v48 = vadd.f32 %v6478_v20, %v1204_v14  ;;  %v1820_v19 = vpack.c.bf16 %v1692_v8, %v1692_v8  ;;  %v4954_v27 = vld [vmem:[#allocation2 + $0x8] sm:$0xf] }
 0x37b   :  { %v1688_v34 = vmax.f32 %v1505_v62, 0.0  ;;  %v1823_v62 = vpack.c.bf16 %v1695_v23, %v1695_v23 }
 0x37c   :  { %v1699_v56 = vmax.f32 %v1533_v48, 0.0 }
 0x37d   :  { %v1816_v5 = vpack.c.bf16 %v1688_v34, %v1688_v34  ;;  %v1563_v34 = vadd.f32 %v6815_v26, %v1234_v6  ;;  %v1206_v26 = vadd.f32 %v7426_v44, %v6641_v16  ;;  %v1244_v16 = vadd.f32 %v7426_v44, %v6890_v13 }
 0x37e   :  { %3280 = vmatpush.bf16.msra.mxu2 %v5773_v2  ;;  %v1827_v2 = vpack.c.bf16 %v1699_v56, %v1699_v56 }
 0x37f   :  { %2375 = vrot.lane.b32.xlu2 %v1816_v5, %s5908_s19  ;;  %2431 = vrot.lane.b32.xlu1 %v1816_v5, %s5906_s24  ;;  %v1711_v5 = vmax.f32 %v1563_v34, 0.0  ;;  %v1535_v23 = vadd.f32 %v6512_v50, %v1206_v26  ;;  %v1573_v13 = vadd.f32 %v6887_v11, %v1244_v16  ;;  %v5724_v11 = vld [vmem:[#allocation2 + $0x14] sm:$0xf0]  ;;  %v8171_v16 = vld [vmem:[#allocation5_spill] sm:$0xff] }
 0x380   :  { %2441 = vrot.lane.b32.xlu0 %v1818_v61, %s5907_s21  ;;  %v7532_v57 = vpop.f32.mrf.mxu3  ;;  %v1236_v61 = vadd.f32 %v7426_v44, %v6851_v41  ;;  %v4955_v14 = vor.u32 %v5724_v11, %v4954_v27 }
 0x381   :  { %v2412_v7 = vpop.permute.xlu0 %2411  ;;  %v1839_v59 = vpack.c.bf16 %v1711_v5, %v1711_v5 }
 0x382   :  { %2416 = vst.msk [vmem:[#allocation2 + $0xb8] sm:$0xf] %vm1875_vm2, %v2412_v7 }
 0x383   :  { %2426 = vst.msk [vmem:[#allocation2 + $0xb8] sm:$0xf] %vm1886_vm3, %v2422_v60 }
 0x384   :  { %2618 = vst.msk [vmem:[#allocation2 + $0x110] sm:$0xf] %vm1875_vm2, %v2412_v7  ;;  %v3199_v7 = vpop.f32.mrf.mxu2 }
 0x385   :  { %2620 = vst.msk [vmem:[#allocation2 + $0x110] sm:$0xf] %vm1886_vm3, %v2422_v60  ;;  %v1580_v60 = vadd.f32 %v6956_v9, %v1251_v47  ;;  %v3200_v41 = vadd.f32 %v7471_v37, %v3199_v7 }
 0x387   :  { %2439 = vrot.lane.b32.xlu2 %v1817_v42, %s5907_s21  ;;  %2449 = vrot.lane.b32.xlu1 %v1819_v43, %s5908_s19  ;;  %v1700_v42 = vmax.f32 %v1535_v23, 0.0  ;;  %v1718_v9 = vmax.f32 %v1580_v60, 0.0  ;;  %v8170_v23 = vld [vmem:[#allocation12_spill] sm:$0xff] }
 0x388   :  { %2477 = vrot.lane.b32.xlu0 %v1823_v62, %s5906_s24  ;;  %v1246_v62 = vadd.f32 %v7426_v44, %v6912_v15  ;;  %v1214_v15 = vadd.f32 %v7426_v44, %v6695_v21  ;;  %v5784_v21 = vld [vmem:[%s8138_s3 + $0xd8] sm:$0xff] }
 0x389   :  { %v2420_v63 = vpop.permute.xlu1 %2419  ;;  %v1828_v1 = vpack.c.bf16 %v1700_v42, %v1700_v42  ;;  %v1846_v6 = vpack.c.bf16 %v1718_v9, %v1718_v9 }
 0x38a   :  { %2425 = vst.msk [vmem:[#allocation2 + $0xa8] sm:$0xf] %vm1886_vm3, %v2420_v63  ;;  %v1575_v12 = vadd.f32 %v6914_v17, %v1246_v62  ;;  %v1543_v48 = vadd.f32 %v6627_v46, %v1214_v15  ;;  %v5728_v46 = vld [vmem:[#allocation2 + $0x34] sm:$0xf0]  ;;  %v5002_v15 = vld [vmem:[#allocation2 + $0x68] sm:$0xf] }
 0x38b   :  { %2619 = vst.msk [vmem:[#allocation2 + $0x100] sm:$0xf] %vm1886_vm3, %v2420_v63 }
 0x38c   :  { %v5755_v38 = vld [vmem:[#allocation2 + $0x10c] sm:$0xf0]  ;;  %2660 = vst.msk [vmem:[#allocation2 + $0x11c] sm:$0xf] %vm1853_vm0, %v1846_v6  ;;  %v1716_v63 = vmax.f32 %v1575_v12, 0.0  ;;  %v5782_v12 = vld [vmem:[%s8138_s3 + $0xc8] sm:$0xff] }
 0x38e   :  { %v1844_v17 = vpack.c.bf16 %v1716_v63, %v1716_v63 }
 0x38f   :  { %2451 = vrot.lane.b32.xlu2 %v1820_v19, %s5908_s19  ;;  %2479 = vrot.lane.b32.xlu1 %v1824_v31, %s5906_s24  ;;  %v1703_v19 = vmax.f32 %v1543_v48, 0.0  ;;  %v1216_v31 = vadd.f32 %v7426_v44, %v6714_v45 }
 0x390   :  { %2489 = vrot.lane.b32.xlu0 %v7348_v58, %s5907_s21  ;;  %v1565_v58 = vadd.f32 %v6826_v52, %v1236_v61  ;;  %v5785_v52 = vld [vmem:[%s8138_s3 + $0xe0] sm:$0xff] }
 0x391   :  { %3330 = vmatpush.bf16.msra.mxu3 %v5785_v52  ;;  %v1831_v26 = vpack.c.bf16 %v1703_v19, %v1703_v19  ;;  %v1545_v61 = vadd.f32 %v6650_v29, %v1216_v31 }
 0x392   :  { %v5074_v20 = vld [vmem:[#allocation2 + $0x100] sm:$0xf]  ;;  %v1712_v50 = vmax.f32 %v1565_v58, 0.0 }
 0x393   :  { %v5075_v28 = vor.u32 %v5755_v38, %v5074_v20  ;;  %v1704_v45 = vmax.f32 %v1545_v61, 0.0  ;;  %v5783_v20 = vld [vmem:[%s8138_s3 + $0xd0] sm:$0xff] }
 0x394   :  { %v1840_v22 = vpack.c.bf16 %v1712_v50, %v1712_v50  ;;  %v8174_v50 = vld [vmem:[#allocation9_spill] sm:$0xff] }
 0x395   :  { %3213 = vmatmul.bf16.gmra.mxu2 %v5075_v28  ;;  %3331 = vmatpush.bf16.msra.mxu3 %v5784_v21  ;;  %v1832_v29 = vpack.c.bf16 %v1704_v45, %v1704_v45  ;;  %v1224_v52 = vadd.f32 %v7426_v44, %v8174_v50  ;;  %v8180_v45 = vld [vmem:[#allocation8_spill] sm:$0xff] }
 0x397   :  { %2487 = vrot.lane.b32.xlu2 %v6612_v39, %s5907_s21  ;;  %2497 = vrot.lane.b32.xlu1 %v1827_v2, %s5908_s19  ;;  %v1715_v39 = vmax.f32 %v1573_v13, 0.0 }
 0x398   :  { %2509 = vrot.lane.b32.xlu0 %v1839_v59, %s5906_s24  ;;  %v3253_v53 = vpop.f32.mrf.mxu3  ;;  %v1221_v59 = vadd.f32 %v7426_v44, %v6753_v35  ;;  %v8172_v35 = vld [vmem:[#allocation11_spill] sm:$0xff] }
 0x399   :  { %v7552_v43 = vadd.f32 %v3253_v53, %v3200_v41  ;;  %v1843_v8 = vpack.c.bf16 %v1715_v39, %v1715_v39  ;;  %3332 = vmatpush.bf16.msra.mxu3 %v5783_v20  ;;  %v8173_v53 = vld [vmem:[#allocation7_spill] sm:$0xff]  ;;  %v8175_v39 = vld [vmem:[#allocation4_spill] sm:$0xff] }
 0x39a   :  { %v1550_v60 = vadd.f32 %v8171_v16, %v1221_v59  ;;  %v1219_v42 = vadd.f32 %v7426_v44, %v8173_v53 }
 0x39c   :  { %v1548_v62 = vadd.f32 %v8175_v39, %v1219_v42 }
 0x39d   :  { %3333 = vmatpush.bf16.msra.mxu3 %v5782_v12  ;;  %v5034_v12 = vld [vmem:[#allocation2 + $0xa8] sm:$0xf] }
 0x39f   :  { %2499 = vrot.lane.b32.xlu2 %v1828_v1, %s5908_s19  ;;  %2511 = vrot.lane.b32.xlu1 %v1840_v22, %s5906_s24 }
 0x3a0   :  { %2521 = vrot.lane.b32.xlu0 %v7496_v36, %s5907_s21 }
 0x3a1   :  { %v2288_v34 = vpop.permute.xlu2 %2287 }
 0x3a5   :  { %3281 = vmatmul.bf16.vlgmr.msra.gmra.mxu2 %v4955_v14  ;;  %v8177_v14 = vld [vmem:[#allocation16_spill] sm:$0xff] }
 0x3a6   :  { %v1261_v63 = vadd.f32 %v7426_v44, %v8177_v14 }
 0x3a7   :  { %2519 = vrot.lane.b32.xlu2 %v6880_v4, %s5907_s21  ;;  %2529 = vrot.lane.b32.xlu1 %v1843_v8, %s5908_s19  ;;  %v4970_v4 = vld [vmem:[#allocation2 + $0x28] sm:$0xf] }
 0x3a8   :  { %2555 = vrot.lane.b32.xlu0 %v1827_v2, %s5906_s24  ;;  %v4971_v56 = vor.u32 %v5728_v46, %v4970_v4  ;;  %v5736_v4 = vld [vmem:[#allocation2 + $0x74] sm:$0xf0] }
 0x3a9   :  { %v2278_v36 = vpop.permute.xlu0 %2277  ;;  %v5003_v46 = vor.u32 %v5736_v4, %v5002_v15  ;;  %v5744_v15 = vld [vmem:[#allocation2 + $0xb4] sm:$0xf0] }
 0x3aa   :  { %2283 = vst.msk [vmem:[#allocation2 + $0x6c] sm:$0xf] %vm1864_vm1, %v2278_v36 }
 0x3ab   :  { %2467 = vst.msk [vmem:[#allocation2 + $0xc4] sm:$0xf] %vm1864_vm1, %v2278_v36  ;;  %v1705_v36 = vmax.f32 %v1548_v62, 0.0 }
 0x3ac   :  { %2293 = vst.msk [vmem:[#allocation2 + $0x6c] sm:$0xf] %vm1875_vm2, %v2288_v34 }
 0x3ad   :  { %2469 = vst.msk [vmem:[#allocation2 + $0xc4] sm:$0xf] %vm1875_vm2, %v2288_v34  ;;  %v1833_v61 = vpack.c.bf16 %v1705_v36, %v1705_v36 }
 0x3af   :  { %2531 = vrot.lane.b32.xlu2 %v1844_v17, %s5908_s19  ;;  %2557 = vrot.lane.b32.xlu1 %v1828_v1, %s5906_s24  ;;  %v1706_v1 = vmax.f32 %v1550_v60, 0.0 }
 0x3b0   :  { %2567 = vrot.lane.b32.xlu0 %v7369_v3, %s5907_s21  ;;  %v1254_v3 = vadd.f32 %v7426_v44, %v6978_v33  ;;  %v1256_v33 = vadd.f32 %v7426_v44, %v6984_v0 }
 0x3b1   :  { %v2280_v5 = vpop.permute.xlu1 %2279 }
 0x3b2   :  { %2284 = vst.msk [vmem:[#allocation2 + $0x7c] sm:$0xf] %vm1864_vm1, %v2280_v5  ;;  %v1583_v38 = vadd.f32 %v6962_v55, %v1254_v3  ;;  %v5732_v55 = vld [vmem:[#allocation2 + $0x54] sm:$0xf0]  ;;  %v1585_v58 = vadd.f32 %v8170_v23, %v1256_v33  ;;  %v8184_v23 = vld [vmem:[#allocation17_spill] sm:$0xff] }
 0x3b3   :  { %2468 = vst.msk [vmem:[#allocation2 + $0xd4] sm:$0xf] %vm1864_vm1, %v2280_v5 }
 0x3b4   :  { %v1719_v47 = vmax.f32 %v1583_v38, 0.0  ;;  %v1720_v41 = vmax.f32 %v1585_v58, 0.0  ;;  %v8181_v38 = vld [vmem:[#allocation14_spill] sm:$0xff] }
 0x3b5   :  { %3286 = vmatmul.bf16.gmra.mxu2 %v4971_v56  ;;  %v8179_v56 = vld [vmem:[#allocation15_spill] sm:$0xff] }
 0x3b6   :  { %v1847_v2 = vpack.c.bf16 %v1719_v47, %v1719_v47  ;;  %v1848_v22 = vpack.c.bf16 %v1720_v41, %v1720_v41  ;;  %v8182_v47 = vld [vmem:[#allocation18_spill] sm:$0xff] }
 0x3b7   :  { %2565 = vrot.lane.b32.xlu2 %v6689_v10, %s5907_s21  ;;  %2575 = vrot.lane.b32.xlu1 %v1831_v26, %s5908_s19  ;;  %v4986_v10 = vld [vmem:[#allocation2 + $0x48] sm:$0xf]  ;;  %v1264_v33 = vadd.f32 %v7426_v44, %v8182_v47 }
 0x3b8   :  { %2585 = vrot.lane.b32.xlu0 %v1843_v8, %s5906_s24  ;;  %v4987_v0 = vor.u32 %v5732_v55, %v4986_v10  ;;  %v1834_v8 = vpack.c.bf16 %v1706_v1, %v1706_v1  ;;  %v8186_v1 = vld [vmem:[#allocation19_spill] sm:$0xff] }
 0x3b9   :  { %v2300_v7 = vpop.permute.xlu2 %2299  ;;  %v1593_v58 = vadd.f32 %v8184_v23, %v1264_v33 }
 0x3bb   :  { %v1723_v41 = vmax.f32 %v1593_v58, 0.0 }
 0x3bf   :  { %2577 = vrot.lane.b32.xlu2 %v1832_v29, %s5908_s19  ;;  %2587 = vrot.lane.b32.xlu1 %v1844_v17, %s5906_s24  ;;  %v8178_v17 = vld [vmem:[#allocation10_spill] sm:$0xff] }
 0x3c0   :  { %2597 = vrot.lane.b32.xlu0 %v1846_v6, %s5907_s21  ;;  %v8176_v6 = vld [vmem:[#allocation6_spill] sm:$0xff]  ;;  %v1226_v48 = vadd.f32 %v7426_v44, %v8178_v17 }
 0x3c1   :  { %v2290_v28 = vpop.permute.xlu0 %2289  ;;  %v1553_v27 = vadd.f32 %v8176_v6, %v1224_v52  ;;  %v2364_v11 = vpop.permute.xlu2 %2363  ;;  %v5740_v52 = vld [vmem:[#allocation2 + $0x94] sm:$0xf0] }
 0x3c2   :  { %2294 = vst.msk [vmem:[#allocation2 + $0x7c] sm:$0xf] %vm1875_vm2, %v2290_v28  ;;  %v1555_v20 = vadd.f32 %v8180_v45, %v1226_v48 }
 0x3c3   :  { %2304 = vst.msk [vmem:[#allocation2 + $0x7c] sm:$0xf] %vm1886_vm3, %v2300_v7  ;;  %v1707_v34 = vmax.f32 %v1553_v27, 0.0 }
 0x3c4   :  { %2470 = vst.msk [vmem:[#allocation2 + $0xd4] sm:$0xf] %vm1875_vm2, %v2290_v28  ;;  %v1708_v28 = vmax.f32 %v1555_v20, 0.0 }
 0x3c5   :  { %2472 = vst.msk [vmem:[#allocation2 + $0xd4] sm:$0xf] %vm1886_vm3, %v2300_v7  ;;  %3291 = vmatmul.bf16.gmra.mxu2 %v4987_v0  ;;  %v1835_v3 = vpack.c.bf16 %v1707_v34, %v1707_v34  ;;  %v8183_v7 = vld [vmem:[#allocation13_spill] sm:$0xff] }
 0x3c6   :  { %v1836_v16 = vpack.c.bf16 %v1708_v28, %v1708_v28 }
 0x3c7   :  { %2595 = vrot.lane.b32.xlu2 %v8172_v35, %s5907_s21  ;;  %2605 = vrot.lane.b32.xlu1 %v1847_v2, %s5908_s19  ;;  %v8185_v35 = vld [vmem:[#allocation20_spill] sm:$0xff] }
 0x3c8   :  { %2631 = vrot.lane.b32.xlu0 %v1831_v26, %s5906_s24  ;;  %v1590_v26 = vadd.f32 %v8179_v56, %v1261_v63  ;;  %v1266_v53 = vadd.f32 %v7426_v44, %v8185_v35 }
 0x3c9   :  { %v2298_v13 = vpop.permute.xlu1 %2297  ;;  %v2354_v9 = vpop.permute.xlu0 %2353 }
 0x3ca   :  { %2303 = vst.msk [vmem:[#allocation2 + $0x6c] sm:$0xf] %vm1886_vm3, %v2298_v13  ;;  %v1722_v10 = vmax.f32 %v1590_v26, 0.0  ;;  %v1595_v39 = vadd.f32 %v8186_v1, %v1266_v53  ;;  %v4972_v53 = vld [vmem:[#allocation2 + $0x38] sm:$0xf0] }
 0x3cb   :  { %2471 = vst.msk [vmem:[#allocation2 + $0xc4] sm:$0xf] %vm1886_vm3, %v2298_v13 }
 0x3cc   :  { %2359 = vst.msk [vmem:[#allocation2 + $0x8c] sm:$0xf] %vm1864_vm1, %v2354_v9  ;;  %v5044_v31 = vld [vmem:[#allocation2 + $0xd0] sm:$0xf0]  ;;  %v1850_v0 = vpack.c.bf16 %v1722_v10, %v1722_v10 }
 0x3cd   :  { %2547 = vst.msk [vmem:[#allocation2 + $0xe4] sm:$0xf] %vm1864_vm1, %v2354_v9  ;;  %v1851_v9 = vpack.c.bf16 %v1723_v41, %v1723_v41 }
 0x3ce   :  { %2369 = vst.msk [vmem:[#allocation2 + $0x8c] sm:$0xf] %vm1875_vm2, %v2364_v11 }
 0x3cf   :  { %2549 = vst.msk [vmem:[#allocation2 + $0xe4] sm:$0xf] %vm1875_vm2, %v2364_v11  ;;  %2607 = vrot.lane.b32.xlu2 %v1848_v22, %s5908_s19  ;;  %2633 = vrot.lane.b32.xlu1 %v1832_v29, %s5906_s24  ;;  %v1259_v29 = vadd.f32 %v7426_v44, %v8181_v38  ;;  %v5781_v44 = vld [vmem:[%s8138_s3 + $0xc0] sm:$0xff] }
 0x3d0   :  { %2643 = vrot.lane.b32.xlu0 %v1834_v8, %s5907_s21  ;;  %3334 = vmatpush.bf16.msra.mxu3 %v5781_v44 }
 0x3d1   :  { %v2356_v21 = vpop.permute.xlu1 %2355  ;;  %v1588_v55 = vadd.f32 %v8183_v7, %v1259_v29  ;;  %v5722_v29 = vld [vmem:[#allocation2 + $0xc] sm:$0xf] }
 0x3d2   :  { %2360 = vst.msk [vmem:[#allocation2 + $0x9c] sm:$0xf] %vm1864_vm1, %v2356_v21  ;;  %v5745_v19 = vld [vmem:[#allocation2 + $0xc4] sm:$0xf] }
 0x3d3   :  { %2548 = vst.msk [vmem:[#allocation2 + $0xf4] sm:$0xf] %vm1864_vm1, %v2356_v21  ;;  %v5047_v5 = vor.u32 %v5745_v19, %v5044_v31  ;;  %v1721_v60 = vmax.f32 %v1588_v55, 0.0  ;;  %v5035_v21 = vor.u32 %v5744_v15, %v5034_v12  ;;  %v4956_v55 = vld [vmem:[#allocation2 + $0x18] sm:$0xf0] }
 0x3d4   :  { %v4959_v23 = vor.u32 %v5722_v29, %v4956_v55  ;;  %v5734_v15 = vld [vmem:[#allocation2 + $0x6c] sm:$0xf] }
 0x3d5   :  { %3257 = vmatmul.bf16.gmra.mxu3 %v5047_v5  ;;  %3296 = vmatmul.bf16.gmra.mxu2 %v5003_v46  ;;  %v1849_v13 = vpack.c.bf16 %v1721_v60, %v1721_v60  ;;  %v5726_v60 = vld [vmem:[#allocation2 + $0x2c] sm:$0xf] }
 0x3d7   :  { %2641 = vrot.lane.b32.xlu2 %v1833_v61, %s5907_s21  ;;  %2651 = vrot.lane.b32.xlu1 %v1835_v3, %s5908_s19 }
 0x3d8   :  { %2661 = vrot.lane.b32.xlu0 %v1847_v2, %s5906_s24  ;;  %v5018_v2 = vld [vmem:[#allocation2 + $0x88] sm:$0xf] }
 0x3d9   :  { %v2376_v59 = vpop.permute.xlu2 %2375  ;;  %v5019_v62 = vor.u32 %v5740_v52, %v5018_v2 }
 0x3df   :  { %2653 = vrot.lane.b32.xlu2 %v1836_v16, %s5908_s19  ;;  %2663 = vrot.lane.b32.xlu1 %v1848_v22, %s5906_s24  ;;  %v1724_v22 = vmax.f32 %v1595_v39, 0.0 }
 0x3e0   :  { %2673 = vrot.lane.b32.xlu0 %v1850_v0, %s5907_s21 }
 0x3e1   :  { %v2440_v42 = vpop.permute.xlu2 %2439  ;;  %v2366_v50 = vpop.permute.xlu0 %2365  ;;  %v1852_v8 = vpack.c.bf16 %v1724_v22, %v1724_v22 }
 0x3e2   :  { %2370 = vst.msk [vmem:[#allocation2 + $0x9c] sm:$0xf] %vm1875_vm2, %v2366_v50 }
 0x3e3   :  { %2380 = vst.msk [vmem:[#allocation2 + $0x9c] sm:$0xf] %vm1886_vm3, %v2376_v59 }
 0x3e4   :  { %2550 = vst.msk [vmem:[#allocation2 + $0xf4] sm:$0xf] %vm1875_vm2, %v2366_v50 }
 0x3e5   :  { %2552 = vst.msk [vmem:[#allocation2 + $0xf4] sm:$0xf] %vm1886_vm3, %v2376_v59  ;;  %3301 = vmatmul.bf16.gmra.mxu2 %v5019_v62 }
 0x3e7   :  { %2681 = vrot.lane.b32.xlu1 %v1851_v9, %s5908_s19  ;;  %2671 = vrot.lane.b32.xlu2 %v1849_v13, %s5907_s21  ;;  %v5730_v9 = vld [vmem:[#allocation2 + $0x4c] sm:$0xf] }
 0x3e9   :  { %v2452_v6 = vpop.permute.xlu2 %2451  ;;  %v2374_v27 = vpop.permute.xlu1 %2373 }
 0x3ea   :  { %2379 = vst.msk [vmem:[#allocation2 + $0x8c] sm:$0xf] %vm1886_vm3, %v2374_v27  ;;  %v2430_v11 = vpop.permute.xlu0 %2429  ;;  %v5020_v29 = vld [vmem:[#allocation2 + $0x98] sm:$0xf0] }
 0x3eb   :  { %2551 = vst.msk [vmem:[#allocation2 + $0xe4] sm:$0xf] %vm1886_vm3, %v2374_v27 }
 0x3ec   :  { %2435 = vst.msk [vmem:[#allocation2 + $0xac] sm:$0xf] %vm1864_vm1, %v2430_v11  ;;  %v5060_v17 = vld [vmem:[#allocation2 + $0xf0] sm:$0xf0] }
 0x3ed   :  { %2623 = vst.msk [vmem:[#allocation2 + $0x104] sm:$0xf] %vm1864_vm1, %v2430_v11 }
 0x3ee   :  { %2445 = vst.msk [vmem:[#allocation2 + $0xac] sm:$0xf] %vm1875_vm2, %v2440_v42 }
 0x3ef   :  { %2625 = vst.msk [vmem:[#allocation2 + $0x104] sm:$0xf] %vm1875_vm2, %v2440_v42  ;;  %2683 = vrot.lane.b32.xlu2 %v1852_v8, %s5908_s19  ;;  %v4975_v42 = vor.u32 %v5726_v60, %v4972_v53  ;;  %v7704_v8 = vpop.f32.mrf.mxu2 }
 0x3f1   :  { %v2488_v14 = vpop.permute.xlu2 %2487  ;;  %v2432_v63 = vpop.permute.xlu1 %2431 }
 0x3f2   :  { %2436 = vst.msk [vmem:[#allocation2 + $0xbc] sm:$0xf] %vm1864_vm1, %v2432_v63  ;;  %v2442_v36 = vpop.permute.xlu0 %2441  ;;  %v5749_v34 = vld [vmem:[#allocation2 + $0xe4] sm:$0xf] }
 0x3f3   :  { %2624 = vst.msk [vmem:[#allocation2 + $0x114] sm:$0xf] %vm1864_vm1, %v2432_v63  ;;  %v5063_v48 = vor.u32 %v5749_v34, %v5060_v17 }
 0x3f4   :  { %2446 = vst.msk [vmem:[#allocation2 + $0xbc] sm:$0xf] %vm1875_vm2, %v2442_v36 }
 0x3f5   :  { %2456 = vst.msk [vmem:[#allocation2 + $0xbc] sm:$0xf] %vm1886_vm3, %v2452_v6  ;;  %3262 = vmatmul.bf16.gmra.mxu3 %v5063_v48  ;;  %3306 = vmatmul.bf16.gmra.mxu2 %v5035_v21  ;;  %v5004_v48 = vld [vmem:[#allocation2 + $0x78] sm:$0xf0] }
 0x3f6   :  { %2626 = vst.msk [vmem:[#allocation2 + $0x114] sm:$0xf] %vm1875_vm2, %v2442_v36  ;;  %v5007_v21 = vor.u32 %v5734_v15, %v5004_v48 }
 0x3f7   :  { %2628 = vst.msk [vmem:[#allocation2 + $0x114] sm:$0xf] %vm1886_vm3, %v2452_v6  ;;  %v4988_v6 = vld [vmem:[#allocation2 + $0x58] sm:$0xf0]  ;;  %v3204_v63 = vpop.f32.mrf.mxu2 }
 0x3f8   :  { %v4991_v27 = vor.u32 %v5730_v9, %v4988_v6 }
 0x3f9   :  { %v2500_v4 = vpop.permute.xlu2 %2499  ;;  %v2450_v19 = vpop.permute.xlu1 %2449 }
 0x3fa   :  { %2455 = vst.msk [vmem:[#allocation2 + $0xac] sm:$0xf] %vm1886_vm3, %v2450_v19  ;;  %v2478_v31 = vpop.permute.xlu0 %2477 }
 0x3fb   :  { %2627 = vst.msk [vmem:[#allocation2 + $0x104] sm:$0xf] %vm1886_vm3, %v2450_v19 }
 0x3fc   :  { %2483 = vst.msk [vmem:[#allocation2 + $0xc8] sm:$0xf] %vm1864_vm1, %v2478_v31 }
 0x3fd   :  { %2493 = vst.msk [vmem:[#allocation2 + $0xc8] sm:$0xf] %vm1875_vm2, %v2488_v14 }
 0x3fe   :  { %v5076_v61 = vld [vmem:[#allocation2 + $0x110] sm:$0xf0] }
 0x3ff   :  { %v7712_v31 = vpop.f32.mrf.mxu2 }
 0x401   :  { %v2520_v5 = vpop.permute.xlu2 %2519  ;;  %v2480_v46 = vpop.permute.xlu1 %2479 }
 0x402   :  { %2484 = vst.msk [vmem:[#allocation2 + $0xd8] sm:$0xf] %vm1864_vm1, %v2480_v46  ;;  %v2490_v56 = vpop.permute.xlu0 %2489  ;;  %v5753_v26 = vld [vmem:[#allocation2 + $0x104] sm:$0xf]  ;;  %v7717_v46 = vpop.f32.mrf.mxu3 }
 0x403   :  { %2494 = vst.msk [vmem:[#allocation2 + $0xd8] sm:$0xf] %vm1875_vm2, %v2490_v56  ;;  %v5079_v3 = vor.u32 %v5753_v26, %v5076_v61  ;;  %v5738_v56 = vld [vmem:[#allocation2 + $0x8c] sm:$0xf] }
 0x404   :  { %2504 = vst.msk [vmem:[#allocation2 + $0xd8] sm:$0xf] %vm1886_vm3, %v2500_v4 }
 0x405   :  { %3267 = vmatmul.bf16.gmra.mxu3 %v5079_v3 }
 0x409   :  { %v2532_v45 = vpop.permute.xlu2 %2531  ;;  %v2498_v20 = vpop.permute.xlu1 %2497 }
 0x40a   :  { %2503 = vst.msk [vmem:[#allocation2 + $0xc8] sm:$0xf] %vm1886_vm3, %v2498_v20  ;;  %v2510_v38 = vpop.permute.xlu0 %2509  ;;  %v3209_v20 = vpop.f32.mrf.mxu2 }
 0x40b   :  { %2515 = vst.msk [vmem:[#allocation2 + $0xcc] sm:$0xf] %vm1864_vm1, %v2510_v38  ;;  %v5748_v28 = vld [vmem:[#allocation2 + $0xd4] sm:$0xf0] }
 0x40c   :  { %2525 = vst.msk [vmem:[#allocation2 + $0xcc] sm:$0xf] %vm1875_vm2, %v2520_v5 }
 0x411   :  { %v2566_v47 = vpop.permute.xlu2 %2565  ;;  %v2512_v33 = vpop.permute.xlu1 %2511  ;;  %v5050_v10 = vld [vmem:[#allocation2 + $0xc8] sm:$0xf] }
 0x412   :  { %2516 = vst.msk [vmem:[#allocation2 + $0xdc] sm:$0xf] %vm1864_vm1, %v2512_v33  ;;  %v2522_v59 = vpop.permute.xlu0 %2521  ;;  %v5051_v7 = vor.u32 %v5748_v28, %v5050_v10  ;;  %v5023_v33 = vor.u32 %v5738_v56, %v5020_v29  ;;  %v3205_v10 = vadd.f32 %v7471_v37, %v3204_v63  ;;  %v7726_v55 = vpop.f32.mrf.mxu2  ;;  %v8189_v56 = vld [vmem:[#allocation23_spill] sm:$0xff] }
 0x413   :  { %2526 = vst.msk [vmem:[#allocation2 + $0xdc] sm:$0xf] %vm1875_vm2, %v2522_v59 }
 0x414   :  { %2536 = vst.msk [vmem:[#allocation2 + $0xdc] sm:$0xf] %vm1886_vm3, %v2532_v45  ;;  %3311 = vmatmul.bf16.gmra.mxu2 %v5051_v7 }
 0x415   :  { %3335 = vmatmul.bf16.vlgmr.msra.gmra.mxu3 %v4959_v23  ;;  %v5742_v23 = vld [vmem:[#allocation2 + $0xac] sm:$0xf] }
 0x419   :  { %v2578_v58 = vpop.permute.xlu2 %2577  ;;  %v2530_v0 = vpop.permute.xlu1 %2529 }
 0x41a   :  { %2535 = vst.msk [vmem:[#allocation2 + $0xcc] sm:$0xf] %vm1886_vm3, %v2530_v0  ;;  %v2556_v16 = vpop.permute.xlu0 %2555 }
 0x41b   :  { %2561 = vst.msk [vmem:[#allocation2 + $0xe8] sm:$0xf] %vm1864_vm1, %v2556_v16  ;;  %v3214_v16 = vpop.f32.mrf.mxu2  ;;  %v5052_v53 = vld [vmem:[#allocation2 + $0xd8] sm:$0xf0] }
 0x41c   :  { %2571 = vst.msk [vmem:[#allocation2 + $0xe8] sm:$0xf] %vm1875_vm2, %v2566_v47 }
 0x421   :  { %v2558_v41 = vpop.permute.xlu1 %2557  ;;  %v2596_v2 = vpop.permute.xlu2 %2595 }
 0x422   :  { %2562 = vst.msk [vmem:[#allocation2 + $0xf8] sm:$0xf] %vm1864_vm1, %v2558_v41  ;;  %v2568_v35 = vpop.permute.xlu0 %2567 }
 0x423   :  { %2572 = vst.msk [vmem:[#allocation2 + $0xf8] sm:$0xf] %vm1875_vm2, %v2568_v35  ;;  %v7728_v60 = vpop.f32.mrf.mxu2  ;;  %v5746_v35 = vld [vmem:[#allocation2 + $0xcc] sm:$0xf] }
 0x424   :  { %2582 = vst.msk [vmem:[#allocation2 + $0xf8] sm:$0xf] %vm1886_vm3, %v2578_v58  ;;  %v5036_v58 = vld [vmem:[#allocation2 + $0xb8] sm:$0xf0] }
 0x425   :  { %3340 = vmatmul.bf16.gmra.mxu3 %v4975_v42  ;;  %v5039_v0 = vor.u32 %v5742_v23, %v5036_v58  ;;  %v3210_v42 = vadd.f32 %v7471_v37, %v3209_v20  ;;  %v8191_v58 = vld [vmem:[#allocation25_spill] sm:$0xff] }
 0x429   :  { %v2576_v50 = vpop.permute.xlu1 %2575  ;;  %v2608_v13 = vpop.permute.xlu2 %2607 }
 0x42a   :  { %2581 = vst.msk [vmem:[#allocation2 + $0xe8] sm:$0xf] %vm1886_vm3, %v2576_v50  ;;  %v2586_v52 = vpop.permute.xlu0 %2585 }
 0x42b   :  { %2591 = vst.msk [vmem:[#allocation2 + $0xec] sm:$0xf] %vm1864_vm1, %v2586_v52  ;;  %v5752_v62 = vld [vmem:[#allocation2 + $0xf4] sm:$0xf0]  ;;  %v3282_v50 = vpop.f32.mrf.mxu2 }
 0x42c   :  { %2601 = vst.msk [vmem:[#allocation2 + $0xec] sm:$0xf] %vm1875_vm2, %v2596_v2  ;;  %v5055_v2 = vor.u32 %v5746_v35, %v5052_v53 }
 0x431   :  { %v2588_v1 = vpop.permute.xlu1 %2587  ;;  %v5066_v39 = vld [vmem:[#allocation2 + $0xe8] sm:$0xf]  ;;  %v2642_v11 = vpop.permute.xlu2 %2641 }
 0x432   :  { %2592 = vst.msk [vmem:[#allocation2 + $0xfc] sm:$0xf] %vm1864_vm1, %v2588_v1  ;;  %v2598_v44 = vpop.permute.xlu0 %2597  ;;  %v5067_v22 = vor.u32 %v5752_v62, %v5066_v39 }
 0x433   :  { %2602 = vst.msk [vmem:[#allocation2 + $0xfc] sm:$0xf] %vm1875_vm2, %v2598_v44  ;;  %v3284_v39 = vpop.f32.mrf.mxu2 }
 0x434   :  { %2612 = vst.msk [vmem:[#allocation2 + $0xfc] sm:$0xf] %vm1886_vm3, %v2608_v13  ;;  %3316 = vmatmul.bf16.gmra.mxu2 %v5067_v22  ;;  %v3215_v22 = vadd.f32 %v7471_v37, %v3214_v16 }
 0x435   :  { %3345 = vmatmul.bf16.gmra.mxu3 %v4991_v27 }
 0x439   :  { %v2606_v12 = vpop.permute.xlu1 %2605  ;;  %v2654_v36 = vpop.permute.xlu2 %2653 }
 0x43a   :  { %2611 = vst.msk [vmem:[#allocation2 + $0xec] sm:$0xf] %vm1886_vm3, %v2606_v12  ;;  %v2632_v14 = vpop.permute.xlu0 %2631 }
 0x43b   :  { %2637 = vst.msk [vmem:[#allocation2 + $0x108] sm:$0xf] %vm1864_vm1, %v2632_v14  ;;  %v5068_v62 = vld [vmem:[#allocation2 + $0xf8] sm:$0xf0] }
 0x43c   :  { %2647 = vst.msk [vmem:[#allocation2 + $0x108] sm:$0xf] %vm1875_vm2, %v2642_v11  ;;  %v3287_v11 = vpop.f32.mrf.mxu2 }
 0x441   :  { %v2634_v34 = vpop.permute.xlu1 %2633  ;;  %v2672_v4 = vpop.permute.xlu2 %2671  ;;  %v5750_v1 = vld [vmem:[#allocation2 + $0xec] sm:$0xf] }
 0x442   :  { %2638 = vst.msk [vmem:[#allocation2 + $0x118] sm:$0xf] %vm1864_vm1, %v2634_v34  ;;  %v2644_v17 = vpop.permute.xlu0 %2643  ;;  %v5071_v44 = vor.u32 %v5750_v1, %v5068_v62  ;;  %v8187_v34 = vld [vmem:[#allocation21_spill] sm:$0xff] }
 0x443   :  { %2648 = vst.msk [vmem:[#allocation2 + $0x118] sm:$0xf] %vm1875_vm2, %v2644_v17  ;;  %v3283_v17 = vadd.f32 %v3282_v50, %v8187_v34 }
 0x444   :  { %2658 = vst.msk [vmem:[#allocation2 + $0x118] sm:$0xf] %vm1886_vm3, %v2654_v36  ;;  %v3289_v36 = vpop.f32.mrf.mxu2 }
 0x445   :  { %3350 = vmatmul.bf16.gmra.mxu3 %v5007_v21 }
 0x449   :  { %v2652_v19 = vpop.permute.xlu1 %2651  ;;  %v2684_v45 = vpop.permute.xlu2 %2683 }
 0x44a   :  { %2657 = vst.msk [vmem:[#allocation2 + $0x108] sm:$0xf] %vm1886_vm3, %v2652_v19  ;;  %v2662_v5 = vpop.permute.xlu0 %2661 }
 0x44b   :  { %2667 = vst.msk [vmem:[#allocation2 + $0x10c] sm:$0xf] %vm1864_vm1, %v2662_v5  ;;  %v5756_v3 = vld [vmem:[#allocation2 + $0x114] sm:$0xf0] }
 0x44c   :  { %2677 = vst.msk [vmem:[#allocation2 + $0x10c] sm:$0xf] %vm1875_vm2, %v2672_v4  ;;  %v8188_v4 = vld [vmem:[#allocation22_spill] sm:$0xff] }
 0x44d   :  { %v3177_v19 = vadd.f32 %v7471_v37, %v8188_v4 }
 0x451   :  { %v2664_v26 = vpop.permute.xlu1 %2663  ;;  %v5082_v61 = vld [vmem:[#allocation2 + $0x108] sm:$0xf] }
 0x452   :  { %2668 = vst.msk [vmem:[#allocation2 + $0x11c] sm:$0xf] %vm1864_vm1, %v2664_v26  ;;  %v5083_v38 = vor.u32 %v5756_v3, %v5082_v61  ;;  %v2674_v47 = vpop.permute.xlu0 %2673  ;;  %v3231_v26 = vadd.f32 %v8189_v56, %v3177_v19  ;;  %v3192_v19 = vadd.f32 %v7471_v37, %v7439_v51 }
 0x453   :  { %2678 = vst.msk [vmem:[#allocation2 + $0x11c] sm:$0xf] %vm1875_vm2, %v2674_v47 }
 0x454   :  { %3321 = vmatmul.bf16.gmra.mxu2 %v5083_v38  ;;  %2688 = vst.msk [vmem:[#allocation2 + $0x11c] sm:$0xf] %vm1886_vm3, %v2684_v45  ;;  %v3285_v3 = vadd.f32 %v3284_v39, %v3231_v26  ;;  %v3292_v45 = vpop.f32.mrf.mxu2  ;;  %v3246_v56 = vadd.f32 %v7447_v18, %v3192_v19 }
 0x455   :  { %3355 = vmatmul.bf16.gmra.mxu3 %v5023_v33  ;;  %v8190_v33 = vld [vmem:[#allocation24_spill] sm:$0xff]  ;;  %v3293_v62 = vadd.f32 %v3292_v45, %v7191_v25 }
 0x458   :  { %v3258_v28 = vpop.f32.mrf.mxu3 }
 0x459   :  { %v7723_v59 = vadd.f32 %v3258_v28, %v3205_v10  ;;  %v2682_v7 = vpop.permute.xlu1 %2681  ;;  %v3288_v10 = vadd.f32 %v3287_v11, %v8190_v33  ;;  %v3197_v33 = vadd.f32 %v7471_v37, %v7527_v54  ;;  %v5808_v54 = vld [vmem:[%s8140_s5 + $0x70] sm:$0xff] }
 0x45a   :  { %2687 = vst.msk [vmem:[#allocation2 + $0x10c] sm:$0xf] %vm1886_vm3, %v2682_v7 }
 0x45b   :  { %v5084_v63 = vld [vmem:[#allocation2 + $0x118] sm:$0xf0] }
 0x45c   :  { %v3294_v23 = vpop.f32.mrf.mxu2 }
 0x460   :  { %v7730_v41 = vpop.f32.mrf.mxu3 }
 0x461   :  { %v5754_v14 = vld [vmem:[#allocation2 + $0x10c] sm:$0xf] }
 0x462   :  { %v5087_v15 = vor.u32 %v5754_v14, %v5084_v63 }
 0x464   :  { %v3297_v1 = vpop.f32.mrf.mxu2 }
 0x465   :  { %3360 = vmatmul.bf16.gmra.mxu3 %v5039_v0  ;;  %v3182_v0 = vadd.f32 %v7471_v37, %v8191_v58  ;;  %v3298_v25 = vadd.f32 %v3297_v1, %v7407_v40 }
 0x467   :  { %v3236_v35 = vadd.f32 %v7184_v49, %v3182_v0 }
 0x46c   :  { %v3299_v63 = vpop.f32.mrf.mxu2 }
 0x475   :  { %3365 = vmatmul.bf16.gmra.mxu3 %v5055_v2  ;;  %v3290_v2 = vadd.f32 %v3289_v36, %v3236_v35 }
 0x478   :  { %v3263_v52 = vpop.f32.mrf.mxu3 }
 0x479   :  { %v7733_v13 = vadd.f32 %v3263_v52, %v3210_v42 }
 0x480   :  { %v7735_v9 = vpop.f32.mrf.mxu3 }
 0x485   :  { %3370 = vmatmul.bf16.gmra.mxu3 %v5071_v44 }
 0x488   :  { %v3268_v6 = vpop.f32.mrf.mxu3 }
 0x489   :  { %v7738_v27 = vadd.f32 %v3268_v6, %v3215_v22  ;;  %v3187_v6 = vadd.f32 %v7471_v37, %v7389_v24  ;;  %v5801_v24 = vld [vmem:[%s8140_s5 + $0x38] sm:$0xff] }
 0x48a   :  { %3796 = vmatpush.bf16.msrb.mxu2 %v5801_v24  ;;  %v5807_v24 = vld [vmem:[%s8140_s5 + $0x68] sm:$0xff] }
 0x48b   :  { %v3241_v49 = vadd.f32 %v7397_v32, %v3187_v6 }
 0x490   :  { %v7740_v12 = vpop.f32.mrf.mxu3 }
 0x495   :  { %3375 = vmatmul.bf16.gmra.mxu3 %v5087_v15  ;;  %v3295_v15 = vadd.f32 %v3294_v23, %v3241_v49 }
 0x498   :  { %v3336_v48 = vpop.f32.mrf.mxu3 }
 0x499   :  { %v3337_v21 = vadd.f32 %v3336_v48, %v3283_v17 }
 0x49b   :  { %v3381_v5 = vmax.f32 %v3337_v21, 0.0  ;;  %v3302_v21 = vpop.f32.mrf.mxu2 }
 0x49d   :  { %v3399_v61 = vpack.c.bf16 %v3381_v5, %v3381_v5 }
 0x49f   :  { %3418 = vst.msk [vmem:[#allocation3] sm:$0xf] %vm3417_vm4, %v3399_v61  ;;  %v3300_v61 = vadd.f32 %v3299_v63, %v3246_v56 }
 0x4a0   :  { %v3338_v20 = vpop.f32.mrf.mxu3 }
 0x4a1   :  { %v3339_v38 = vadd.f32 %v3338_v20, %v3285_v3 }
 0x4a3   :  { %v3382_v29 = vmax.f32 %v3339_v38, 0.0  ;;  %v3304_v45 = vpop.f32.mrf.mxu2 }
 0x4a5   :  { %v3400_v47 = vpack.c.bf16 %v3382_v29, %v3382_v29  ;;  %v5809_v29 = vld [vmem:[%s8140_s5 + $0x78] sm:$0xff] }
 0x4a6   :  { %3810 = vmatpush.bf16.msrb.mxu3 %v5809_v29  ;;  %v5795_v29 = vld [vmem:[%s8140_s5 + $0x8] sm:$0xff] }
 0x4a7   :  { %3419 = vst.msk [vmem:[#allocation3 + $0x14] sm:$0xf] %vm3417_vm4, %v3400_v47  ;;  %v3303_v47 = vadd.f32 %v3302_v21, %v7481_v30  ;;  %v5800_v30 = vld [vmem:[%s8140_s5 + $0x30] sm:$0xff] }
 0x4a8   :  { %v3341_v28 = vpop.f32.mrf.mxu3  ;;  %3797 = vmatpush.bf16.msrb.mxu2 %v5800_v30 }
 0x4a9   :  { %v3342_v7 = vadd.f32 %v3341_v28, %v3288_v10 }
 0x4aa   :  { %3811 = vmatpush.bf16.msrb.mxu3 %v5808_v54 }
 0x4ab   :  { %v3383_v16 = vmax.f32 %v3342_v7, 0.0  ;;  %v3307_v28 = vpop.f32.mrf.mxu2  ;;  %v3251_v7 = vadd.f32 %v7532_v57, %v3197_v33 }
 0x4ac   :  { %v3308_v37 = vadd.f32 %v3307_v28, %v7552_v43  ;;  %v5805_v28 = vld [vmem:[%s8140_s5 + $0x58] sm:$0xff] }
 0x4ad   :  { %v3401_v53 = vpack.c.bf16 %v3383_v16, %v3383_v16  ;;  %v3305_v58 = vadd.f32 %v3304_v45, %v3251_v7 }
 0x4ae   :  { %3812 = vmatpush.bf16.msrb.mxu3 %v5807_v24 }
 0x4af   :  { %3422 = vrot.lane.b32.xlu0 %v3401_v53, %s5907_s21 }
 0x4b0   :  { %v3343_v42 = vpop.f32.mrf.mxu3 }
 0x4b1   :  { %v3344_v50 = vadd.f32 %v3343_v42, %v3290_v2 }
 0x4b3   :  { %v3384_v52 = vmax.f32 %v3344_v50, 0.0  ;;  %v3309_v2 = vpop.f32.mrf.mxu2  ;;  %v7788_v50 = vld [vmem:[%s8139_s4] ss:$0 sm:$0xff] }
 0x4b5   :  { %v3402_v39 = vpack.c.bf16 %v3384_v52, %v3384_v52  ;;  %v3202_v52 = vadd.f32 %v7788_v50, %v7704_v8 }
 0x4b7   :  { %3424 = vrot.lane.b32.xlu1 %v3402_v39, %s5907_s21  ;;  %v3256_v43 = vadd.f32 %v7717_v46, %v3202_v52 }
 0x4b8   :  { %v3346_v44 = vpop.f32.mrf.mxu3 }
 0x4b9   :  { %v3347_v22 = vadd.f32 %v3346_v44, %v3293_v62  ;;  %v5799_v62 = vld [vmem:[%s8140_s5 + $0x28] sm:$0xff] }
 0x4ba   :  { %3798 = vmatpush.bf16.msrb.mxu2 %v5799_v62 }
 0x4bb   :  { %v3385_v11 = vmax.f32 %v3347_v22, 0.0  ;;  %v3312_v44 = vpop.f32.mrf.mxu2  ;;  %v3310_v22 = vadd.f32 %v3309_v2, %v3256_v43  ;;  %v5802_v43 = vld [vmem:[%s8140_s5 + $0x40] sm:$0xff] }
 0x4bc   :  { %v3313_v63 = vadd.f32 %v3312_v44, %v7723_v59  ;;  %v5798_v59 = vld [vmem:[%s8140_s5 + $0x20] sm:$0xff] }
 0x4bd   :  { %v3403_v14 = vpack.c.bf16 %v3385_v11, %v3385_v11 }
 0x4be   :  { %3799 = vmatpush.bf16.msrb.mxu2 %v5798_v59 }
 0x4bf   :  { %3431 = vst.msk [vmem:[#allocation3 + $0x4] sm:$0xf] %vm3417_vm4, %v3403_v14 }
 0x4c0   :  { %v3348_v36 = vpop.f32.mrf.mxu3 }
 0x4c1   :  { %v3349_v34 = vadd.f32 %v3348_v36, %v3295_v15  ;;  %v3207_v36 = vadd.f32 %v7788_v50, %v7712_v31 }
 0x4c3   :  { %v3386_v17 = vmax.f32 %v3349_v34, 0.0  ;;  %v3314_v8 = vpop.f32.mrf.mxu2 }
 0x4c5   :  { %v3404_v48 = vpack.c.bf16 %v3386_v17, %v3386_v17  ;;  %v3261_v17 = vadd.f32 %v7730_v41, %v3207_v36  ;;  %v5825_v36 = vld [vmem:[%s8140_s5 + $0xf8] sm:$0xff] }
 0x4c7   :  { %3432 = vst.msk [vmem:[#allocation3 + $0x18] sm:$0xf] %vm3417_vm4, %v3404_v48 }
 0x4c8   :  { %v3351_v4 = vpop.f32.mrf.mxu3 }
 0x4c9   :  { %v3352_v32 = vadd.f32 %v3351_v4, %v3298_v25  ;;  %v3315_v25 = vadd.f32 %v3314_v8, %v3261_v17  ;;  %v5810_v8 = vld [vmem:[%s8140_s5 + $0x80] sm:$0xff]  ;;  %v5824_v17 = vld [vmem:[%s8140_s5 + $0xf0] sm:$0xff] }
 0x4cb   :  { %v3387_v5 = vmax.f32 %v3352_v32, 0.0  ;;  %v3317_v21 = vpop.f32.mrf.mxu2 }
 0x4cc   :  { %v3318_v41 = vadd.f32 %v3317_v21, %v7733_v13  ;;  %v5806_v13 = vld [vmem:[%s8140_s5 + $0x60] sm:$0xff]  ;;  %v5827_v21 = vld [vmem:[%s8140_s5 + $0x108] sm:$0xff] }
 0x4cd   :  { %v3405_v26 = vpack.c.bf16 %v3387_v5, %v3387_v5  ;;  %v5797_v5 = vld [vmem:[%s8140_s5 + $0x18] sm:$0xff]  ;;  %3813 = vmatpush.bf16.msrb.mxu3 %v5806_v13 }
 0x4ce   :  { %3800 = vmatpush.bf16.msrb.mxu2 %v5797_v5  ;;  %v5820_v5 = vld [vmem:[%s8140_s5 + $0xd0] sm:$0xff] }
 0x4cf   :  { %3435 = vrot.lane.b32.xlu2 %v3405_v26, %s5907_s21 }
 0x4d0   :  { %v3353_v40 = vpop.f32.mrf.mxu3 }
 0x4d1   :  { %v3354_v3 = vadd.f32 %v3353_v40, %v3300_v61  ;;  %v5796_v61 = vld [vmem:[%s8140_s5 + $0x10] sm:$0xff]  ;;  %3814 = vmatpush.bf16.msrb.mxu3 %v5805_v28  ;;  %v5842_v28 = vld [vmem:[%s8142_s7 + $0x64] sm:$0xf] }
 0x4d2   :  { %3801 = vmatpush.bf16.msrb.mxu2 %v5796_v61 }
 0x4d3   :  { %v3388_v20 = vmax.f32 %v3354_v3, 0.0  ;;  %v3319_v40 = vpop.f32.mrf.mxu2  ;;  %v3212_v3 = vadd.f32 %v7788_v50, %v7726_v55  ;;  %v5794_v55 = vld [vmem:[%s8140_s5] sm:$0xff] }
 0x4d5   :  { %v3406_v38 = vpack.c.bf16 %v3388_v20, %v3388_v20  ;;  %v3266_v20 = vadd.f32 %v7735_v9, %v3212_v3  ;;  %v5818_v3 = vld [vmem:[%s8140_s5 + $0xc0] sm:$0xff] }
 0x4d6   :  { %3802 = vmatpush.bf16.msrb.mxu2 %v5795_v29 }
 0x4d7   :  { %3437 = vrot.lane.b32.xlu0 %v3406_v38, %s5907_s21 }
 0x4d8   :  { %v3356_v51 = vpop.f32.mrf.mxu3 }
 0x4d9   :  { %v3357_v18 = vadd.f32 %v3356_v51, %v3303_v47  ;;  %v3320_v47 = vadd.f32 %v3319_v40, %v3266_v20  ;;  %v5819_v40 = vld [vmem:[%s8140_s5 + $0xc8] sm:$0xff] }
 0x4da   :  { %3803 = vmatpush.bf16.msrb.mxu2 %v5794_v55 }
 0x4db   :  { %v3389_v10 = vmax.f32 %v3357_v18, 0.0  ;;  %v3322_v33 = vpop.f32.mrf.mxu2 }
 0x4dc   :  { %v3323_v7 = vadd.f32 %v3322_v33, %v7738_v27 }
 0x4dd   :  { %v3407_v23 = vpack.c.bf16 %v3389_v10, %v3389_v10 }
 0x4df   :  { %3443 = vst.msk [vmem:[#allocation3 + $0x8] sm:$0xf] %vm3417_vm4, %v3407_v23  ;;  %v5804_v23 = vld [vmem:[%s8140_s5 + $0x50] sm:$0xff] }
 0x4e0   :  { %v3358_v0 = vpop.f32.mrf.mxu3  ;;  %3815 = vmatpush.bf16.msrb.mxu3 %v5804_v23  ;;  %v5433_v23 = vld [vmem:[%s8142_s7 + $0x70] sm:$0xf0] }
 0x4e1   :  { %v3359_v16 = vadd.f32 %v3358_v0, %v3305_v58  ;;  %v3217_v0 = vadd.f32 %v7788_v50, %v7728_v60 }
 0x4e3   :  { %v3390_v35 = vmax.f32 %v3359_v16, 0.0 }
 0x4e5   :  { %v3408_v53 = vpack.c.bf16 %v3390_v35, %v3390_v35  ;;  %v3324_v35 = vpop.f32.mrf.mxu2 }
 0x4e7   :  { %3444 = vst.msk [vmem:[#allocation3 + $0x1c] sm:$0xf] %vm3417_vm4, %v3408_v53  ;;  %v3271_v53 = vadd.f32 %v7740_v12, %v3217_v0  ;;  %v5803_v12 = vld [vmem:[%s8140_s5 + $0x48] sm:$0xff]  ;;  %v5436_v0 = vor.u32 %v5842_v28, %v5433_v23 }
 0x4e8   :  { %v3361_v57 = vpop.f32.mrf.mxu3  ;;  %3816 = vmatpush.bf16.msrb.mxu3 %v5803_v12  ;;  %v5383_v12 = vld [vmem:[%s8142_s7] sm:$0xf] }
 0x4e9   :  { %v3362_v42 = vadd.f32 %v3361_v57, %v3308_v37  ;;  %v3325_v37 = vadd.f32 %v3324_v35, %v3271_v53  ;;  %v5417_v35 = vld [vmem:[%s8142_s7 + $0x50] sm:$0xf0] }
 0x4eb   :  { %v3391_v1 = vmax.f32 %v3362_v42, 0.0 }
 0x4ec   :  { %3817 = vmatpush.bf16.msrb.mxu3 %v5802_v43  ;;  %v5830_v43 = vld [vmem:[%s8142_s7 + $0x4] sm:$0xf] }
 0x4ed   :  { %v3409_v39 = vpack.c.bf16 %v3391_v1, %v3391_v1  ;;  %v5817_v1 = vld [vmem:[%s8140_s5 + $0xb8] sm:$0xff] }
 0x4ee   :  { %3824 = vmatpush.bf16.msra.mxu2 %v5817_v1  ;;  %v5832_v1 = vld [vmem:[%s8142_s7 + $0xc] sm:$0xf0] }
 0x4ef   :  { %3447 = vrot.lane.b32.xlu1 %v3409_v39, %s5907_s21  ;;  %v5816_v39 = vld [vmem:[%s8140_s5 + $0xb0] sm:$0xff] }
 0x4f0   :  { %v3363_v6 = vpop.f32.mrf.mxu3  ;;  %3838 = vmatpush.bf16.msra.mxu3 %v5825_v36  ;;  %v5425_v36 = vld [vmem:[%s8142_s7 + $0x58] sm:$0xf0] }
 0x4f1   :  { %v3364_v11 = vadd.f32 %v3363_v6, %v3310_v22  ;;  %v5815_v6 = vld [vmem:[%s8140_s5 + $0xa8] sm:$0xff] }
 0x4f2   :  { %3825 = vmatpush.bf16.msra.mxu2 %v5816_v39  ;;  %v5384_v39 = vor.u32 %v5832_v1, %v5383_v12  ;;  %v5846_v12 = vld [vmem:[%s8143_s9] sm:$0xff] }
 0x4f3   :  { %v3392_v49 = vmax.f32 %v3364_v11, 0.0  ;;  %v5814_v11 = vld [vmem:[%s8140_s5 + $0xa0] sm:$0xff] }
 0x4f4   :  { %3839 = vmatpush.bf16.msra.mxu3 %v5824_v17  ;;  %v5854_v1 = vld [vmem:[%s8143_s9 + $0x40] sm:$0xff] }
 0x4f5   :  { %v3410_v14 = vpack.c.bf16 %v3392_v49, %v3392_v49  ;;  %v5813_v49 = vld [vmem:[%s8140_s5 + $0x98] sm:$0xff] }
 0x4f6   :  { %3826 = vmatpush.bf16.msra.mxu2 %v5815_v6  ;;  %v5845_v6 = vld [vmem:[%s8142_s7 + $0x74] sm:$0xf0] }
 0x4f7   :  { %3449 = vrot.lane.b32.xlu2 %v3410_v14, %s5907_s21  ;;  %v5812_v14 = vld [vmem:[%s8140_s5 + $0x90] sm:$0xff] }
 0x4f8   :  { %v3366_v46 = vpop.f32.mrf.mxu3 }
 0x4f9   :  { %v3367_v15 = vadd.f32 %v3366_v46, %v3313_v63  ;;  %v5811_v63 = vld [vmem:[%s8140_s5 + $0x88] sm:$0xff] }
 0x4fa   :  { %3827 = vmatpush.bf16.msra.mxu2 %v5814_v11  ;;  %v5843_v11 = vld [vmem:[%s8142_s7 + $0x6c] sm:$0xf] }
 0x4fb   :  { %v3393_v34 = vmax.f32 %v3367_v15, 0.0  ;;  %v5829_v15 = vld [vmem:[%s8140_s5 + $0x118] sm:$0xff] }
 0x4fd   :  { %v3411_v48 = vpack.c.bf16 %v3393_v34, %v3393_v34  ;;  %v5828_v34 = vld [vmem:[%s8140_s5 + $0x110] sm:$0xff] }
 0x4fe   :  { %3828 = vmatpush.bf16.msra.mxu2 %v5813_v49 }
 0x4ff   :  { %3455 = vst.msk [vmem:[#allocation3 + $0xc] sm:$0xf] %vm3417_vm4, %v3411_v48 }
 0x500   :  { %v3368_v4 = vpop.f32.mrf.mxu3 }
 0x501   :  { %v3369_v32 = vadd.f32 %v3368_v4, %v3315_v25  ;;  %v5826_v4 = vld [vmem:[%s8140_s5 + $0x100] sm:$0xff] }
 0x502   :  { %3829 = vmatpush.bf16.msra.mxu2 %v5812_v14  ;;  %v5441_v14 = vld [vmem:[%s8142_s7 + $0x78] sm:$0xf0] }
 0x503   :  { %v3394_v31 = vmax.f32 %v3369_v32, 0.0  ;;  %v5823_v32 = vld [vmem:[%s8140_s5 + $0xe8] sm:$0xff] }
 0x504   :  { %3840 = vmatpush.bf16.msra.mxu3 %v5823_v32 }
 0x505   :  { %v3412_v19 = vpack.c.bf16 %v3394_v31, %v3394_v31  ;;  %v5822_v31 = vld [vmem:[%s8140_s5 + $0xe0] sm:$0xff] }
 0x506   :  { %3830 = vmatpush.bf16.msra.mxu2 %v5811_v63  ;;  %v5423_v63 = vld [vmem:[%s8142_s7 + $0x48] sm:$0xf] }
 0x507   :  { %3456 = vst.msk [vmem:[#allocation3 + $0x20] sm:$0xf] %vm3417_vm4, %v3412_v19 }
 0x508   :  { %v3371_v56 = vpop.f32.mrf.mxu3  ;;  %3841 = vmatpush.bf16.msra.mxu3 %v5822_v31 }
 0x509   :  { %v3372_v26 = vadd.f32 %v3371_v56, %v3318_v41  ;;  %v5821_v41 = vld [vmem:[%s8140_s5 + $0xd8] sm:$0xff] }
 0x50a   :  { %3831 = vmatpush.bf16.msra.mxu2 %v5810_v8  ;;  %v5841_v8 = vld [vmem:[%s8142_s7 + $0x54] sm:$0xf0] }
 0x50b   :  { %v3395_v45 = vmax.f32 %v3372_v26, 0.0 }
 0x50c   :  { %3842 = vmatpush.bf16.msra.mxu3 %v5821_v41  ;;  %v5833_v41 = vld [vmem:[%s8142_s7 + $0x14] sm:$0xf0] }
 0x50d   :  { %v3413_v38 = vpack.c.bf16 %v3395_v45, %v3395_v45 }
 0x50f   :  { %3459 = vrot.lane.b32.xlu0 %v3413_v38, %s5907_s21 }
 0x510   :  { %v3373_v51 = vpop.f32.mrf.mxu3  ;;  %3843 = vmatpush.bf16.msra.mxu3 %v5820_v5  ;;  %v5831_v5 = vld [vmem:[%s8142_s7 + $0xc] sm:$0xf] }
 0x511   :  { %v3374_v18 = vadd.f32 %v3373_v51, %v3320_v47 }
 0x513   :  { %v3396_v10 = vmax.f32 %v3374_v18, 0.0 }
 0x514   :  { %3844 = vmatpush.bf16.msra.mxu3 %v5819_v40 }
 0x515   :  { %v3414_v9 = vpack.c.bf16 %v3396_v10, %v3396_v10  ;;  %v5431_v10 = vld [vmem:[%s8142_s7 + $0x60] sm:$0xf] }
 0x517   :  { %3461 = vrot.lane.b32.xlu1 %v3414_v9, %s5907_s21  ;;  %v5844_v9 = vld [vmem:[%s8142_s7 + $0x6c] sm:$0xf0] }
 0x518   :  { %v3376_v58 = vpop.f32.mrf.mxu3  ;;  %3845 = vmatpush.bf16.msra.mxu3 %v5818_v3 }
 0x519   :  { %v3377_v30 = vadd.f32 %v3376_v58, %v3323_v7  ;;  %v5432_v7 = vor.u32 %v5844_v9, %v5431_v10  ;;  %v5415_v58 = vld [vmem:[%s8142_s7 + $0x40] sm:$0xf] }
 0x51b   :  { %v3397_v16 = vmax.f32 %v3377_v30, 0.0  ;;  %v5840_v30 = vld [vmem:[%s8142_s7 + $0x4c] sm:$0xf0] }
 0x51c   :  { %v5416_v53 = vor.u32 %v5840_v30, %v5415_v58 }
 0x51d   :  { %v3415_v2 = vpack.c.bf16 %v3397_v16, %v3397_v16  ;;  %v5838_v16 = vld [vmem:[%s8142_s7 + $0x44] sm:$0xf] }
 0x51f   :  { %3467 = vst.msk [vmem:[#allocation3 + $0x10] sm:$0xf] %vm3417_vm4, %v3415_v2  ;;  %v5420_v2 = vor.u32 %v5838_v16, %v5417_v35  ;;  %v5852_v16 = vld [vmem:[%s8143_s9 + $0x30] sm:$0xff] }
 0x520   :  { %v3378_v27 = vpop.f32.mrf.mxu3  ;;  %v5860_v35 = vld [vmem:[%s8143_s9 + $0x70] sm:$0xff] }
 0x521   :  { %v3379_v54 = vadd.f32 %v3378_v27, %v3325_v37  ;;  %v3423_v57 = vpop.permute.xlu0 %3422  ;;  %v5399_v27 = vld [vmem:[%s8142_s7 + $0x20] sm:$0xf] }
 0x522   :  { %3429 = vst.msk [vmem:[#allocation3] sm:$0xf] %vm3428_vm5, %v3423_v57  ;;  %v5834_v57 = vld [vmem:[%s8142_s7 + $0x24] sm:$0xf] }
 0x523   :  { %v3398_v42 = vmax.f32 %v3379_v54, 0.0  ;;  %v5836_v54 = vld [vmem:[%s8142_s7 + $0x2c] sm:$0xf0] }
 0x525   :  { %v3416_v52 = vpack.c.bf16 %v3398_v42, %v3398_v42  ;;  %v5400_v42 = vor.u32 %v5836_v54, %v5399_v27  ;;  %v5858_v27 = vld [vmem:[%s8143_s9 + $0x60] sm:$0xff]  ;;  %v5849_v54 = vld [vmem:[%s8143_s9 + $0x18] sm:$0xff] }
 0x526   :  { %v5234_v13 = vld [vmem:[#allocation3 + $0x10] sm:$0xf] }
 0x527   :  { %3468 = vst.msk [vmem:[#allocation3 + $0x24] sm:$0xf] %vm3417_vm4, %v3416_v52  ;;  %v5401_v52 = vld [vmem:[%s8142_s7 + $0x30] sm:$0xf0] }
 0x529   :  { %v3436_v60 = vpop.permute.xlu2 %3435  ;;  %v3425_v50 = vpop.permute.xlu1 %3424  ;;  %v5218_v62 = vld [vmem:[#allocation3] sm:$0xf] }
 0x52a   :  { %3441 = vst.msk [vmem:[#allocation3 + $0x4] sm:$0xf] %vm3428_vm5, %v3436_v60 }
 0x52b   :  { %3430 = vst.msk [vmem:[#allocation3 + $0x14] sm:$0xf] %vm3428_vm5, %v3425_v50  ;;  %v5404_v50 = vor.u32 %v5834_v57, %v5401_v52  ;;  %v5857_v57 = vld [vmem:[%s8143_s9 + $0x58] sm:$0xff]  ;;  %v5856_v52 = vld [vmem:[%s8143_s9 + $0x50] sm:$0xff] }
 0x52e   :  { %v5793_v45 = vld [vmem:[#allocation3 + $0x20] sm:$0xf0] }
 0x52f   :  { %v5235_v20 = vor.u32 %v5793_v45, %v5234_v13 }
 0x531   :  { %v5789_v25 = vld [vmem:[#allocation3 + $0x4] sm:$0xf] }
 0x532   :  { %v5791_v44 = vld [vmem:[#allocation3 + $0x10] sm:$0xf0] }
 0x533   :  { %v5219_v22 = vor.u32 %v5791_v44, %v5218_v62  ;;  %v5385_v62 = vld [vmem:[%s8142_s7 + $0x10] sm:$0xf0] }
 0x534   :  { %v5388_v44 = vor.u32 %v5830_v43, %v5385_v62  ;;  %v5869_v43 = vld [vmem:[%s8143_s9 + $0xb8] sm:$0xff]  ;;  %v5868_v62 = vld [vmem:[%s8143_s9 + $0xb0] sm:$0xff] }
 0x535   :  { %3804 = vmatmul.bf16.vlgmr.msrb.gmra.mxu2 %v5219_v22  ;;  %v5439_v22 = vld [vmem:[%s8142_s7 + $0x68] sm:$0xf] }
 0x536   :  { %3856 = vmatpush.bf16.msrb.mxu2 %v5829_v15  ;;  %v5440_v49 = vor.u32 %v5845_v6, %v5439_v22  ;;  %v5839_v15 = vld [vmem:[%s8142_s7 + $0x4c] sm:$0xf] }
 0x537   :  { %v5428_v17 = vor.u32 %v5839_v15, %v5425_v36  ;;  %v5867_v22 = vld [vmem:[%s8143_s9 + $0xa8] sm:$0xff] }
 0x538   :  { %v5875_v6 = vld [vmem:[%s8143_s9 + $0xe8] sm:$0xff] }
 0x539   :  { %v5863_v15 = vld [vmem:[%s8143_s9 + $0x88] sm:$0xff] }
 0x53a   :  { %3857 = vmatpush.bf16.msrb.mxu2 %v5828_v34  ;;  %v5424_v34 = vor.u32 %v5841_v8, %v5423_v63  ;;  %v5873_v63 = vld [vmem:[%s8143_s9 + $0xd8] sm:$0xff]  ;;  %v5864_v8 = vld [vmem:[%s8143_s9 + $0x90] sm:$0xff]  ;;  %v5871_v36 = vld [vmem:[%s8143_s9 + $0xc8] sm:$0xff] }
 0x53e   :  { %3858 = vmatpush.bf16.msrb.mxu2 %v5827_v21  ;;  %v5409_v21 = vld [vmem:[%s8142_s7 + $0x38] sm:$0xf0] }
 0x542   :  { %3859 = vmatpush.bf16.msrb.mxu2 %v5826_v4 }
 0x549   :  { %v3438_v46 = vpop.permute.xlu0 %3437 }
 0x54a   :  { %3442 = vst.msk [vmem:[#allocation3 + $0x18] sm:$0xf] %vm3428_vm5, %v3438_v46  ;;  %v5444_v46 = vor.u32 %v5843_v11, %v5441_v14  ;;  %v5866_v11 = vld [vmem:[%s8143_s9 + $0xa0] sm:$0xff]  ;;  %v5865_v14 = vld [vmem:[%s8143_s9 + $0x98] sm:$0xff] }
 0x551   :  { %v3450_v48 = vpop.permute.xlu2 %3449  ;;  %v5220_v24 = vld [vmem:[#allocation3 + $0x14] sm:$0xf0] }
 0x552   :  { %3454 = vst.msk [vmem:[#allocation3 + $0x1c] sm:$0xf] %vm3428_vm5, %v3450_v48  ;;  %v5223_v59 = vor.u32 %v5789_v25, %v5220_v24  ;;  %v5407_v48 = vld [vmem:[%s8142_s7 + $0x28] sm:$0xf]  ;;  %v5837_v25 = vld [vmem:[%s8142_s7 + $0x34] sm:$0xf0] }
 0x553   :  { %v5408_v32 = vor.u32 %v5837_v25, %v5407_v48  ;;  %v3885_v48 = vld [vmem:[%s8145_s8] sm:$0xf] }
 0x554   :  { %3818 = vmatmul.bf16.vlgmr.msrb.gmra.mxu3 %v5223_v59  ;;  %v5835_v59 = vld [vmem:[%s8142_s7 + $0x2c] sm:$0xf] }
 0x555   :  { %3982 = vmatpush.bf16.msrb.mxu3 %v5432_v7  ;;  %v5412_v31 = vor.u32 %v5835_v59, %v5409_v21  ;;  %v3887_v59 = vperm.slane %v3885_v48, 0  ;;  %v3888_v21 = vperm.slane %v3885_v48, 1 }
 0x559   :  { %v5792_v26 = vld [vmem:[#allocation3 + $0x18] sm:$0xf0]  ;;  %3983 = vmatpush.bf16.msrb.mxu3 %v5416_v53  ;;  %v5851_v53 = vld [vmem:[%s8143_s9 + $0x28] sm:$0xff] }
 0x55d   :  { %3984 = vmatpush.bf16.msrb.mxu3 %v5400_v42  ;;  %v5848_v42 = vld [vmem:[%s8143_s9 + $0x10] sm:$0xff] }
 0x561   :  { %v3448_v19 = vpop.permute.xlu1 %3447  ;;  %3985 = vmatpush.bf16.msrb.mxu3 %v5384_v39  ;;  %v5877_v39 = vld [vmem:[%s8143_s9 + $0xf8] sm:$0xff] }
 0x562   :  { %3453 = vst.msk [vmem:[#allocation3 + $0x8] sm:$0xf] %vm3428_vm5, %v3448_v19  ;;  %v5391_v19 = vld [vmem:[%s8142_s7 + $0x8] sm:$0xf] }
 0x569   :  { %v5226_v56 = vld [vmem:[#allocation3 + $0x8] sm:$0xf] }
 0x56a   :  { %v5227_v61 = vor.u32 %v5792_v26, %v5226_v56  ;;  %v5393_v56 = vld [vmem:[%s8142_s7 + $0x18] sm:$0xf0]  ;;  %v5899_v26 = vld [vmem:[%s8141_s6] ss:$0 sm:$0xff] }
 0x56b   :  { %v5396_v40 = vor.u32 %v5831_v5, %v5393_v56 }
 0x56c   :  { %3832 = vmatmul.bf16.vlgmr.msra.gmra.mxu2 %v5227_v61  ;;  %v5392_v61 = vor.u32 %v5833_v41, %v5391_v19 }
 0x56d   :  { %3996 = vmatpush.bf16.msra.mxu2 %v5436_v0  ;;  %v5861_v0 = vld [vmem:[%s8143_s9 + $0x78] sm:$0xff] }
 0x571   :  { %3997 = vmatpush.bf16.msra.mxu2 %v5420_v2  ;;  %v5859_v2 = vld [vmem:[%s8143_s9 + $0x68] sm:$0xff] }
 0x575   :  { %3998 = vmatpush.bf16.msra.mxu2 %v5404_v50  ;;  %v5855_v50 = vld [vmem:[%s8143_s9 + $0x48] sm:$0xff] }
 0x579   :  { %3999 = vmatpush.bf16.msra.mxu2 %v5388_v44  ;;  %v5876_v44 = vld [vmem:[%s8143_s9 + $0xf0] sm:$0xff] }
 0x57c   :  { %5380 = vmatmul.msk.bf16.vlgmr.msrb.gmra.mxu2 %vm3792_vm6, %v5235_v20 }
 0x57d   :  { %4024 = vmatpush.bf16.msrb.mxu2 %v5444_v46  ;;  %v5872_v46 = vld [vmem:[%s8143_s9 + $0xd0] sm:$0xff] }
 0x581   :  { %v3460_v38 = vpop.permute.xlu0 %3459  ;;  %4025 = vmatpush.bf16.msrb.mxu2 %v5428_v17  ;;  %v5870_v17 = vld [vmem:[%s8143_s9 + $0xc0] sm:$0xff] }
 0x582   :  { %3465 = vst.msk [vmem:[#allocation3 + $0xc] sm:$0xf] %vm3428_vm5, %v3460_v38 }
 0x585   :  { %4026 = vmatpush.bf16.msrb.mxu2 %v5412_v31 }
 0x589   :  { %v3462_v29 = vpop.permute.xlu1 %3461  ;;  %v5790_v47 = vld [vmem:[#allocation3 + $0xc] sm:$0xf]  ;;  %4027 = vmatpush.bf16.msrb.mxu2 %v5396_v40 }
 0x58a   :  { %3466 = vst.msk [vmem:[#allocation3 + $0x20] sm:$0xf] %vm3428_vm5, %v3462_v29 }
 0x591   :  { %v5228_v51 = vld [vmem:[#allocation3 + $0x1c] sm:$0xf0] }
 0x592   :  { %v5231_v18 = vor.u32 %v5790_v47, %v5228_v51 }
 0x594   :  { %3846 = vmatmul.bf16.vlgmr.msra.gmra.mxu3 %v5231_v18 }
 0x595   :  { %4010 = vmatpush.bf16.msra.mxu3 %v5440_v49  ;;  %v5874_v49 = vld [vmem:[%s8143_s9 + $0xe0] sm:$0xff] }
 0x599   :  { %4011 = vmatpush.bf16.msra.mxu3 %v5424_v34  ;;  %v5862_v34 = vld [vmem:[%s8143_s9 + $0x80] sm:$0xff] }
 0x59d   :  { %4012 = vmatpush.bf16.msra.mxu3 %v5408_v32 }
 0x5a1   :  { %4013 = vmatpush.bf16.msra.mxu3 %v5392_v61 }
 0x5b8   :  { %v7918_v55 = vpop.f32.mrf.mxu2 }
 0x5b9   :  { %v3806_v3 = vadd.f32 %v5899_v26, %v7918_v55  ;;  %v5853_v55 = vld [vmem:[%s8143_s9 + $0x38] sm:$0xff] }
 0x5c0   :  { %v7920_v33 = vpop.f32.mrf.mxu2 }
 0x5c1   :  { %v3808_v38 = vadd.f32 %v5899_v26, %v7920_v33 }
 0x5d7   :  { %v3819_v60 = vpop.f32.mrf.mxu3 }
 0x5d8   :  { %v3820_v20 = vadd.f32 %v3819_v60, %v3806_v3  ;;  %v5847_v60 = vld [vmem:[%s8143_s9 + $0x8] sm:$0xff] }
 0x5df   :  { %v3821_v4 = vpop.f32.mrf.mxu3 }
 0x5e0   :  { %v3822_v47 = vadd.f32 %v3821_v4, %v3808_v38  ;;  %v3889_v38 = vperm.slane %v3885_v48, 2 }
 0x5ef   :  { %v3833_v37 = vpop.f32.mrf.mxu2 }
 0x5f0   :  { %v3834_v29 = vadd.f32 %v3833_v37, %v3820_v20  ;;  %v5850_v37 = vld [vmem:[%s8143_s9 + $0x20] sm:$0xff] }
 0x5f7   :  { %v3835_v24 = vpop.f32.mrf.mxu2 }
 0x5f8   :  { %v3836_v18 = vadd.f32 %v3835_v24, %v3822_v47 }
 0x5ff   :  { %v3861_v45 = vpop.f32.mrf.mxu2 }
 0x607   :  { %v3863_v7 = vpop.f32.mrf.mxu2 }
 0x617   :  { %v3847_v13 = vpop.f32.mrf.mxu3 }
 0x618   :  { %v3848_v51 = vadd.f32 %v3847_v13, %v3834_v29  ;;  %v3890_v29 = vperm.slane %v3885_v48, 3 }
 0x61a   :  { %v3862_v9 = vadd.f32 %v3861_v45, %v3848_v51 }
 0x61c   :  { %v3866_v58 = vmax.f32 %v3862_v9, 0.0 }
 0x61f   :  { %v3849_v10 = vpop.f32.mrf.mxu3 }
 0x620   :  { %v3850_v28 = vadd.f32 %v3849_v10, %v3836_v18 }
 0x622   :  { %v3864_v23 = vadd.f32 %v3863_v7, %v3850_v28 }
 0x624   :  { %v3867_v30 = vmax.f32 %v3864_v23, 0.0 }
 0x626   :  { %v3868_v33 = vpack.c.bf16 %v3867_v30, %v3866_v58 }
 0x628   :  { %5445 = vmatmul.msk.bf16.vlgmr.msrb.gmra.mxu3 %vm3792_vm6, %v3868_v33  ;;  %5446 = vmatmul.msk.bf16.vlgmr.msra.gmra.mxu2 %vm3792_vm6, %v3868_v33 }
 0x629   :  { %4306 = vmatpush.bf16.msrb.mxu3 %v5853_v55  ;;  %4320 = vmatpush.bf16.msra.mxu2 %v5861_v0 }
 0x62d   :  { %4307 = vmatpush.bf16.msrb.mxu3 %v5852_v16  ;;  %4321 = vmatpush.bf16.msra.mxu2 %v5860_v35  ;;  %v5900_v35 = vld [vmem:[%s8144_s10] ss:$0 sm:$0xff] }
 0x631   :  { %4308 = vmatpush.bf16.msrb.mxu3 %v5851_v53  ;;  %4322 = vmatpush.bf16.msra.mxu2 %v5859_v2 }
 0x635   :  { %4309 = vmatpush.bf16.msrb.mxu3 %v5850_v37  ;;  %4323 = vmatpush.bf16.msra.mxu2 %v5858_v27 }
 0x638   :  { %5447 = vmatmul.msk.bf16.vlgmr.msra.gmra.mxu3 %vm3792_vm6, %v3868_v33  ;;  %5448 = vmatmul.msk.bf16.vlgmr.msrb.gmra.mxu2 %vm3792_vm6, %v3868_v33 }
 0x639   :  { %4310 = vmatpush.bf16.msrb.mxu3 %v5849_v54  ;;  %4324 = vmatpush.bf16.msra.mxu2 %v5857_v57 }
 0x63d   :  { %4311 = vmatpush.bf16.msrb.mxu3 %v5848_v42  ;;  %4325 = vmatpush.bf16.msra.mxu2 %v5856_v52 }
 0x641   :  { %4312 = vmatpush.bf16.msrb.mxu3 %v5847_v60  ;;  %4326 = vmatpush.bf16.msra.mxu2 %v5855_v50 }
 0x645   :  { %4313 = vmatpush.bf16.msrb.mxu3 %v5846_v12  ;;  %4327 = vmatpush.bf16.msra.mxu2 %v5854_v1 }
 0x649   :  { %4334 = vmatpush.bf16.msra.mxu3 %v5869_v43  ;;  %4348 = vmatpush.bf16.msrb.mxu2 %v5877_v39 }
 0x64d   :  { %4335 = vmatpush.bf16.msra.mxu3 %v5868_v62  ;;  %4349 = vmatpush.bf16.msrb.mxu2 %v5876_v44 }
 0x651   :  { %4336 = vmatpush.bf16.msra.mxu3 %v5867_v22  ;;  %4350 = vmatpush.bf16.msrb.mxu2 %v5875_v6 }
 0x655   :  { %4337 = vmatpush.bf16.msra.mxu3 %v5866_v11  ;;  %4351 = vmatpush.bf16.msrb.mxu2 %v5874_v49 }
 0x659   :  { %4338 = vmatpush.bf16.msra.mxu3 %v5865_v14  ;;  %4352 = vmatpush.bf16.msrb.mxu2 %v5873_v63 }
 0x65d   :  { %4339 = vmatpush.bf16.msra.mxu3 %v5864_v8  ;;  %4353 = vmatpush.bf16.msrb.mxu2 %v5872_v46 }
 0x661   :  { %4340 = vmatpush.bf16.msra.mxu3 %v5863_v15  ;;  %4354 = vmatpush.bf16.msrb.mxu2 %v5871_v36 }
 0x665   :  { %4341 = vmatpush.bf16.msra.mxu3 %v5862_v34  ;;  %4355 = vmatpush.bf16.msrb.mxu2 %v5870_v17 }
 0x6ab   :  { %v3987_v25 = vpop.f32.mrf.mxu3  ;;  %v4001_v24 = vpop.f32.mrf.mxu2 }
 0x6ac   :  { %v3988_v4 = vadd.f32 %v3987_v25, %v3887_v59  ;;  %v4002_v32 = vadd.f32 %v4001_v24, %v3888_v21 }
 0x6ae   :  { %v4034_v56 = vmax.f32 %v3988_v4, 0.0  ;;  %v4035_v26 = vmax.f32 %v4002_v32, 0.0 }
 0x6b3   :  { %v3989_v31 = vpop.f32.mrf.mxu3  ;;  %v4003_v19 = vpop.f32.mrf.mxu2 }
 0x6b4   :  { %v3990_v41 = vadd.f32 %v3989_v31, %v3887_v59  ;;  %v4004_v5 = vadd.f32 %v4003_v19, %v3888_v21 }
 0x6b6   :  { %v4038_v61 = vmax.f32 %v3990_v41, 0.0  ;;  %v4039_v40 = vmax.f32 %v4004_v5, 0.0 }
 0x6b8   :  { %v4042_v3 = vpack.c.bf16 %v4038_v61, %v4034_v56  ;;  %v4043_v45 = vpack.c.bf16 %v4039_v40, %v4035_v26 }
 0x6ba   :  { %4314 = vmatmul.bf16.vlgmr.msrb.gmra.mxu3 %v4042_v3  ;;  %4328 = vmatmul.bf16.vlgmr.msra.gmra.mxu2 %v4043_v45 }
 0x6bb   :  { %v4015_v13 = vpop.f32.mrf.mxu3  ;;  %v4029_v20 = vpop.f32.mrf.mxu2 }
 0x6bc   :  { %v4016_v47 = vadd.f32 %v4015_v13, %v3889_v38  ;;  %v4030_v51 = vadd.f32 %v4029_v20, %v3890_v29 }
 0x6be   :  { %v4036_v7 = vmax.f32 %v4016_v47, 0.0  ;;  %v4037_v23 = vmax.f32 %v4030_v51, 0.0 }
 0x6c3   :  { %v4017_v18 = vpop.f32.mrf.mxu3  ;;  %v4031_v10 = vpop.f32.mrf.mxu2 }
 0x6c4   :  { %v4018_v9 = vadd.f32 %v4017_v18, %v3889_v38  ;;  %v4032_v28 = vadd.f32 %v4031_v10, %v3890_v29 }
 0x6c6   :  { %v4040_v58 = vmax.f32 %v4018_v9, 0.0  ;;  %v4041_v30 = vmax.f32 %v4032_v28, 0.0 }
 0x6c8   :  { %v4044_v55 = vpack.c.bf16 %v4040_v58, %v4036_v7  ;;  %v4045_v0 = vpack.c.bf16 %v4041_v30, %v4037_v23 }
 0x6ca   :  { %4342 = vmatmul.bf16.vlgmr.msra.gmra.mxu3 %v4044_v55  ;;  %4356 = vmatmul.bf16.vlgmr.msrb.gmra.mxu2 %v4045_v0 }
 0x73d   :  { %v4315_v33 = vpop.f32.mrf.mxu3  ;;  %v4329_v16 = vpop.f32.mrf.mxu2 }
 0x73e   :  { %v4316_v37 = vadd.f32 %v5900_v35, %v4315_v33 }
 0x740   :  { %v4330_v27 = vadd.f32 %v4329_v16, %v4316_v37 }
 0x745   :  { %v4317_v53 = vpop.f32.mrf.mxu3  ;;  %v4331_v2 = vpop.f32.mrf.mxu2 }
 0x746   :  { %v4318_v52 = vadd.f32 %v5900_v35, %v4317_v53 }
 0x748   :  { %v4332_v50 = vadd.f32 %v4331_v2, %v4318_v52 }
 0x74d   :  { %v4343_v54 = vpop.f32.mrf.mxu3  ;;  %v4357_v57 = vpop.f32.mrf.mxu2 }
 0x74e   :  { %v4344_v42 = vadd.f32 %v4343_v54, %v4330_v27 }
 0x750   :  { %v4358_v60 = vadd.f32 %v4357_v57, %v4344_v42 }
 0x752   :  { %4362 = vst [vmem:[%s8146_s11] sm:$0xff] %v4358_v60 }
 0x755   :  { %v4345_v12 = vpop.f32.mrf.mxu3  ;;  %v4359_v43 = vpop.f32.mrf.mxu2 }
 0x756   :  { %v4346_v1 = vadd.f32 %v4345_v12, %v4332_v50 }
 0x758   :  { %v4360_v39 = vadd.f32 %v4359_v43, %v4346_v1 }
 0x75a   :  { %4363 = vst [vmem:[%s8146_s11 + $0x8] sm:$0xff] %v4360_v39 }

</bundles_post_ra>
